<compile_context>
chip_gen: v7x
topology: tpu7x:2x2x1
jax: 0.10.0
libtpu: 0.0.40
codegen_flags: <defaults>
</compile_context>

<pallas_src>
import math
import functools

import jax
import jax.numpy as jnp
from jax.experimental import pallas as pl
from jax.experimental.pallas import tpu as pltpu

# ----------------------------- small synthetic config ------------------------------
C = 3              # image channels
P = 4              # patch size            (real model: 14)
S0 = 16            # base / split size     (real model: 336)
S2_SCALES = [16, 32, 48]   # sorted; split size = S2_SCALES[0], image size = S2_SCALES[-1]
G = S0 // P        # patches per side of one tile  -> 4
SEQ = G * G + 1    # tokens per tile (CLS + patches) -> 17
D = 32             # hidden size           (real model: 1024)
H = 2              # attention heads
DH = D // H        # head dim -> 16
MLP = 4 * D        # mlp hidden -> 128
NUM_LAYERS = 2
SELECT_LAYER = -2          # args.mm_vision_select_layer
SELECT_FEATURE = 'patch'   # drop CLS token
LN_EPS = 1e-5
ATTN_SCALE = DH ** -0.5

ACT_DTYPE = jnp.bfloat16   # weights/activations; matmuls accumulate in f32


def _round_up(x, m):
    return (x + m - 1) // m * m


SEQ_PAD = _round_up(SEQ, 8)   # tokens padded ONCE (17 -> 24); pad keys masked in attention


# --------------------------- generation-gated budgets ---------------------------

@functools.lru_cache(maxsize=1)
def _vmem_budget():
    try:
        cap = int(pltpu.get_tpu_info().vmem_capacity_bytes)
    except Exception:
        cap = 64 * 1024 * 1024            # conservative (v7x-sized) fallback
    # leave headroom for double-buffering / scratch, never exceed ~96 MiB
    return max(32 * 1024 * 1024, min(cap - 16 * 1024 * 1024, 96 * 1024 * 1024))


@functools.lru_cache(maxsize=1)
def _tm_max():
    # smaller M tiles on 64 MiB-VMEM parts (v7x) so weight-resident matmuls still fit
    return 256 if _vmem_budget() <= 48 * 1024 * 1024 else 512


def _compiler_params(n_parallel_axes):
    return pltpu.CompilerParams(
        dimension_semantics=tuple(["parallel"] * n_parallel_axes),
        vmem_limit_bytes=_vmem_budget())


def _pick_tm(M):
    """Largest M-tile (multiple of 8, <= TM_MAX) that divides M; otherwise pad."""
    tmax = _tm_max()
    if M % 8 == 0 and M >= 8:
        start = min(tmax, M)
        start -= start % 8
        for tm in range(start, 7, -8):
            if M % tm == 0:
                return tm, M
    tm = min(tmax, _round_up(max(M, 8), 8))
    return tm, _round_up(M, tm)


# =============================== Pallas kernels ===============================

def _make_matmul_kernel(has_bias, has_ln, act, has_res):
    """y = [LN](x) @ W [+ b] [quick_gelu] [+ residual], f32 accumulation."""
    def kernel(*refs):
        it = iter(refs)
        x_ref = next(it)
        w_ref = next(it)
        b_ref = next(it) if has_bias else None
        g_ref = next(it) if has_ln else None
        bt_ref = next(it) if has_ln else None
        r_ref = next(it) if has_res else None
        o_ref = next(it)

        x = x_ref[...]
        if has_ln:                               # LayerNorm stats in f32 (once per x tile)
            xf = x.astype(jnp.float32)
            mean = jnp.mean(xf, axis=-1, keepdims=True)
            var = jnp.mean((xf - mean) ** 2, axis=-1, keepdims=True)
            xf = (xf - mean) * jax.lax.rsqrt(var + LN_EPS)
            xf = xf * g_ref[...] + bt_ref[...]   # gamma/beta already f32
            x = xf.astype(w_ref.dtype)
        y = jnp.dot(x, w_ref[...], preferred_element_type=jnp.float32)
        if has_bias:
            y = y + b_ref[...]
        if act == 'quick_gelu':                  # HF CLIP quick_gelu: x * sigmoid(1.702 x)
            y = y * jax.nn.sigmoid(1.702 * y)
        if has_res:
            y = y + r_ref[...].astype(jnp.float32)
        o_ref[...] = y.astype(o_ref.dtype)
    return kernel


def fused_linear(x2, w, b=None, *, ln=None, act=None, residual=None, out_dtype=None):
    """Weight-resident fused matmul.  x2:(M,K)  w:(K,N)  b:(N,)|None
    ln:(gamma,beta)|None  residual:(M,N)|None.  Output (M, N).

    The full (K, N) weight is one VMEM-resident block (constant index_map); only the
    M axis is tiled.  Tokens are padded once upstream, so the pad path below is
    normally dead.
    """
    M, K = x2.shape
    N = w.shape[1]
    out_dtype = out_dtype or x2.dtype
    tm, Mp = _pick_tm(M)

    if Mp != M:
        x2 = jnp.pad(x2, ((0, Mp - M), (0, 0)))
        if residual is not None:
            residual = jnp.pad(residual, ((0, Mp - M), (0, 0)))

    # TODO(synk): at real CLIP-L sizes, if (K, N) does not fit the VMEM budget, tile N
    # with the N axis as the OUTER grid axis so the weight tile stays resident per sweep.
    inputs = [x2, w]
    in_specs = [
        pl.BlockSpec((tm, K), lambda i: (i, 0)),
        pl.BlockSpec((K, N), lambda i: (0, 0)),   # resident weight: constant index_map
    ]
    if b is not None:
        inputs.append(b.reshape(1, N).astype(jnp.float32))
        in_specs.append(pl.BlockSpec((1, N), lambda i: (0, 0)))
    if ln is not None:
        g, bt = ln
        inputs.append(g.reshape(1, K).astype(jnp.float32))
        inputs.append(bt.reshape(1, K).astype(jnp.float32))
        in_specs.append(pl.BlockSpec((1, K), lambda i: (0, 0)))
        in_specs.append(pl.BlockSpec((1, K), lambda i: (0, 0)))
    if residual is not None:
        inputs.append(residual)
        in_specs.append(pl.BlockSpec((tm, N), lambda i: (i, 0)))

    kernel = _make_matmul_kernel(b is not None, ln is not None, act, residual is not None)
    out = pl.pallas_call(
        kernel,
        out_shape=jax.ShapeDtypeStruct((Mp, N), out_dtype),
        grid=(Mp // tm,),
        in_specs=in_specs,
        out_specs=pl.BlockSpec((tm, N), lambda i: (i, 0)),
        compiler_params=_compiler_params(1),
    )(*inputs)
    return out[:M] if Mp != M else out


def _embed_kernel(x_ref, w_ref, cls_ref, pos_ref, g_ref, b_ref, o_ref):
    """patch-embed matmul + CLS concat + pos add + pre_layernorm + token padding, fused.

    x:(1,GG,CPP)  w:(CPP,D)  cls:(1,D)f32  pos:(SEQ,D)f32  g/b:(1,D)f32  o:(1,SEQ_PAD,D)
    """
    pe = jnp.dot(x_ref[0], w_ref[...], preferred_element_type=jnp.float32)     # (GG, D)
    emb = jnp.concatenate([cls_ref[...], pe], axis=0) + pos_ref[...]           # (SEQ, D)
    if SEQ_PAD > SEQ:
        emb = jnp.concatenate(
            [emb, jnp.zeros((SEQ_PAD - SEQ, emb.shape[1]), jnp.float32)], axis=0)
    mean = jnp.mean(emb, axis=-1, keepdims=True)
    var = jnp.mean((emb - mean) ** 2, axis=-1, keepdims=True)
    y = (emb - mean) * jax.lax.rsqrt(var + LN_EPS)
    y = y * g_ref[...] + b_ref[...]
    o_ref[0] = y.astype(o_ref.dtype)


def embed_and_preln(patches, params):
    """patches: (Nt, G*G, C*P*P) -> pre-LN'd, token-padded hidden states (Nt, SEQ_PAD, D)."""
    Nt = patches.shape[0]
    GG = G * G
    CPP = C * P * P
    return pl.pallas_call(
        _embed_kernel,
        out_shape=jax.ShapeDtypeStruct((Nt, SEQ_PAD, D), ACT_DTYPE),
        grid=(Nt,),
        in_specs=[
            pl.BlockSpec((1, GG, CPP), lambda i: (i, 0, 0)),
            pl.BlockSpec((CPP, D), lambda i: (0, 0)),
            pl.BlockSpec((1, D), lambda i: (0, 0)),
            pl.BlockSpec((SEQ, D), lambda i: (0, 0)),
            pl.BlockSpec((1, D), lambda i: (0, 0)),
            pl.BlockSpec((1, D), lambda i: (0, 0)),
        ],
        out_specs=pl.BlockSpec((1, SEQ_PAD, D), lambda i: (i, 0, 0)),
        compiler_params=_compiler_params(1),
    )(patches, params['patch_w'],
      params['class_emb'].reshape(1, D).astype(jnp.float32),
      params['pos_emb'].astype(jnp.float32),
      params['pre_ln_g'].reshape(1, D).astype(jnp.float32),
      params['pre_ln_b'].reshape(1, D).astype(jnp.float32))


def _attn_kernel(qkv_ref, o_ref):
    """One batch-tile program: all heads.  qkv block (1, SEQ_PAD, 3D); attention scale is
    pre-folded into the q weight columns; padded key tokens are masked out."""
    qkv = qkv_ref[0]                      # (SEQ_PAD, 3D) bf16
    if SEQ_PAD > SEQ:
        key_idx = jax.lax.broadcasted_iota(jnp.int32, (SEQ_PAD, SEQ_PAD), 1)
        key_mask = key_idx < SEQ
    # TODO(synk): at real sizes (S=577, DH=64) use flash-style q-row blocking and
    # lane-dense 2-head (128-lane) slabs instead of per-head sub-128-lane slices.
    for h in range(H):
        q = qkv[:, h * DH:(h + 1) * DH]
        k = qkv[:, D + h * DH: D + (h + 1) * DH]
        v = qkv[:, 2 * D + h * DH: 2 * D + (h + 1) * DH]
        # q @ k^T without an explicit transpose (contract last dims), f32 scores
        s = jax.lax.dot_general(q, k, (((1,), (1,)), ((), ())),
                                preferred_element_type=jnp.float32)
        if SEQ_PAD > SEQ:
            s = jnp.where(key_mask, s, -1e30)
        m = jnp.max(s, axis=-1, keepdims=True)
        p = jnp.exp(s - m)
        p = p * pl.reciprocal(jnp.sum(p, axis=-1, keepdims=True), approx=True)
        o = jnp.dot(p.astype(v.dtype), v, preferred_element_type=jnp.float32)
        # store this head's output directly (no trailing concatenate / relayout)
        o_ref[0, :, h * DH:(h + 1) * DH] = o.astype(o_ref.dtype)


def attention(qkv):
    """qkv: (Nt, SEQ_PAD, 3D) -> (Nt, SEQ_PAD, D); grid over batch tiles."""
    Nt, S, _ = qkv.shape
    return pl.pallas_call(
        _attn_kernel,
        out_shape=jax.ShapeDtypeStruct((Nt, S, D), qkv.dtype),
        grid=(Nt,),
        in_specs=[pl.BlockSpec((1, S, 3 * D), lambda i: (i, 0, 0))],
        out_specs=pl.BlockSpec((1, S, D), lambda i: (i, 0, 0)),
        compiler_params=_compiler_params(1),
    )(qkv)


# =========================== CLIP vision transformer ===========================

def encoder_layer(h, lp):
    """HF CLIPEncoderLayer: pre-LN attention block + pre-LN quick_gelu MLP block."""
    Nt, S, Dd = h.shape
    h2 = h.reshape(Nt * S, Dd)
    # --- self attention: LN1 fused into the fused QKV projection (D -> 3D) ---
    qkv = fused_linear(h2, lp['qkv_w'], lp['qkv_b'], ln=(lp['ln1_g'], lp['ln1_b']))
    attn = attention(qkv.reshape(Nt, S, 3 * Dd))                    # (Nt, S, D)
    # out projection with residual add fused into the epilogue
    h2 = fused_linear(attn.reshape(Nt * S, Dd), lp['o_w'], lp['o_b'], residual=h2)
    # --- MLP: LN2 + fc1 + quick_gelu fused, then fc2 + residual fused ---
    x = fused_linear(h2, lp['fc1_w'], lp['fc1_b'],
                     ln=(lp['ln2_g'], lp['ln2_b']), act='quick_gelu')
    h2 = fused_linear(x, lp['fc2_w'], lp['fc2_b'], residual=h2)
    return h2.reshape(Nt, S, Dd)


def forward_feature(params, tiles):
    """CLIPVisionTowerS2.forward_feature for a batch of fixed-size tiles.

    tiles: (Nt, C, S0, S0) NCHW  ->  (Nt, G*G, D)  (hidden_states[SELECT_LAYER], CLS dropped)
    """
    Nt = tiles.shape[0]
    # im2col: stride-P conv (bias=False) == matmul over flattened (c, ph, pw) patches
    x = tiles.reshape(Nt, C, G, P, G, P).transpose(0, 2, 4, 1, 3, 5)
    x = x.reshape(Nt, G * G, C * P * P).astype(ACT_DTYPE)
    # patch-embed + CLS concat + pos-emb + pre_layernorm + token padding in ONE kernel
    h = embed_and_preln(x, params)                                   # (Nt, SEQ_PAD, D)

    # hidden_states[SELECT_LAYER]: only run the layers that contribute to the output
    if SELECT_LAYER < 0:
        n_run = NUM_LAYERS + 1 + SELECT_LAYER
    else:
        n_run = SELECT_LAYER
    n_run = max(0, min(n_run, NUM_LAYERS))
    for lp in params['layers'][:n_run]:
        h = encoder_layer(h, lp)

    if SELECT_FEATURE == 'patch':
        feats = h[:, 1:SEQ, :]           # drop CLS token and token padding
    else:
        feats = h[:, :SEQ, :]            # 'cls_patch'
    return feats.astype(jnp.float32)


# ================================ S2 wrapper ================================
# JAX re-implementation of s2wrapper.forward (scaling_on_scales), output_shape='bnc'.

def split_chessboard(x, n):
    B, Cc, Hh, Ww = x.shape
    h, w = Hh // n, Ww // n
    tiles = [x[:, :, i * h:(i + 1) * h, j * w:(j + 1) * w]
             for i in range(n) for j in range(n)]
    return jnp.concatenate(tiles, axis=0)


def merge_chessboard(x, n):
    Bn = x.shape[0]
    b = Bn // (n * n)
    rows = []
    for i in range(n):
        cols = [x[(i * n + j) * b:(i * n + j + 1) * b] for j in range(n)]
        rows.append(jnp.concatenate(cols, axis=-1))
    return jnp.concatenate(rows, axis=-2)


def multiscale_forward(params, images, img_sizes, max_split_size):
    B, Cc, _, _ = images.shape
    num_splits = [math.ceil(s / max_split_size) for s in img_sizes]

    # resize + chessboard-split every scale, then run the tower ONCE on all tiles
    tile_batches = []
    for size, n in zip(img_sizes, num_splits):
        # TODO(synk): PyTorch F.interpolate(mode='bicubic') uses a=-0.75 cubic kernel;
        # jax.image.resize 'cubic' uses Keys a=-0.5, so values differ slightly at resized scales.
        x = jax.image.resize(images.astype(jnp.float32), (B, Cc, size, size),
                             method='cubic', antialias=False)
        tile_batches.append(split_chessboard(x, n))                  # (n*n*B, C, S0, S0)
    counts = [n * n * B for n in num_splits]
    all_tiles = jnp.concatenate(tile_batches, axis=0)                # (sum(n^2)*B, C, S0, S0)
    all_feats = forward_feature(params, all_tiles)                   # (sum(n^2)*B, G*G, D) f32

    outs = []
    off = 0
    for n, cnt in zip(num_splits, counts):
        feats = all_feats[off:off + cnt]
        off += cnt
        g = G
        feats = feats.reshape(cnt, g, g, D).transpose(0, 3, 1, 2)    # b c h w
        outs.append(merge_chessboard(feats, n))                      # (B, D, n*g, n*g)

    out_size = outs[0].shape[-1]
    merged = []
    for o in outs:
        f = o.shape[-1] // out_size
        # F.interpolate(mode='area') with integer ratio == average pooling
        o = o.reshape(B, D, out_size, f, out_size, f).mean(axis=(3, 5))
        merged.append(o)
    out = jnp.concatenate(merged, axis=1)                            # (B, D*num_scales, g, g)
    out = out.transpose(0, 2, 3, 1).reshape(B, out_size * out_size, -1)  # b (h w) c
    return out.astype(images.dtype)


@jax.jit
def s2_vision_tower_forward(params, images):
    """CLIPVisionTowerS2.forward for a batched (non-list) input."""
    return multiscale_forward(params, images, img_sizes=S2_SCALES,
                              max_split_size=S2_SCALES[0])


# ============================ deterministic params ============================

def init_params(key):
    keys = jax.random.split(key, 64)
    it = iter(keys)

    def nrm(shape, std=0.02):
        return jax.random.normal(next(it), shape, jnp.float32) * std

    params = {
        'patch_w': nrm((C * P * P, D)).astype(ACT_DTYPE),   # conv weight reshaped, bias=False
        'class_emb': nrm((D,)).astype(ACT_DTYPE),
        'pos_emb': nrm((SEQ, D)).astype(ACT_DTYPE),
        'pre_ln_g': jnp.ones((D,), jnp.float32),
        'pre_ln_b': jnp.zeros((D,), jnp.float32),
        'layers': [],
    }
    for _ in range(NUM_LAYERS):
        q_w, k_w, v_w = nrm((D, D)), nrm((D, D)), nrm((D, D))
        q_b = jnp.zeros((D,), jnp.float32)
        k_b = jnp.zeros((D,), jnp.float32)
        v_b = jnp.zeros((D,), jnp.float32)
        # fuse q/k/v into one (D, 3D) projection; fold attention scale into the q part
        qkv_w = jnp.concatenate([q_w * ATTN_SCALE, k_w, v_w], axis=1).astype(ACT_DTYPE)
        qkv_b = jnp.concatenate([q_b * ATTN_SCALE, k_b, v_b], axis=0)
        params['layers'].append({
            'ln1_g': jnp.ones((D,), jnp.float32), 'ln1_b': jnp.zeros((D,), jnp.float32),
            'qkv_w': qkv_w, 'qkv_b': qkv_b,
            'o_w': nrm((D, D)).astype(ACT_DTYPE), 'o_b': jnp.zeros((D,), jnp.float32),
            'ln2_g': jnp.ones((D,), jnp.float32), 'ln2_b': jnp.zeros((D,), jnp.float32),
            'fc1_w': nrm((D, MLP)).astype(ACT_DTYPE), 'fc1_b': jnp.zeros((MLP,), jnp.float32),
            'fc2_w': nrm((MLP, D)).astype(ACT_DTYPE), 'fc2_b': jnp.zeros((D,), jnp.float32),
        })
    return params


# ==================================== main ====================================

if __name__ == "__main__":
    key = jax.random.PRNGKey(0)
    pkey, xkey = jax.random.split(key)
    params = init_params(pkey)

    B = 2
    # input images at the S2 image size (largest scale), NCHW like PyTorch
    images = jax.random.normal(xkey, (B, C, S2_SCALES[-1], S2_SCALES[-1]), jnp.float32)

    out = s2_vision_tower_forward(params, images)
    out = jax.block_until_ready(out)

    expected = (B, G * G, D * len(S2_SCALES))   # (B, num_patches, hidden_size * num_scales)
    assert out.shape == expected, (out.shape, expected)
    assert bool(jnp.all(jnp.isfinite(out.astype(jnp.float32))))
    print("KERNEL_OK")
</pallas_src>

<mosaic_0001>
module attributes {stable_mosaic.version = 11 : i64} {
  func.func @_embed_kernel(%arg0: i32, %arg1: memref<1x16x48xbf16, #tpu.memory_space<vmem>>, %arg2: memref<48x32xbf16, #tpu.memory_space<vmem>>, %arg3: memref<1x32xf32, #tpu.memory_space<vmem>>, %arg4: memref<17x32xf32, #tpu.memory_space<vmem>>, %arg5: memref<1x32xf32, #tpu.memory_space<vmem>>, %arg6: memref<1x32xf32, #tpu.memory_space<vmem>>, %arg7: memref<1x24x32xbf16, #tpu.memory_space<vmem>>) attributes {dimension_semantics = [#tpu.dimension_semantics<parallel>], iteration_bounds = array<i64: 28>, scalar_prefetch = 0 : i64, scratch_operands = 0 : i64, tpu.core_type = #tpu.core_type<tc>, window_params = [{transform_indices = @transform_0, window_bounds = array<i64: 1, 16, 48>}, {pipeline_mode = #tpu.pipeline_mode<synchronous>, transform_indices = @transform_1, window_bounds = array<i64: 48, 32>}, {pipeline_mode = #tpu.pipeline_mode<synchronous>, transform_indices = @transform_2, window_bounds = array<i64: 1, 32>}, {pipeline_mode = #tpu.pipeline_mode<synchronous>, transform_indices = @transform_3, window_bounds = array<i64: 17, 32>}, {pipeline_mode = #tpu.pipeline_mode<synchronous>, transform_indices = @transform_4, window_bounds = array<i64: 1, 32>}, {pipeline_mode = #tpu.pipeline_mode<synchronous>, transform_indices = @transform_5, window_bounds = array<i64: 1, 32>}, {transform_indices = @transform_6, window_bounds = array<i64: 1, 24, 32>}]} {
    %c0 = arith.constant 0 : index
    %c0_0 = arith.constant 0 : index
    %c0_1 = arith.constant 0 : index
    %0 = vector.load %arg1[%c0, %c0_0, %c0_1] : memref<1x16x48xbf16, #tpu.memory_space<vmem>>, vector<1x16x48xbf16>
    %1 = vector.shape_cast %0 : vector<1x16x48xbf16> to vector<16x48xbf16>
    %c0_2 = arith.constant 0 : index
    %c0_3 = arith.constant 0 : index
    %2 = vector.load %arg2[%c0_2, %c0_3] : memref<48x32xbf16, #tpu.memory_space<vmem>>, vector<48x32xbf16>
    %cst = arith.constant dense<0.000000e+00> : vector<16x32xf32>
    %3 = tpu.matmul %1, %2, %cst {dimension_numbers = #tpu.dot_dimension_numbers<[1], [0], [0], [1], [0, 0, 1, 1], [], []>} : vector<16x48xbf16>, vector<48x32xbf16>, vector<16x32xf32> -> vector<16x32xf32>
    %c0_4 = arith.constant 0 : index
    %c0_5 = arith.constant 0 : index
    %4 = vector.load %arg3[%c0_4, %c0_5] : memref<1x32xf32, #tpu.memory_space<vmem>>, vector<1x32xf32>
    %5 = tpu.concatenate %4, %3 in 0 : vector<1x32xf32>, vector<16x32xf32> -> vector<17x32xf32>
    %c0_6 = arith.constant 0 : index
    %c0_7 = arith.constant 0 : index
    %6 = vector.load %arg4[%c0_6, %c0_7] : memref<17x32xf32, #tpu.memory_space<vmem>>, vector<17x32xf32>
    %7 = arith.addf %5, %6 : vector<17x32xf32>
    %cst_8 = arith.constant 0.000000e+00 : f32
    %8 = vector.broadcast %cst_8 : f32 to vector<7x32xf32>
    %9 = tpu.concatenate %7, %8 in 0 : vector<17x32xf32>, vector<7x32xf32> -> vector<24x32xf32>
    %cst_9 = arith.constant dense<0.000000e+00> : vector<24xf32>
    %10 = vector.multi_reduction <add>, %9, %cst_9 [1] : vector<24x32xf32> to vector<24xf32>
    %11 = vector.shape_cast %10 : vector<24xf32> to vector<24x1xf32>
    %cst_10 = arith.constant 3.200000e+01 : f32
    %12 = vector.broadcast %cst_10 : f32 to vector<24x1xf32>
    %13 = arith.divf %11, %12 : vector<24x1xf32>
    %14 = vector.broadcast %13 : vector<24x1xf32> to vector<24x32xf32>
    %15 = arith.subf %9, %14 : vector<24x32xf32>
    %16 = arith.mulf %15, %15 : vector<24x32xf32>
    %cst_11 = arith.constant dense<0.000000e+00> : vector<24xf32>
    %17 = vector.multi_reduction <add>, %16, %cst_11 [1] : vector<24x32xf32> to vector<24xf32>
    %18 = vector.shape_cast %17 : vector<24xf32> to vector<24x1xf32>
    %cst_12 = arith.constant 3.200000e+01 : f32
    %19 = vector.broadcast %cst_12 : f32 to vector<24x1xf32>
    %20 = arith.divf %18, %19 : vector<24x1xf32>
    %21 = vector.broadcast %13 : vector<24x1xf32> to vector<24x32xf32>
    %22 = arith.subf %9, %21 : vector<24x32xf32>
    %cst_13 = arith.constant 9.99999974E-6 : f32
    %23 = vector.broadcast %cst_13 : f32 to vector<24x1xf32>
    %24 = arith.addf %20, %23 : vector<24x1xf32>
    %25 = math.rsqrt %24 : vector<24x1xf32>
    %26 = vector.broadcast %25 : vector<24x1xf32> to vector<24x32xf32>
    %27 = arith.mulf %22, %26 : vector<24x32xf32>
    %c0_14 = arith.constant 0 : index
    %c0_15 = arith.constant 0 : index
    %28 = vector.load %arg5[%c0_14, %c0_15] : memref<1x32xf32, #tpu.memory_space<vmem>>, vector<1x32xf32>
    %29 = vector.broadcast %28 : vector<1x32xf32> to vector<24x32xf32>
    %30 = arith.mulf %27, %29 : vector<24x32xf32>
    %c0_16 = arith.constant 0 : index
    %c0_17 = arith.constant 0 : index
    %31 = vector.load %arg6[%c0_16, %c0_17] : memref<1x32xf32, #tpu.memory_space<vmem>>, vector<1x32xf32>
    %32 = vector.broadcast %31 : vector<1x32xf32> to vector<24x32xf32>
    %33 = arith.addf %30, %32 : vector<24x32xf32>
    %34 = arith.truncf %33 : vector<24x32xf32> to vector<24x32xbf16>
    %c0_18 = arith.constant 0 : index
    %c0_19 = arith.constant 0 : index
    %c0_20 = arith.constant 0 : index
    %35 = vector.load %arg7[%c0_18, %c0_19, %c0_20] : memref<1x24x32xbf16, #tpu.memory_space<vmem>>, vector<1x24x32xbf16>
    %36 = vector.shape_cast %35 : vector<1x24x32xbf16> to vector<24x32xbf16>
    %37 = vector.shape_cast %34 : vector<24x32xbf16> to vector<1x24x32xbf16>
    tpu.vector_store %arg7[%c0_18, %c0_19, %c0_20], %37 {strides = array<i32>} : memref<1x24x32xbf16, #tpu.memory_space<vmem>>, vector<1x24x32xbf16>,
    return
  }
  func.func @transform_0(%arg0: i32) -> (i32, i32, i32) {
    %c0_i32 = arith.constant 0 : i32
    %c0_i32_0 = arith.constant 0 : i32
    %c0_i32_1 = arith.constant 0 : i32
    return %arg0, %c0_i32, %c0_i32_0 : i32, i32, i32
  }
  func.func @transform_1(%arg0: i32) -> (i32, i32) {
    %c0_i32 = arith.constant 0 : i32
    %c0_i32_0 = arith.constant 0 : i32
    %c0_i32_1 = arith.constant 0 : i32
    return %c0_i32, %c0_i32_0 : i32, i32
  }
  func.func @transform_2(%arg0: i32) -> (i32, i32) {
    %c0_i32 = arith.constant 0 : i32
    %c0_i32_0 = arith.constant 0 : i32
    %c0_i32_1 = arith.constant 0 : i32
    return %c0_i32, %c0_i32_0 : i32, i32
  }
  func.func @transform_3(%arg0: i32) -> (i32, i32) {
    %c0_i32 = arith.constant 0 : i32
    %c0_i32_0 = arith.constant 0 : i32
    %c0_i32_1 = arith.constant 0 : i32
    return %c0_i32, %c0_i32_0 : i32, i32
  }
  func.func @transform_4(%arg0: i32) -> (i32, i32) {
    %c0_i32 = arith.constant 0 : i32
    %c0_i32_0 = arith.constant 0 : i32
    %c0_i32_1 = arith.constant 0 : i32
    return %c0_i32, %c0_i32_0 : i32, i32
  }
  func.func @transform_5(%arg0: i32) -> (i32, i32) {
    %c0_i32 = arith.constant 0 : i32
    %c0_i32_0 = arith.constant 0 : i32
    %c0_i32_1 = arith.constant 0 : i32
    return %c0_i32, %c0_i32_0 : i32, i32
  }
  func.func @transform_6(%arg0: i32) -> (i32, i32, i32) {
    %c0_i32 = arith.constant 0 : i32
    %c0_i32_0 = arith.constant 0 : i32
    %c0_i32_1 = arith.constant 0 : i32
    return %arg0, %c0_i32, %c0_i32_0 : i32, i32, i32
  }
}

module attributes {stable_mosaic.version = 11 : i64} {
  func.func @kernel(%arg0: i32, %arg1: memref<224x32xbf16, #tpu.memory_space<vmem>>, %arg2: memref<32x96xbf16, #tpu.memory_space<vmem>>, %arg3: memref<1x96xf32, #tpu.memory_space<vmem>>, %arg4: memref<1x32xf32, #tpu.memory_space<vmem>>, %arg5: memref<1x32xf32, #tpu.memory_space<vmem>>, %arg6: memref<224x96xbf16, #tpu.memory_space<vmem>>) attributes {dimension_semantics = [#tpu.dimension_semantics<parallel>], iteration_bounds = array<i64: 3>, scalar_prefetch = 0 : i64, scratch_operands = 0 : i64, tpu.core_type = #tpu.core_type<tc>, window_params = [{transform_indices = @transform_0, window_bounds = array<i64: 224, 32>}, {pipeline_mode = #tpu.pipeline_mode<synchronous>, transform_indices = @transform_1, window_bounds = array<i64: 32, 96>}, {pipeline_mode = #tpu.pipeline_mode<synchronous>, transform_indices = @transform_2, window_bounds = array<i64: 1, 96>}, {pipeline_mode = #tpu.pipeline_mode<synchronous>, transform_indices = @transform_3, window_bounds = array<i64: 1, 32>}, {pipeline_mode = #tpu.pipeline_mode<synchronous>, transform_indices = @transform_4, window_bounds = array<i64: 1, 32>}, {transform_indices = @transform_5, window_bounds = array<i64: 224, 96>}]} {
    %c0 = arith.constant 0 : index
    %c0_0 = arith.constant 0 : index
    %0 = vector.load %arg1[%c0, %c0_0] : memref<224x32xbf16, #tpu.memory_space<vmem>>, vector<224x32xbf16>
    %1 = arith.extf %0 : vector<224x32xbf16> to vector<224x32xf32>
    %cst = arith.constant dense<0.000000e+00> : vector<224xf32>
    %2 = vector.multi_reduction <add>, %1, %cst [1] : vector<224x32xf32> to vector<224xf32>
    %3 = vector.shape_cast %2 : vector<224xf32> to vector<224x1xf32>
    %cst_1 = arith.constant 3.200000e+01 : f32
    %4 = vector.broadcast %cst_1 : f32 to vector<224x1xf32>
    %5 = arith.divf %3, %4 : vector<224x1xf32>
    %6 = vector.broadcast %5 : vector<224x1xf32> to vector<224x32xf32>
    %7 = arith.subf %1, %6 : vector<224x32xf32>
    %8 = arith.mulf %7, %7 : vector<224x32xf32>
    %cst_2 = arith.constant dense<0.000000e+00> : vector<224xf32>
    %9 = vector.multi_reduction <add>, %8, %cst_2 [1] : vector<224x32xf32> to vector<224xf32>
    %10 = vector.shape_cast %9 : vector<224xf32> to vector<224x1xf32>
    %cst_3 = arith.constant 3.200000e+01 : f32
    %11 = vector.broadcast %cst_3 : f32 to vector<224x1xf32>
    %12 = arith.divf %10, %11 : vector<224x1xf32>
    %13 = vector.broadcast %5 : vector<224x1xf32> to vector<224x32xf32>
    %14 = arith.subf %1, %13 : vector<224x32xf32>
    %cst_4 = arith.constant 9.99999974E-6 : f32
    %15 = vector.broadcast %cst_4 : f32 to vector<224x1xf32>
    %16 = arith.addf %12, %15 : vector<224x1xf32>
    %17 = math.rsqrt %16 : vector<224x1xf32>
    %18 = vector.broadcast %17 : vector<224x1xf32> to vector<224x32xf32>
    %19 = arith.mulf %14, %18 : vector<224x32xf32>
    %c0_5 = arith.constant 0 : index
    %c0_6 = arith.constant 0 : index
    %20 = vector.load %arg4[%c0_5, %c0_6] : memref<1x32xf32, #tpu.memory_space<vmem>>, vector<1x32xf32>
    %21 = vector.broadcast %20 : vector<1x32xf32> to vector<224x32xf32>
    %22 = arith.mulf %19, %21 : vector<224x32xf32>
    %c0_7 = arith.constant 0 : index
    %c0_8 = arith.constant 0 : index
    %23 = vector.load %arg5[%c0_7, %c0_8] : memref<1x32xf32, #tpu.memory_space<vmem>>, vector<1x32xf32>
    %24 = vector.broadcast %23 : vector<1x32xf32> to vector<224x32xf32>
    %25 = arith.addf %22, %24 : vector<224x32xf32>
    %26 = arith.truncf %25 : vector<224x32xf32> to vector<224x32xbf16>
    %c0_9 = arith.constant 0 : index
    %c0_10 = arith.constant 0 : index
    %27 = vector.load %arg2[%c0_9, %c0_10] : memref<32x96xbf16, #tpu.memory_space<vmem>>, vector<32x96xbf16>
    %cst_11 = arith.constant dense<0.000000e+00> : vector<224x96xf32>
    %28 = tpu.matmul %26, %27, %cst_11 {dimension_numbers = #tpu.dot_dimension_numbers<[1], [0], [0], [1], [0, 0, 1, 1], [], []>} : vector<224x32xbf16>, vector<32x96xbf16>, vector<224x96xf32> -> vector<224x96xf32>
    %c0_12 = arith.constant 0 : index
    %c0_13 = arith.constant 0 : index
    %29 = vector.load %arg3[%c0_12, %c0_13] : memref<1x96xf32, #tpu.memory_space<vmem>>, vector<1x96xf32>
    %30 = vector.broadcast %29 : vector<1x96xf32> to vector<224x96xf32>
    %31 = arith.addf %28, %30 : vector<224x96xf32>
    %32 = arith.truncf %31 : vector<224x96xf32> to vector<224x96xbf16>
    %c0_14 = arith.constant 0 : index
    %c0_15 = arith.constant 0 : index
    %33 = vector.load %arg6[%c0_14, %c0_15] : memref<224x96xbf16, #tpu.memory_space<vmem>>, vector<224x96xbf16>
    tpu.vector_store %arg6[%c0_14, %c0_15], %32 {strides = array<i32>} : memref<224x96xbf16, #tpu.memory_space<vmem>>, vector<224x96xbf16>,
    return
  }
  func.func @transform_0(%arg0: i32) -> (i32, i32) {
    %c0_i32 = arith.constant 0 : i32
    %c0_i32_0 = arith.constant 0 : i32
    return %arg0, %c0_i32 : i32, i32
  }
  func.func @transform_1(%arg0: i32) -> (i32, i32) {
    %c0_i32 = arith.constant 0 : i32
    %c0_i32_0 = arith.constant 0 : i32
    %c0_i32_1 = arith.constant 0 : i32
    return %c0_i32, %c0_i32_0 : i32, i32
  }
  func.func @transform_2(%arg0: i32) -> (i32, i32) {
    %c0_i32 = arith.constant 0 : i32
    %c0_i32_0 = arith.constant 0 : i32
    %c0_i32_1 = arith.constant 0 : i32
    return %c0_i32, %c0_i32_0 : i32, i32
  }
  func.func @transform_3(%arg0: i32) -> (i32, i32) {
    %c0_i32 = arith.constant 0 : i32
    %c0_i32_0 = arith.constant 0 : i32
    %c0_i32_1 = arith.constant 0 : i32
    return %c0_i32, %c0_i32_0 : i32, i32
  }
  func.func @transform_4(%arg0: i32) -> (i32, i32) {
    %c0_i32 = arith.constant 0 : i32
    %c0_i32_0 = arith.constant 0 : i32
    %c0_i32_1 = arith.constant 0 : i32
    return %c0_i32, %c0_i32_0 : i32, i32
  }
  func.func @transform_5(%arg0: i32) -> (i32, i32) {
    %c0_i32 = arith.constant 0 : i32
    %c0_i32_0 = arith.constant 0 : i32
    return %arg0, %c0_i32 : i32, i32
  }
}

module attributes {stable_mosaic.version = 11 : i64} {
  func.func @_attn_kernel(%arg0: i32, %arg1: memref<1x24x96xbf16, #tpu.memory_space<vmem>>, %arg2: memref<1x24x32xbf16, #tpu.memory_space<vmem>>) attributes {dimension_semantics = [#tpu.dimension_semantics<parallel>], iteration_bounds = array<i64: 28>, scalar_prefetch = 0 : i64, scratch_operands = 0 : i64, tpu.core_type = #tpu.core_type<tc>, window_params = [{transform_indices = @transform_0, window_bounds = array<i64: 1, 24, 96>}, {transform_indices = @transform_1, window_bounds = array<i64: 1, 24, 32>}]} {
    %c0 = arith.constant 0 : index
    %c0_0 = arith.constant 0 : index
    %c0_1 = arith.constant 0 : index
    %0 = vector.load %arg1[%c0, %c0_0, %c0_1] : memref<1x24x96xbf16, #tpu.memory_space<vmem>>, vector<1x24x96xbf16>
    %1 = vector.shape_cast %0 : vector<1x24x96xbf16> to vector<24x96xbf16>
    %2 = tpu.iota {dimensions = array<i32: 1>} : vector<24x24xi32>
    %c17_i32 = arith.constant 17 : i32
    %3 = vector.broadcast %c17_i32 : i32 to vector<24x24xi32>
    %4 = arith.cmpi slt, %2, %3 : vector<24x24xi32>
    %5 = vector.extract_strided_slice %1 {offsets = [0, 0], sizes = [24, 16], strides = [1, 1]} : vector<24x96xbf16> to vector<24x16xbf16>
    %6 = vector.extract_strided_slice %1 {offsets = [0, 32], sizes = [24, 16], strides = [1, 1]} : vector<24x96xbf16> to vector<24x16xbf16>
    %7 = vector.extract_strided_slice %1 {offsets = [0, 64], sizes = [24, 16], strides = [1, 1]} : vector<24x96xbf16> to vector<24x16xbf16>
    %cst = arith.constant dense<0.000000e+00> : vector<24x24xf32>
    %8 = tpu.matmul %5, %6, %cst {dimension_numbers = #tpu.dot_dimension_numbers<[1], [1], [0], [0], [0, 0, 1, 0], [], []>} : vector<24x16xbf16>, vector<24x16xbf16>, vector<24x24xf32> -> vector<24x24xf32>
    %cst_2 = arith.constant -1.000000e+30 : f32
    %9 = vector.broadcast %cst_2 : f32 to vector<24x24xf32>
    %10 = arith.select %4, %8, %9 : vector<24x24xi1>, vector<24x24xf32>
    %cst_3 = arith.constant dense<0xFF800000> : vector<24xf32>
    %11 = vector.multi_reduction <maximumf>, %10, %cst_3 [1] : vector<24x24xf32> to vector<24xf32>
    %12 = vector.shape_cast %11 : vector<24xf32> to vector<24x1xf32>
    %13 = vector.broadcast %12 : vector<24x1xf32> to vector<24x24xf32>
    %14 = arith.subf %10, %13 : vector<24x24xf32>
    %15 = math.exp %14 : vector<24x24xf32>
    %cst_4 = arith.constant dense<0.000000e+00> : vector<24xf32>
    %16 = vector.multi_reduction <add>, %15, %cst_4 [1] : vector<24x24xf32> to vector<24xf32>
    %17 = vector.shape_cast %16 : vector<24xf32> to vector<24x1xf32>
    %18 = tpu.reciprocal %17 {approx = true} : vector<24x1xf32> -> vector<24x1xf32>
    %19 = vector.broadcast %18 : vector<24x1xf32> to vector<24x24xf32>
    %20 = arith.mulf %15, %19 : vector<24x24xf32>
    %21 = arith.truncf %20 : vector<24x24xf32> to vector<24x24xbf16>
    %cst_5 = arith.constant dense<0.000000e+00> : vector<24x16xf32>
    %22 = tpu.matmul %21, %7, %cst_5 {dimension_numbers = #tpu.dot_dimension_numbers<[1], [0], [0], [1], [0, 0, 1, 1], [], []>} : vector<24x24xbf16>, vector<24x16xbf16>, vector<24x16xf32> -> vector<24x16xf32>
    %23 = arith.truncf %22 : vector<24x16xf32> to vector<24x16xbf16>
    %c0_6 = arith.constant 0 : index
    %c0_7 = arith.constant 0 : index
    %c0_8 = arith.constant 0 : index
    %24 = vector.load %arg2[%c0_6, %c0_7, %c0_8] : memref<1x24x32xbf16, #tpu.memory_space<vmem>>, vector<1x24x16xbf16>
    %25 = vector.shape_cast %24 : vector<1x24x16xbf16> to vector<24x16xbf16>
    %26 = vector.shape_cast %23 : vector<24x16xbf16> to vector<1x24x16xbf16>
    tpu.vector_store %arg2[%c0_6, %c0_7, %c0_8], %26 {strides = array<i32>} : memref<1x24x32xbf16, #tpu.memory_space<vmem>>, vector<1x24x16xbf16>,
    %27 = vector.extract_strided_slice %1 {offsets = [0, 16], sizes = [24, 16], strides = [1, 1]} : vector<24x96xbf16> to vector<24x16xbf16>
    %28 = vector.extract_strided_slice %1 {offsets = [0, 48], sizes = [24, 16], strides = [1, 1]} : vector<24x96xbf16> to vector<24x16xbf16>
    %29 = vector.extract_strided_slice %1 {offsets = [0, 80], sizes = [24, 16], strides = [1, 1]} : vector<24x96xbf16> to vector<24x16xbf16>
    %cst_9 = arith.constant dense<0.000000e+00> : vector<24x24xf32>
    %30 = tpu.matmul %27, %28, %cst_9 {dimension_numbers = #tpu.dot_dimension_numbers<[1], [1], [0], [0], [0, 0, 1, 0], [], []>} : vector<24x16xbf16>, vector<24x16xbf16>, vector<24x24xf32> -> vector<24x24xf32>
    %cst_10 = arith.constant -1.000000e+30 : f32
    %31 = vector.broadcast %cst_10 : f32 to vector<24x24xf32>
    %32 = arith.select %4, %30, %31 : vector<24x24xi1>, vector<24x24xf32>
    %cst_11 = arith.constant dense<0xFF800000> : vector<24xf32>
    %33 = vector.multi_reduction <maximumf>, %32, %cst_11 [1] : vector<24x24xf32> to vector<24xf32>
    %34 = vector.shape_cast %33 : vector<24xf32> to vector<24x1xf32>
    %35 = vector.broadcast %34 : vector<24x1xf32> to vector<24x24xf32>
    %36 = arith.subf %32, %35 : vector<24x24xf32>
    %37 = math.exp %36 : vector<24x24xf32>
    %cst_12 = arith.constant dense<0.000000e+00> : vector<24xf32>
    %38 = vector.multi_reduction <add>, %37, %cst_12 [1] : vector<24x24xf32> to vector<24xf32>
    %39 = vector.shape_cast %38 : vector<24xf32> to vector<24x1xf32>
    %40 = tpu.reciprocal %39 {approx = true} : vector<24x1xf32> -> vector<24x1xf32>
    %41 = vector.broadcast %40 : vector<24x1xf32> to vector<24x24xf32>
    %42 = arith.mulf %37, %41 : vector<24x24xf32>
    %43 = arith.truncf %42 : vector<24x24xf32> to vector<24x24xbf16>
    %cst_13 = arith.constant dense<0.000000e+00> : vector<24x16xf32>
    %44 = tpu.matmul %43, %29, %cst_13 {dimension_numbers = #tpu.dot_dimension_numbers<[1], [0], [0], [1], [0, 0, 1, 1], [], []>} : vector<24x24xbf16>, vector<24x16xbf16>, vector<24x16xf32> -> vector<24x16xf32>
    %45 = arith.truncf %44 : vector<24x16xf32> to vector<24x16xbf16>
    %c0_14 = arith.constant 0 : index
    %c0_15 = arith.constant 0 : index
    %c16 = arith.constant 16 : index
    %46 = vector.load %arg2[%c0_14, %c0_15, %c16] : memref<1x24x32xbf16, #tpu.memory_space<vmem>>, vector<1x24x16xbf16>
    %47 = vector.shape_cast %46 : vector<1x24x16xbf16> to vector<24x16xbf16>
    %48 = vector.shape_cast %45 : vector<24x16xbf16> to vector<1x24x16xbf16>
    tpu.vector_store %arg2[%c0_14, %c0_15, %c16], %48 {strides = array<i32>} : memref<1x24x32xbf16, #tpu.memory_space<vmem>>, vector<1x24x16xbf16>,
    return
  }
  func.func @transform_0(%arg0: i32) -> (i32, i32, i32) {
    %c0_i32 = arith.constant 0 : i32
    %c0_i32_0 = arith.constant 0 : i32
    %c0_i32_1 = arith.constant 0 : i32
    return %arg0, %c0_i32, %c0_i32_0 : i32, i32, i32
  }
  func.func @transform_1(%arg0: i32) -> (i32, i32, i32) {
    %c0_i32 = arith.constant 0 : i32
    %c0_i32_0 = arith.constant 0 : i32
    %c0_i32_1 = arith.constant 0 : i32
    return %arg0, %c0_i32, %c0_i32_0 : i32, i32, i32
  }
}

module attributes {stable_mosaic.version = 11 : i64} {
  func.func @kernel(%arg0: i32, %arg1: memref<224x32xbf16, #tpu.memory_space<vmem>>, %arg2: memref<32x32xbf16, #tpu.memory_space<vmem>>, %arg3: memref<1x32xf32, #tpu.memory_space<vmem>>, %arg4: memref<224x32xbf16, #tpu.memory_space<vmem>>, %arg5: memref<224x32xbf16, #tpu.memory_space<vmem>>) attributes {dimension_semantics = [#tpu.dimension_semantics<parallel>], iteration_bounds = array<i64: 3>, scalar_prefetch = 0 : i64, scratch_operands = 0 : i64, tpu.core_type = #tpu.core_type<tc>, window_params = [{transform_indices = @transform_0, window_bounds = array<i64: 224, 32>}, {pipeline_mode = #tpu.pipeline_mode<synchronous>, transform_indices = @transform_1, window_bounds = array<i64: 32, 32>}, {pipeline_mode = #tpu.pipeline_mode<synchronous>, transform_indices = @transform_2, window_bounds = array<i64: 1, 32>}, {transform_indices = @transform_3, window_bounds = array<i64: 224, 32>}, {transform_indices = @transform_4, window_bounds = array<i64: 224, 32>}]} {
    %c0 = arith.constant 0 : index
    %c0_0 = arith.constant 0 : index
    %0 = vector.load %arg1[%c0, %c0_0] : memref<224x32xbf16, #tpu.memory_space<vmem>>, vector<224x32xbf16>
    %c0_1 = arith.constant 0 : index
    %c0_2 = arith.constant 0 : index
    %1 = vector.load %arg2[%c0_1, %c0_2] : memref<32x32xbf16, #tpu.memory_space<vmem>>, vector<32x32xbf16>
    %cst = arith.constant dense<0.000000e+00> : vector<224x32xf32>
    %2 = tpu.matmul %0, %1, %cst {dimension_numbers = #tpu.dot_dimension_numbers<[1], [0], [0], [1], [0, 0, 1, 1], [], []>} : vector<224x32xbf16>, vector<32x32xbf16>, vector<224x32xf32> -> vector<224x32xf32>
    %c0_3 = arith.constant 0 : index
    %c0_4 = arith.constant 0 : index
    %3 = vector.load %arg3[%c0_3, %c0_4] : memref<1x32xf32, #tpu.memory_space<vmem>>, vector<1x32xf32>
    %4 = vector.broadcast %3 : vector<1x32xf32> to vector<224x32xf32>
    %5 = arith.addf %2, %4 : vector<224x32xf32>
    %c0_5 = arith.constant 0 : index
    %c0_6 = arith.constant 0 : index
    %6 = vector.load %arg4[%c0_5, %c0_6] : memref<224x32xbf16, #tpu.memory_space<vmem>>, vector<224x32xbf16>
    %7 = arith.extf %6 : vector<224x32xbf16> to vector<224x32xf32>
    %8 = arith.addf %5, %7 : vector<224x32xf32>
    %9 = arith.truncf %8 : vector<224x32xf32> to vector<224x32xbf16>
    %c0_7 = arith.constant 0 : index
    %c0_8 = arith.constant 0 : index
    %10 = vector.load %arg5[%c0_7, %c0_8] : memref<224x32xbf16, #tpu.memory_space<vmem>>, vector<224x32xbf16>
    tpu.vector_store %arg5[%c0_7, %c0_8], %9 {strides = array<i32>} : memref<224x32xbf16, #tpu.memory_space<vmem>>, vector<224x32xbf16>,
    return
  }
  func.func @transform_0(%arg0: i32) -> (i32, i32) {
    %c0_i32 = arith.constant 0 : i32
    %c0_i32_0 = arith.constant 0 : i32
    return %arg0, %c0_i32 : i32, i32
  }
  func.func @transform_1(%arg0: i32) -> (i32, i32) {
    %c0_i32 = arith.constant 0 : i32
    %c0_i32_0 = arith.constant 0 : i32
    %c0_i32_1 = arith.constant 0 : i32
    return %c0_i32, %c0_i32_0 : i32, i32
  }
  func.func @transform_2(%arg0: i32) -> (i32, i32) {
    %c0_i32 = arith.constant 0 : i32
    %c0_i32_0 = arith.constant 0 : i32
    %c0_i32_1 = arith.constant 0 : i32
    return %c0_i32, %c0_i32_0 : i32, i32
  }
  func.func @transform_3(%arg0: i32) -> (i32, i32) {
    %c0_i32 = arith.constant 0 : i32
    %c0_i32_0 = arith.constant 0 : i32
    return %arg0, %c0_i32 : i32, i32
  }
  func.func @transform_4(%arg0: i32) -> (i32, i32) {
    %c0_i32 = arith.constant 0 : i32
    %c0_i32_0 = arith.constant 0 : i32
    return %arg0, %c0_i32 : i32, i32
  }
}

module attributes {stable_mosaic.version = 11 : i64} {
  func.func @kernel(%arg0: i32, %arg1: memref<224x32xbf16, #tpu.memory_space<vmem>>, %arg2: memref<32x128xbf16, #tpu.memory_space<vmem>>, %arg3: memref<1x128xf32, #tpu.memory_space<vmem>>, %arg4: memref<1x32xf32, #tpu.memory_space<vmem>>, %arg5: memref<1x32xf32, #tpu.memory_space<vmem>>, %arg6: memref<224x128xbf16, #tpu.memory_space<vmem>>) attributes {dimension_semantics = [#tpu.dimension_semantics<parallel>], iteration_bounds = array<i64: 3>, scalar_prefetch = 0 : i64, scratch_operands = 0 : i64, tpu.core_type = #tpu.core_type<tc>, window_params = [{transform_indices = @transform_0, window_bounds = array<i64: 224, 32>}, {pipeline_mode = #tpu.pipeline_mode<synchronous>, transform_indices = @transform_1, window_bounds = array<i64: 32, 128>}, {pipeline_mode = #tpu.pipeline_mode<synchronous>, transform_indices = @transform_2, window_bounds = array<i64: 1, 128>}, {pipeline_mode = #tpu.pipeline_mode<synchronous>, transform_indices = @transform_3, window_bounds = array<i64: 1, 32>}, {pipeline_mode = #tpu.pipeline_mode<synchronous>, transform_indices = @transform_4, window_bounds = array<i64: 1, 32>}, {transform_indices = @transform_5, window_bounds = array<i64: 224, 128>}]} {
    %c0 = arith.constant 0 : index
    %c0_0 = arith.constant 0 : index
    %0 = vector.load %arg1[%c0, %c0_0] : memref<224x32xbf16, #tpu.memory_space<vmem>>, vector<224x32xbf16>
    %1 = arith.extf %0 : vector<224x32xbf16> to vector<224x32xf32>
    %cst = arith.constant dense<0.000000e+00> : vector<224xf32>
    %2 = vector.multi_reduction <add>, %1, %cst [1] : vector<224x32xf32> to vector<224xf32>
    %3 = vector.shape_cast %2 : vector<224xf32> to vector<224x1xf32>
    %cst_1 = arith.constant 3.200000e+01 : f32
    %4 = vector.broadcast %cst_1 : f32 to vector<224x1xf32>
    %5 = arith.divf %3, %4 : vector<224x1xf32>
    %6 = vector.broadcast %5 : vector<224x1xf32> to vector<224x32xf32>
    %7 = arith.subf %1, %6 : vector<224x32xf32>
    %8 = arith.mulf %7, %7 : vector<224x32xf32>
    %cst_2 = arith.constant dense<0.000000e+00> : vector<224xf32>
    %9 = vector.multi_reduction <add>, %8, %cst_2 [1] : vector<224x32xf32> to vector<224xf32>
    %10 = vector.shape_cast %9 : vector<224xf32> to vector<224x1xf32>
    %cst_3 = arith.constant 3.200000e+01 : f32
    %11 = vector.broadcast %cst_3 : f32 to vector<224x1xf32>
    %12 = arith.divf %10, %11 : vector<224x1xf32>
    %13 = vector.broadcast %5 : vector<224x1xf32> to vector<224x32xf32>
    %14 = arith.subf %1, %13 : vector<224x32xf32>
    %cst_4 = arith.constant 9.99999974E-6 : f32
    %15 = vector.broadcast %cst_4 : f32 to vector<224x1xf32>
    %16 = arith.addf %12, %15 : vector<224x1xf32>
    %17 = math.rsqrt %16 : vector<224x1xf32>
    %18 = vector.broadcast %17 : vector<224x1xf32> to vector<224x32xf32>
    %19 = arith.mulf %14, %18 : vector<224x32xf32>
    %c0_5 = arith.constant 0 : index
    %c0_6 = arith.constant 0 : index
    %20 = vector.load %arg4[%c0_5, %c0_6] : memref<1x32xf32, #tpu.memory_space<vmem>>, vector<1x32xf32>
    %21 = vector.broadcast %20 : vector<1x32xf32> to vector<224x32xf32>
    %22 = arith.mulf %19, %21 : vector<224x32xf32>
    %c0_7 = arith.constant 0 : index
    %c0_8 = arith.constant 0 : index
    %23 = vector.load %arg5[%c0_7, %c0_8] : memref<1x32xf32, #tpu.memory_space<vmem>>, vector<1x32xf32>
    %24 = vector.broadcast %23 : vector<1x32xf32> to vector<224x32xf32>
    %25 = arith.addf %22, %24 : vector<224x32xf32>
    %26 = arith.truncf %25 : vector<224x32xf32> to vector<224x32xbf16>
    %c0_9 = arith.constant 0 : index
    %c0_10 = arith.constant 0 : index
    %27 = vector.load %arg2[%c0_9, %c0_10] : memref<32x128xbf16, #tpu.memory_space<vmem>>, vector<32x128xbf16>
    %cst_11 = arith.constant dense<0.000000e+00> : vector<224x128xf32>
    %28 = tpu.matmul %26, %27, %cst_11 {dimension_numbers = #tpu.dot_dimension_numbers<[1], [0], [0], [1], [0, 0, 1, 1], [], []>} : vector<224x32xbf16>, vector<32x128xbf16>, vector<224x128xf32> -> vector<224x128xf32>
    %c0_12 = arith.constant 0 : index
    %c0_13 = arith.constant 0 : index
    %29 = vector.load %arg3[%c0_12, %c0_13] : memref<1x128xf32, #tpu.memory_space<vmem>>, vector<1x128xf32>
    %30 = vector.broadcast %29 : vector<1x128xf32> to vector<224x128xf32>
    %31 = arith.addf %28, %30 : vector<224x128xf32>
    %cst_14 = arith.constant 1.702000e+00 : f32
    %32 = vector.broadcast %cst_14 : f32 to vector<224x128xf32>
    %33 = arith.mulf %32, %31 : vector<224x128xf32>
    %34 = arith.negf %33 : vector<224x128xf32>
    %35 = math.exp %34 : vector<224x128xf32>
    %cst_15 = arith.constant 1.000000e+00 : f32
    %36 = vector.broadcast %cst_15 : f32 to vector<224x128xf32>
    %37 = arith.addf %36, %35 : vector<224x128xf32>
    %38 = arith.divf %36, %37 : vector<224x128xf32>
    %39 = arith.mulf %31, %38 : vector<224x128xf32>
    %40 = arith.truncf %39 : vector<224x128xf32> to vector<224x128xbf16>
    %c0_16 = arith.constant 0 : index
    %c0_17 = arith.constant 0 : index
    %41 = vector.load %arg6[%c0_16, %c0_17] : memref<224x128xbf16, #tpu.memory_space<vmem>>, vector<224x128xbf16>
    tpu.vector_store %arg6[%c0_16, %c0_17], %40 {strides = array<i32>} : memref<224x128xbf16, #tpu.memory_space<vmem>>, vector<224x128xbf16>,
    return
  }
  func.func @transform_0(%arg0: i32) -> (i32, i32) {
    %c0_i32 = arith.constant 0 : i32
    %c0_i32_0 = arith.constant 0 : i32
    return %arg0, %c0_i32 : i32, i32
  }
  func.func @transform_1(%arg0: i32) -> (i32, i32) {
    %c0_i32 = arith.constant 0 : i32
    %c0_i32_0 = arith.constant 0 : i32
    %c0_i32_1 = arith.constant 0 : i32
    return %c0_i32, %c0_i32_0 : i32, i32
  }
  func.func @transform_2(%arg0: i32) -> (i32, i32) {
    %c0_i32 = arith.constant 0 : i32
    %c0_i32_0 = arith.constant 0 : i32
    %c0_i32_1 = arith.constant 0 : i32
    return %c0_i32, %c0_i32_0 : i32, i32
  }
  func.func @transform_3(%arg0: i32) -> (i32, i32) {
    %c0_i32 = arith.constant 0 : i32
    %c0_i32_0 = arith.constant 0 : i32
    %c0_i32_1 = arith.constant 0 : i32
    return %c0_i32, %c0_i32_0 : i32, i32
  }
  func.func @transform_4(%arg0: i32) -> (i32, i32) {
    %c0_i32 = arith.constant 0 : i32
    %c0_i32_0 = arith.constant 0 : i32
    %c0_i32_1 = arith.constant 0 : i32
    return %c0_i32, %c0_i32_0 : i32, i32
  }
  func.func @transform_5(%arg0: i32) -> (i32, i32) {
    %c0_i32 = arith.constant 0 : i32
    %c0_i32_0 = arith.constant 0 : i32
    return %arg0, %c0_i32 : i32, i32
  }
}

module attributes {stable_mosaic.version = 11 : i64} {
  func.func @kernel(%arg0: i32, %arg1: memref<224x128xbf16, #tpu.memory_space<vmem>>, %arg2: memref<128x32xbf16, #tpu.memory_space<vmem>>, %arg3: memref<1x32xf32, #tpu.memory_space<vmem>>, %arg4: memref<224x32xbf16, #tpu.memory_space<vmem>>, %arg5: memref<224x32xbf16, #tpu.memory_space<vmem>>) attributes {dimension_semantics = [#tpu.dimension_semantics<parallel>], iteration_bounds = array<i64: 3>, scalar_prefetch = 0 : i64, scratch_operands = 0 : i64, tpu.core_type = #tpu.core_type<tc>, window_params = [{transform_indices = @transform_0, window_bounds = array<i64: 224, 128>}, {pipeline_mode = #tpu.pipeline_mode<synchronous>, transform_indices = @transform_1, window_bounds = array<i64: 128, 32>}, {pipeline_mode = #tpu.pipeline_mode<synchronous>, transform_indices = @transform_2, window_bounds = array<i64: 1, 32>}, {transform_indices = @transform_3, window_bounds = array<i64: 224, 32>}, {transform_indices = @transform_4, window_bounds = array<i64: 224, 32>}]} {
    %c0 = arith.constant 0 : index
    %c0_0 = arith.constant 0 : index
    %0 = vector.load %arg1[%c0, %c0_0] : memref<224x128xbf16, #tpu.memory_space<vmem>>, vector<224x128xbf16>
    %c0_1 = arith.constant 0 : index
    %c0_2 = arith.constant 0 : index
    %1 = vector.load %arg2[%c0_1, %c0_2] : memref<128x32xbf16, #tpu.memory_space<vmem>>, vector<128x32xbf16>
    %cst = arith.constant dense<0.000000e+00> : vector<224x32xf32>
    %2 = tpu.matmul %0, %1, %cst {dimension_numbers = #tpu.dot_dimension_numbers<[1], [0], [0], [1], [0, 0, 1, 1], [], []>} : vector<224x128xbf16>, vector<128x32xbf16>, vector<224x32xf32> -> vector<224x32xf32>
    %c0_3 = arith.constant 0 : index
    %c0_4 = arith.constant 0 : index
    %3 = vector.load %arg3[%c0_3, %c0_4] : memref<1x32xf32, #tpu.memory_space<vmem>>, vector<1x32xf32>
    %4 = vector.broadcast %3 : vector<1x32xf32> to vector<224x32xf32>
    %5 = arith.addf %2, %4 : vector<224x32xf32>
    %c0_5 = arith.constant 0 : index
    %c0_6 = arith.constant 0 : index
    %6 = vector.load %arg4[%c0_5, %c0_6] : memref<224x32xbf16, #tpu.memory_space<vmem>>, vector<224x32xbf16>
    %7 = arith.extf %6 : vector<224x32xbf16> to vector<224x32xf32>
    %8 = arith.addf %5, %7 : vector<224x32xf32>
    %9 = arith.truncf %8 : vector<224x32xf32> to vector<224x32xbf16>
    %c0_7 = arith.constant 0 : index
    %c0_8 = arith.constant 0 : index
    %10 = vector.load %arg5[%c0_7, %c0_8] : memref<224x32xbf16, #tpu.memory_space<vmem>>, vector<224x32xbf16>
    tpu.vector_store %arg5[%c0_7, %c0_8], %9 {strides = array<i32>} : memref<224x32xbf16, #tpu.memory_space<vmem>>, vector<224x32xbf16>,
    return
  }
  func.func @transform_0(%arg0: i32) -> (i32, i32) {
    %c0_i32 = arith.constant 0 : i32
    %c0_i32_0 = arith.constant 0 : i32
    return %arg0, %c0_i32 : i32, i32
  }
  func.func @transform_1(%arg0: i32) -> (i32, i32) {
    %c0_i32 = arith.constant 0 : i32
    %c0_i32_0 = arith.constant 0 : i32
    %c0_i32_1 = arith.constant 0 : i32
    return %c0_i32, %c0_i32_0 : i32, i32
  }
  func.func @transform_2(%arg0: i32) -> (i32, i32) {
    %c0_i32 = arith.constant 0 : i32
    %c0_i32_0 = arith.constant 0 : i32
    %c0_i32_1 = arith.constant 0 : i32
    return %c0_i32, %c0_i32_0 : i32, i32
  }
  func.func @transform_3(%arg0: i32) -> (i32, i32) {
    %c0_i32 = arith.constant 0 : i32
    %c0_i32_0 = arith.constant 0 : i32
    return %arg0, %c0_i32 : i32, i32
  }
  func.func @transform_4(%arg0: i32) -> (i32, i32) {
    %c0_i32 = arith.constant 0 : i32
    %c0_i32_0 = arith.constant 0 : i32
    return %arg0, %c0_i32 : i32, i32
  }
}

</mosaic_0001>

<bundles_post_ra>
// kernel: s2_vision_tower_forward.6
= control target key start
LH: loop header
LB: loop body
LE: loop exit
PB: predicated region body
PF: predicated region fallthrough
CT: control target
= control target key end

     0   :  { %s584_s21 = smov 0   ;;  %s641_s0 = inlined_call_operand.vmem [shape: bf16[28,16,48], index: 0, kind: input, shape index: {}]   ;;  %s642_s1 = inlined_call_operand.vmem [shape: bf16[48,32], index: 1, kind: input, shape index: {}]   ;;  %s643_s2 = inlined_call_operand.vmem [shape: f32[1,32], index: 2, kind: input, shape index: {}]   ;;  %s644_s3 = inlined_call_operand.vmem [shape: f32[17,32], index: 3, kind: input, shape index: {}]   ;;  %s645_s4 = inlined_call_operand.vmem [shape: f32[1,32], index: 4, kind: input, shape index: {}]   ;;  %s646_s5 = inlined_call_operand.vmem [shape: f32[1,32], index: 5, kind: input, shape index: {}]   ;;  %s647_s6 = inlined_call_operand.vmem [shape: bf16[28,24,32], index: 6, kind: output, shape index: {}]  }
   0x1 LB: > { %s480_s22 = sadd.s32 4294967295, %s545_s21   ;;  %p484_p0 = scmp.ge.s32.totalorder %s545_s21, 1  ;;  %s545_s21 = sphi %s584_s21, %s16_s21  }
   0x2   : > { %p212_p1 = scmp.lt.s32.totalorder %s545_s21, 29 }
   0x4   : > { %p213_p2 = pnand %p484_p0, %p212_p1 }
   0x5   : > { %v529_v0 = vld [vmem:[%s642_s1] sm:$0xff] (!%p213_p2)   ;;  %v547_v1 = vmov (!%p213_p2), 0.0   ;;  %v530_v2 = vld [vmem:[%s642_s1 + $0x8] sm:$0xff] (!%p213_p2)   ;;  %vm548_vm0 = vmmov (!%p213_p2), 0   ;;  %p242_p3 = scmp.lt.s32.totalorder (!%p213_p2), %s480_s22, 27  ;;  %v531_v3 = vld [vmem:[%s642_s1 + $0x10] sm:$0xff] (!%p213_p2)  }
   0x6   : > { %216 = sbr.rel (%p213_p2) target bundleno = 556 (0x22c), region = 44  ;;  %508 = vmatprep.subr.bf16.mxu0 (!%p213_p2), %v547_v1  ;;  %514 = vmatprep.mubr.msk.bf16.mxu0 (!%p213_p2), %vm548_vm0, %v547_v1  ;;  %vm284_vm1 = vcmask (!%p213_p2), 392192   ;;  %v329_v6 = vld [vmem:[%s643_s2] sm:$0x1] (!%p213_p2)  ;;  %vm332_vm2 = vcmask (!%p213_p2), 1040384   ;;  %vm347_vm3 = vcmask (!%p213_p2), 261120  }
   0x7   : > { %509 = vmatpush3.bf16.msra.mxu0 (!%p213_p2), %v529_v0  ;;  %v340_v9 = vld [vmem:[%s644_s3] sm:$0xff] (!%p213_p2)  ;;  %v342_v11 = vld [vmem:[%s644_s3 + $0x10] sm:$0x1] (!%p213_p2)  ;;  %v341_v15 = vld [vmem:[%s644_s3 + $0x8] sm:$0xff] (!%p213_p2)  ;;  %vm421_vm4 = vcmask (!%p213_p2), 257024  }
   0x8   : > { %510 = vmatprep.subr.bf16.mxu0 (!%p213_p2), %v547_v1  ;;  %v493_v49 = vld [vmem:[%s645_s4] ss:$0 sm:$0xff] (!%p213_p2) }
   0x9   : > { %v494_v51 = vld [vmem:[%s646_s5] ss:$0 sm:$0xff] (!%p213_p2) }
   0xb   : > { %511 = vmatpush3.bf16.msra.mxu0 (!%p213_p2), %v530_v2 }
   0xc   : > { %512 = vmatprep.subr.bf16.mxu0 (!%p213_p2), %v547_v1 }
   0xd   : > { %s649_s22 = smov (!%p242_p3, %s480_s22), 27 }
   0xe   : > { %s500_s29 = sshll.u32 %s649_s22, 3  ;;  %s518_s19 = smul.u32 12, %s649_s22 }
   0xf   : > { %s246_s8 = scalar_lea.vmem %s641_s0, %s500_s29  ;;  %513 = vmatpush3.bf16.msra.mxu0 %v531_v3 }
  0x10   : > { %v532_v4 = vld [vmem:[%s246_s8] sm:$0xff]   ;;  %s251_s26 = scalar_lea.vmem %s647_s6, %s518_s19 }
  0x12   : > { %515 = vmatmul.mubr.msk.bf16.vlgmr.msra.gmra.mrb[0].mxu0 %vm284_vm1, %v532_v4 }
  0xe5   : > { %v322_v5 = vpop.f32.mrb[0].mxu0 }
  0xe6   : > { %v333_v7 = vrot.slane %v322_v5, 7  ;;  %v516_v8 = vpop.f32.mrb[1].mxu0 }
  0xe7   : > { %v325_v10 = vpop.f32.mrb[2].mxu0 }
  0xe8   : > { %v334_v12 = vrot.slane %v325_v10, 7  ;;  %v517_v13 = vpop.f32.mrb[3].mxu0  ;;  %v339_v14 = vsel %vm332_vm2, %v329_v6, %v333_v7 }
  0xe9   : > { %v343_v16 = vadd.f32 %v340_v9, %v339_v14 }
  0xea   : > { %v345_v17 = vadd.f32 %v342_v11, %v334_v12  ;;  %v335_v18 = vsel %vm332_vm2, %v333_v7, %v334_v12 }
  0xeb   : > { %v348_v19 = vsel %vm347_vm3, %v343_v16, 0.0  ;;  %v344_v20 = vadd.f32 %v341_v15, %v335_v18 }
  0xec   : > { %349 = vadd.xlane.f32.xlu0 %v348_v19  ;;  %v346_v21 = vsel %vm332_vm2, %v345_v17, 0.0 }
  0xed   : > { %v354_v22 = vsel %vm347_vm3, %v346_v21, 0.0  ;;  %v351_v23 = vsel %vm347_vm3, %v344_v20, 0.0 }
  0xee   : > { %355 = vadd.xlane.f32.xlu1 %v354_v22 }
  0xf0   : > { %352 = vadd.xlane.f32.xlu0 %v351_v23 }
 0x179   : > { %v350_v24 = vpop.xlane.xlu0 %349 }
 0x17a   : > { %v358_v25 = vmul.f32 0.03125, %v350_v24 }
 0x17b   : > { %v356_v26 = vpop.xlane.xlu1 %355 }
 0x17c   : > { %v361_v27 = vsub.f32 %v343_v16, %v358_v25  ;;  %v360_v28 = vmul.f32 0.03125, %v356_v26 }
 0x17d   : > { %v353_v29 = vpop.xlane.xlu0 %352 }
 0x17e   : > { %v363_v30 = vsub.f32 %v346_v21, %v360_v28  ;;  %v359_v31 = vmul.f32 0.03125, %v353_v29  ;;  %v364_v32 = vmul.f32 %v361_v27, %v361_v27 }
 0x180   : > { %v362_v33 = vsub.f32 %v344_v20, %v359_v31  ;;  %v367_v34 = vsel %vm347_vm3, %v364_v32, 0.0  ;;  %v366_v35 = vmul.f32 %v363_v30, %v363_v30 }
 0x181   : > { %368 = vadd.xlane.f32.xlu1 %v367_v34 }
 0x182   : > { %v365_v36 = vmul.f32 %v362_v33, %v362_v33  ;;  %v373_v37 = vsel %vm347_vm3, %v366_v35, 0.0 }
 0x184   : > { %v370_v38 = vsel %vm347_vm3, %v365_v36, 0.0 }
 0x185   : > { %374 = vadd.xlane.f32.xlu1 %v373_v37  ;;  %371 = vadd.xlane.f32.xlu0 %v370_v38 }
 0x20e   : > { %v369_v39 = vpop.xlane.xlu1 %368 }
 0x20f   : > { %v376_v40 = vmul.f32 0.03125, %v369_v39 }
 0x211   : > { %v379_v41 = vadd.f32 1e-05, %v376_v40 }
 0x212   : > { %v375_v42 = vpop.xlane.xlu1 %374  ;;  %v372_v43 = vpop.xlane.xlu0 %371 }
 0x213   : > { %533 = vrsqrt.f32 %v379_v41  ;;  %v378_v44 = vmul.f32 0.03125, %v375_v42  ;;  %v377_v45 = vmul.f32 0.03125, %v372_v43 }
 0x215   : > { %v381_v46 = vadd.f32 1e-05, %v378_v44  ;;  %v380_v47 = vadd.f32 1e-05, %v377_v45 }
 0x217   : > { %535 = vrsqrt.f32 %v381_v46 }
 0x218   : > { %537 = vrsqrt.f32 %v380_v47 }
 0x21d   : > { %v534_v48 = vpop.eup %533 }
 0x21e   : > { %v385_v50 = vmul.f32 %v534_v48, %v361_v27 }
 0x220   : > { %v395_v52 = vmul.f32 %v493_v49, %v385_v50 }
 0x221   : > { %v536_v53 = vpop.eup %535 }
 0x222   : > { %v538_v54 = vpop.eup %537  ;;  %v405_v55 = vadd.f32 %v494_v51, %v395_v52  ;;  %v387_v56 = vmul.f32 %v536_v53, %v363_v30 }
 0x223   : > { %v386_v57 = vmul.f32 %v538_v54, %v362_v33 }
 0x224   : > { %v501_v58 = vpack.c.bf16 %v405_v55, %v405_v55  ;;  %v397_v59 = vmul.f32 %v493_v49, %v387_v56 }
 0x225   : > { %v396_v60 = vmul.f32 %v493_v49, %v386_v57 }
 0x226   : > { %422 = vst.msk [vmem:[%s251_s26] sm:$0xf] %vm421_vm4, %v501_v58  ;;  %v407_v61 = vadd.f32 %v494_v51, %v397_v59 }
 0x227   : > { %v406_v62 = vadd.f32 %v494_v51, %v396_v60 }
 0x228   : > { %v503_v63 = vpack.c.bf16 %v407_v61, %v407_v61 }
 0x229   : > { %v502_v0 = vpack.c.bf16 %v406_v62, %v406_v62 }
 0x22a   : > { %424 = vst.msk [vmem:[%s251_s26 + $0x8] sm:$0xf] %vm421_vm4, %v503_v63 }
 0x22b   : > { %423 = vst.msk [vmem:[%s251_s26 + $0x4] sm:$0xf] %vm421_vm4, %v502_v0 }
 0x22c PF: > { %s16_s21 = sadd.s32 1, %s545_s21  }
 0x22d   : > { %p13_p4 = scmp.ge.s32.totalorder %s16_s21, 30  }
 0x22f   :  { %15 = sbr.rel (!%p13_p4) target bundleno = 1 (0x1), region = 74 }

// kernel: s2_vision_tower_forward.8
= control target key start
LH: loop header
LB: loop body
LE: loop exit
PB: predicated region body
PF: predicated region fallthrough
CT: control target
= control target key end

     0   :  { %s712_s6 = smov 0   ;;  %s807_s0 = inlined_call_operand.vmem [shape: bf16[28,24,96], index: 0, kind: input, shape index: {}]   ;;  %s808_s1 = inlined_call_operand.vmem [shape: bf16[28,24,32], index: 1, kind: output, shape index: {}]  }
   0x1 LB: > { %s562_s7 = sadd.s32 4294967295, %s694_s6   ;;  %p566_p0 = scmp.ge.s32.totalorder %s694_s6, 1  ;;  %s694_s6 = sphi %s712_s6, %s11_s6  }
   0x2   : > { %p87_p1 = scmp.lt.s32.totalorder %s694_s6, 29 }
   0x4   : > { %p88_p2 = pnand %p566_p0, %p87_p1 }
   0x5   : > { %p107_p3 = scmp.lt.s32.totalorder (!%p88_p2), %s562_s7, 27  ;;  %vm136_vm0 = vcmask (!%p88_p2), 130048   ;;  %s696_s12 = smov (!%p88_p2), 96   ;;  %v121_v6 = vlaneseq (!%p88_p2)  ;;  %vm200_vm2 = vcmask (!%p88_p2), 195584   ;;  %vm247_vm3 = vcmask (!%p88_p2), 1043456  }
   0x6   : > { %91 = sbr.rel (%p88_p2) target bundleno = 1577 (0x629), region = 24  ;;  %s697_s13 = smov (!%p88_p2), 64   ;;  %vm312_vm4 = vcmask (!%p88_p2), 125952   ;;  %vm503_vm5 = vcmask (!%p88_p2), 257152  }
   0x7   : > { %v742_v7 = vand.u32 (!%p88_p2), 127, %v121_v6  ;;  %s698_s14 = smov (!%p88_p2), 80   ;;  %s699_s15 = smov (!%p88_p2), 112  }
   0x8   : > { %s700_s19 = smov (!%p88_p2), 48   ;;  %s701_s20 = smov (!%p88_p2), 16  }
   0x9   : > { %vm123_vm1 = vcmp.lt.s32.totalorder (!%p88_p2), %v742_v7, 17 }
   0xd   : > { %s810_s7 = smov (!%p107_p3, %s562_s7), 27 }
   0xe   : > { %s647_s8 = smul.u32 12, %s810_s7 }
  0x10   : > { %s111_s11 = scalar_lea.vmem %s807_s0, %s647_s8  ;;  %s778_s18 = scalar_lea.vmem %s808_s1, %s647_s8 }
  0x11   : > { %v728_v0 = vld [vmem:[%s111_s11] sm:$0xff]   ;;  %v731_v1 = vld [vmem:[%s111_s11 + $0x8] ss:$0 sps:$4 sm:$0xff]  }
  0x12   : > { %132 = vrot.lane.b32.xlu0 %v728_v0, %s696_s12  ;;  %613 = vmatprep.mubr.msk.bf16.mxu0 %vm136_vm0, %v728_v0 }
  0x16   : > { %134 = vrot.lane.b32.xlu0 %v731_v1, %s696_s12 }
  0x84   : > { %v133_v2 = vpop.permute.xlu0 %132 }
  0x85   : > { %641 = vmatprep.subr.msk.bf16.mxu0 %vm136_vm0, %v133_v2  ;;  %v144_v3 = vsel %vm136_vm0, %v133_v2, 0 }
  0x86   : > { %610 = vmatpush3.bf16.xpose.msra.mxu0 %v144_v3 }
  0x88   : > { %v135_v4 = vpop.permute.xlu0 %134 }
  0x89   : > { %642 = vmatprep.subr.msk.bf16.mxu0 %vm136_vm0, %v135_v4  ;;  %v147_v5 = vsel %vm136_vm0, %v135_v4, 0 }
  0x8e   : > { %612 = vmatpush3.bf16.xpose.msra.mxu0 %v147_v5 }
  0x95   : > { %614 = vmatmul.mubr.msk.bf16.vlgmr.msra.gmra.mrb[0].mxu0 %vm136_vm0, %v731_v1 }
 0x168   : > { %v615_v8 = vpop.f32.mrb[0].mxu0 }
 0x169   : > { %v199_v9 = vsel %vm123_vm1, %v615_v8, -1e+30  ;;  %v183_v10 = vpop.f32.mrb[1].mxu0 }
 0x16a   : > { %v197_v11 = vsel %vm123_vm1, %v183_v10, -1e+30  ;;  %v616_v12 = vpop.f32.mrb[2].mxu0  ;;  %v207_v13 = vsel %vm200_vm2, %v199_v9, -inf }
 0x16b   : > { %208 = vmax.xlane.f32.xlu0 %v207_v13  ;;  %v186_v14 = vpop.f32.mrb[3].mxu0  ;;  %v201_v15 = vsel %vm200_vm2, %v197_v11, -inf }
 0x16c   : > { %v198_v16 = vsel %vm123_vm1, %v186_v14, -1e+30  ;;  %202 = vmax.xlane.f32.xlu1 %v201_v15 }
 0x16d   : > { %v204_v17 = vsel %vm200_vm2, %v198_v16, -inf }
 0x170   : > { %205 = vmax.xlane.f32.xlu1 %v204_v17 }
 0x181   : > { %236 = vrot.lane.b32.xlu1 %v728_v0, %s697_s13  ;;  %320 = vrot.lane.b32.xlu0 %v728_v0, %s698_s14 }
 0x1f8   : > { %v209_v18 = vpop.xlane.xlu0 %208 }
 0x1f9   : > { %v212_v19 = vsub.f32 %v199_v9, %v209_v18  ;;  %v203_v20 = vpop.xlane.xlu1 %202 }
 0x1fa   : > { %v210_v21 = vsub.f32 %v197_v11, %v203_v20 }
 0x1fb   : > { %v217_v22 = vmul.f32 1.442695, %v212_v19 }
 0x1fc   : > { %v213_v23 = vmul.f32 1.442695, %v210_v21  ;;  %v321_v38 = vpop.permute.xlu0 %320 }
 0x1fd   : > { %664 = vpow2.f32 %v217_v22  ;;  %v206_v24 = vpop.xlane.xlu1 %205  ;;  %v331_v48 = vsel %vm136_vm0, %v321_v38, 0 }
 0x1fe   : > { %v211_v25 = vsub.f32 %v198_v16, %v206_v24  ;;  %666 = vpow2.f32 %v213_v23 }
 0x200   : > { %v215_v26 = vmul.f32 1.442695, %v211_v25 }
 0x201   : > { %v237_v27 = vpop.permute.xlu1 %236 }
 0x202   : > { %617 = vmatprep.subr.bf16.mxu1 %v237_v27  ;;  %668 = vpow2.f32 %v215_v26 }
 0x203   : > { %618 = vmatpush3.bf16.msra.mxu1 %v237_v27 }
 0x207   : > { %v665_v28 = vpop.eup %664 }
 0x208   : > { %v225_v29 = vsel %vm200_vm2, %v665_v28, 0.0  ;;  %v667_v30 = vpop.eup %666 }
 0x209   : > { %226 = vadd.xlane.f32.xlu1 %v225_v29  ;;  %v219_v31 = vsel %vm200_vm2, %v667_v30, 0.0 }
 0x20c   : > { %v669_v32 = vpop.eup %668 }
 0x20d   : > { %220 = vadd.xlane.f32.xlu1 %v219_v31  ;;  %v222_v33 = vsel %vm200_vm2, %v669_v32, 0.0 }
 0x211   : > { %223 = vadd.xlane.f32.xlu1 %v222_v33 }
 0x222   : > { %238 = vrot.lane.b32.xlu1 %v731_v1, %s697_s13 }
 0x226   : > { %322 = vrot.lane.b32.xlu1 %v731_v1, %s698_s14 }
 0x22a   : > { %316 = vrot.lane.b32.xlu1 %v728_v0, %s699_s15 }
 0x22e   : > { %318 = vrot.lane.b32.xlu1 %v731_v1, %s699_s15 }
 0x296   : > { %v227_v34 = vpop.xlane.xlu1 %226 }
 0x297   : > { %670 = vrcp.f32 %v227_v34 }
 0x29a   : > { %v221_v35 = vpop.xlane.xlu1 %220 }
 0x29b   : > { %672 = vrcp.f32 %v221_v35 }
 0x29e   : > { %v224_v36 = vpop.xlane.xlu1 %223 }
 0x29f   : > { %674 = vrcp.f32 %v224_v36 }
 0x2a1   : > { %v671_v40 = vpop.eup %670 }
 0x2a2   : > { %v239_v37 = vpop.permute.xlu1 %238  ;;  %v233_v44 = vmul.f32 %v671_v40, %v665_v28 }
 0x2a3   : > { %643 = vmatprep.subr.msk.bf16.mxu1 %vm247_vm3, %v239_v37  ;;  %v249_v39 = vsel %vm247_vm3, %v239_v37, 0 }
 0x2a4   : > { %620 = vmatpush3.bf16.msra.mxu1 %v249_v39  ;;  %v235_v49 = vpack.c.bf16 %v233_v44, %v233_v44 }
 0x2a5   : > { %644 = vmatprep.subr.msk.bf16.mxu1 %vm136_vm0, %v321_v38  ;;  %v673_v41 = vpop.eup %672 }
 0x2a6   : > { %v323_v42 = vpop.permute.xlu1 %322  ;;  %v231_v45 = vmul.f32 %v673_v41, %v667_v30 }
 0x2a7   : > { %v334_v51 = vsel %vm136_vm0, %v323_v42, 0 }
 0x2a9   : > { %v675_v43 = vpop.eup %674 }
 0x2aa   : > { %v232_v46 = vmul.f32 %v675_v43, %v669_v32  ;;  %v317_v50 = vpop.permute.xlu1 %316 }
 0x2ac   : > { %v234_v47 = vpack.c.bf16 %v232_v46, %v231_v45 }
 0x2ae   : > { %621 = vmatprep.mubr.msk.bf16.mxu1 %vm200_vm2, %v234_v47  ;;  %v319_v52 = vpop.permute.xlu1 %318 }
 0x2af   : > { %622 = vmatmul.mubr.msk.bf16.vlgmr.msra.gmra.mrb[0].mxu1 %vm200_vm2, %v235_v49 }
 0x2b0   : > { %626 = vmatpush3.bf16.xpose.msra.mxu1 %v331_v48  ;;  %629 = vmatprep.mubr.msk.bf16.mxu1 %vm136_vm0, %v317_v50 }
 0x2b1   : > { %645 = vmatprep.subr.msk.bf16.mxu1 %vm136_vm0, %v323_v42 }
 0x2b8   : > { %628 = vmatpush3.bf16.xpose.msra.mxu1 %v334_v51 }
 0x2bf   : > { %630 = vmatmul.mubr.msk.bf16.vlgmr.msra.gmra.mrb[4].mxu1 %vm136_vm0, %v319_v52 }
 0x382   : > { %v623_v53 = vpop.f32.mrb[0].mxu1 }
 0x383   : > { %v589_v54 = vpack.c.bf16 %v623_v53, %v623_v53  ;;  %v285_v55 = vpop.f32.mrb[1].mxu1 }
 0x384   : > { %v587_v56 = vpack.c.bf16 %v285_v55, %v285_v55  ;;  %v624_v57 = vpop.f32.mrb[2].mxu1 }
 0x385   : > { %315 = vst.msk [vmem:[%s778_s18 + $0x8] sm:$0xf] %vm312_vm4, %v589_v54  ;;  %v288_v58 = vpop.f32.mrb[3].mxu1 }
 0x386   : > { %313 = vst.msk [vmem:[%s778_s18] sm:$0xf] %vm312_vm4, %v587_v56  ;;  %v588_v59 = vpack.c.bf16 %v288_v58, %v288_v58 }
 0x388   : > { %314 = vst.msk [vmem:[%s778_s18 + $0x4] sm:$0xf] %vm312_vm4, %v588_v59 }
 0x392   : > { %v631_v60 = vpop.f32.mrb[4].mxu1 }
 0x393   : > { %v370_v61 = vpop.f32.mrb[5].mxu1  ;;  %v386_v4 = vsel %vm123_vm1, %v631_v60, -1e+30 }
 0x394   : > { %v384_v62 = vsel %vm123_vm1, %v370_v61, -1e+30  ;;  %v632_v63 = vpop.f32.mrb[6].mxu1  ;;  %v393_v8 = vsel %vm200_vm2, %v386_v4, -inf }
 0x395   : > { %v373_v2 = vpop.f32.mrb[7].mxu1  ;;  %v387_v3 = vsel %vm200_vm2, %v384_v62, -inf }
 0x396   : > { %v385_v5 = vsel %vm123_vm1, %v373_v2, -1e+30  ;;  %388 = vmax.xlane.f32.xlu1 %v387_v3 }
 0x397   : > { %v390_v6 = vsel %vm200_vm2, %v385_v5, -inf }
 0x398   : > { %391 = vmax.xlane.f32.xlu0 %v390_v6 }
 0x39a   : > { %394 = vmax.xlane.f32.xlu1 %v393_v8 }
 0x423   : > { %v389_v9 = vpop.xlane.xlu1 %388 }
 0x424   : > { %v396_v11 = vsub.f32 %v384_v62, %v389_v9 }
 0x425   : > { %v392_v10 = vpop.xlane.xlu0 %391 }
 0x426   : > { %v397_v12 = vsub.f32 %v385_v5, %v392_v10  ;;  %v399_v16 = vmul.f32 1.442695, %v396_v11 }
 0x427   : > { %v395_v13 = vpop.xlane.xlu1 %394 }
 0x428   : > { %v401_v14 = vmul.f32 1.442695, %v397_v12  ;;  %v398_v15 = vsub.f32 %v386_v4, %v395_v13 }
 0x42a   : > { %676 = vpow2.f32 %v401_v14  ;;  %v403_v17 = vmul.f32 1.442695, %v398_v15 }
 0x42c   : > { %678 = vpow2.f32 %v403_v17 }
 0x42d   : > { %680 = vpow2.f32 %v399_v16 }
 0x434   : > { %v677_v7 = vpop.eup %676 }
 0x435   : > { %v408_v18 = vsel %vm200_vm2, %v677_v7, 0.0 }
 0x436   : > { %v679_v19 = vpop.eup %678  ;;  %409 = vadd.xlane.f32.xlu1 %v408_v18 }
 0x437   : > { %v411_v20 = vsel %vm200_vm2, %v679_v19, 0.0  ;;  %v681_v21 = vpop.eup %680 }
 0x438   : > { %412 = vadd.xlane.f32.xlu0 %v411_v20  ;;  %v405_v22 = vsel %vm200_vm2, %v681_v21, 0.0 }
 0x43c   : > { %406 = vadd.xlane.f32.xlu0 %v405_v22 }
 0x447   : > { %422 = vrot.lane.b32.xlu1 %v728_v0, %s700_s19 }
 0x452   : > { %424 = vrot.lane.b32.xlu0 %v731_v1, %s700_s19 }
 0x4c3   : > { %v410_v23 = vpop.xlane.xlu1 %409 }
 0x4c5   : > { %v413_v24 = vpop.xlane.xlu0 %412 }
 0x4c6   : > { %682 = vrcp.f32 %v413_v24 }
 0x4c7   : > { %v423_v25 = vpop.permute.xlu1 %422  ;;  %684 = vrcp.f32 %v410_v23 }
 0x4c8   : > { %633 = vmatprep.subr.bf16.mxu0 %v423_v25 }
 0x4c9   : > { %v407_v26 = vpop.xlane.xlu0 %406  ;;  %634 = vmatpush3.bf16.msra.mxu0 %v423_v25 }
 0x4ca   : > { %686 = vrcp.f32 %v407_v26 }
 0x4cd   : > { %v425_v27 = vpop.permute.xlu0 %424 }
 0x4ce   : > { %v434_v28 = vsel %vm247_vm3, %v425_v27, 0  ;;  %646 = vmatprep.subr.msk.bf16.mxu0 %vm247_vm3, %v425_v27 }
 0x4cf   : > { %636 = vmatpush3.bf16.msra.mxu0 %v434_v28 }
 0x4d0   : > { %v683_v29 = vpop.eup %682 }
 0x4d1   : > { %v685_v30 = vpop.eup %684  ;;  %v419_v31 = vmul.f32 %v683_v29, %v679_v19 }
 0x4d2   : > { %v418_v32 = vmul.f32 %v685_v30, %v677_v7 }
 0x4d3   : > { %v421_v34 = vpack.c.bf16 %v419_v31, %v419_v31 }
 0x4d4   : > { %v687_v0 = vpop.eup %686 }
 0x4d5   : > { %v417_v1 = vmul.f32 %v687_v0, %v681_v21 }
 0x4d7   : > { %v420_v33 = vpack.c.bf16 %v418_v32, %v417_v1 }
 0x4d9   : > { %637 = vmatprep.mubr.msk.bf16.mxu0 %vm200_vm2, %v420_v33 }
 0x4da   : > { %638 = vmatmul.mubr.msk.bf16.vlgmr.msra.gmra.mrb[4].mxu0 %vm200_vm2, %v421_v34 }
 0x5ad   : > { %v639_v35 = vpop.f32.mrb[4].mxu0 }
 0x5ae   : > { %v592_v36 = vpack.c.bf16 %v639_v35, %v639_v35  ;;  %v470_v37 = vpop.f32.mrb[5].mxu0 }
 0x5af   : > { %v590_v38 = vpack.c.bf16 %v470_v37, %v470_v37  ;;  %v640_v39 = vpop.f32.mrb[6].mxu0 }
 0x5b0   : > { %498 = vrot.lane.b32.xlu0 %v592_v36, %s701_s20  ;;  %v473_v40 = vpop.f32.mrb[7].mxu0 }
 0x5b1   : > { %494 = vrot.lane.b32.xlu1 %v590_v38, %s701_s20  ;;  %v591_v41 = vpack.c.bf16 %v473_v40, %v473_v40 }
 0x5b5   : > { %496 = vrot.lane.b32.xlu1 %v591_v41, %s701_s20 }
 0x622   : > { %v499_v42 = vpop.permute.xlu0 %498 }
 0x623   : > { %506 = vst.msk [vmem:[%s778_s18 + $0x8] sm:$0xf] %vm503_vm5, %v499_v42  ;;  %v495_v43 = vpop.permute.xlu1 %494 }
 0x624   : > { %504 = vst.msk [vmem:[%s778_s18] sm:$0xf] %vm503_vm5, %v495_v43 }
 0x627   : > { %v497_v44 = vpop.permute.xlu1 %496 }
 0x628   : > { %505 = vst.msk [vmem:[%s778_s18 + $0x4] sm:$0xf] %vm503_vm5, %v497_v44 }
 0x629 PF: > { %s11_s6 = sadd.s32 1, %s694_s6  }
 0x62a   : > { %p8_p4 = scmp.ge.s32.totalorder %s11_s6, 30  }
 0x62c   :  { %10 = sbr.rel (!%p8_p4) target bundleno = 1 (0x1), region = 54 }

// kernel: s2_vision_tower_forward.7
= control target key start
LH: loop header
LB: loop body
LE: loop exit
PB: predicated region body
PF: predicated region fallthrough
CT: control target
= control target key end

     0   :  { %s1451_s18 = smov 0   ;;  %s2032_s0 = inlined_call_operand.vmem [shape: bf16[672,32], index: 0, kind: input, shape index: {}]   ;;  %s2033_s1 = inlined_call_operand.vmem [shape: bf16[32,96], index: 1, kind: input, shape index: {}]   ;;  %s2034_s2 = inlined_call_operand.vmem [shape: f32[1,96], index: 2, kind: input, shape index: {}]   ;;  %s2035_s3 = inlined_call_operand.vmem [shape: f32[1,32], index: 3, kind: input, shape index: {}]   ;;  %s2036_s4 = inlined_call_operand.vmem [shape: f32[1,32], index: 4, kind: input, shape index: {}]   ;;  %s2037_s5 = inlined_call_operand.vmem [shape: bf16[672,96], index: 5, kind: output, shape index: {}]  }
   0x1 LB: > { %s1142_s19 = sadd.s32 4294967295, %s1419_s18   ;;  %p1146_p0 = scmp.ge.s32.totalorder %s1419_s18, 1  ;;  %s1419_s18 = sphi %s1451_s18, %s15_s18  }
   0x2   : > { %p188_p1 = scmp.lt.s32.totalorder %s1419_s18, 4 }
   0x4   : > { %p189_p2 = pnand %p1146_p0, %p188_p1 }
   0x5   : > { %s216_s20 = smul.u32 (!%p189_p2), 28, %s1142_s19  ;;  %vm285_vm0 = vcmask (!%p189_p2), 261120   ;;  %vm1057_vm1 = vcmask (!%p189_p2), 781312  }
   0x6   : > { %192 = sbr.rel (%p189_p2) target bundleno = 610 (0x262), region = 40 }
   0x7   : > { %p217_p3 = scmp.lt.s32.totalorder (!%p189_p2), %s216_s20, 83 }
   0xd   : > { %s2039_s20 = smov (!%p217_p3, %s216_s20), 83 }
   0xe   : > { %s1147_s21 = sshll.u32 %s2039_s20, 2 }
   0xf   : > { %s1467_s24 = scalar_lea.vmem %s2032_s0, %s1147_s21  ;;  %s1944_s12 = scalar_lea.vmem %s2037_s5, %s1147_s21 }
  0x10   : > { %v1470_v0 = vld [vmem:[%s1467_s24] sm:$0xff]   ;;  %v1473_v1 = vld [vmem:[%s1467_s24 + $0x8] sm:$0xff]   ;;  %v1480_v6 = vld [vmem:[%s1467_s24 + $0x10] sm:$0xff]  }
  0x11   : > { %v1228_v2 = vunpack.c.l.bf16 %v1470_v0  ;;  %v1232_v3 = vunpack.c.l.bf16 %v1473_v1  ;;  %v1229_v4 = vunpack.c.h.bf16 %v1470_v0  ;;  %v1233_v5 = vunpack.c.h.bf16 %v1473_v1  ;;  %v1497_v13 = vld [vmem:[%s1467_s24 + $0x40] sm:$0xff]   ;;  %v1508_v18 = vld [vmem:[%s1467_s24 + $0x18] sm:$0xff]   ;;  %v1519_v23 = vld [vmem:[%s1467_s24 + $0x48] sm:$0xff]  }
  0x12   : > { %v1236_v11 = vunpack.c.l.bf16 %v1480_v6  ;;  %v1237_v12 = vunpack.c.h.bf16 %v1480_v6  ;;  %v1260_v16 = vunpack.c.l.bf16 %v1497_v13  ;;  %v1261_v17 = vunpack.c.h.bf16 %v1497_v13  ;;  %v1530_v28 = vld [vmem:[%s1467_s24 + $0x20] sm:$0xff]   ;;  %v1541_v33 = vld [vmem:[%s1467_s24 + $0x50] sm:$0xff]   ;;  %v1552_v38 = vld [vmem:[%s1467_s24 + $0x28] sm:$0xff]  }
  0x13   : > { %v286_v7 = vsel %vm285_vm0, %v1228_v2, 0.0  ;;  %v292_v8 = vsel %vm285_vm0, %v1232_v3, 0.0  ;;  %v289_v9 = vsel %vm285_vm0, %v1229_v4, 0.0  ;;  %v295_v10 = vsel %vm285_vm0, %v1233_v5, 0.0  ;;  %v1563_v43 = vld [vmem:[%s1467_s24 + $0x58] sm:$0xff]   ;;  %v1574_v48 = vld [vmem:[%s1467_s24 + $0x30] sm:$0xff]  }
  0x14   : > { %287 = vadd.xlane.f32.xlu0 %v286_v7  ;;  %293 = vadd.xlane.f32.xlu1 %v292_v8  ;;  %v298_v14 = vsel %vm285_vm0, %v1236_v11, 0.0  ;;  %v301_v15 = vsel %vm285_vm0, %v1237_v12, 0.0  ;;  %v334_v19 = vsel %vm285_vm0, %v1260_v16, 0.0  ;;  %v337_v20 = vsel %vm285_vm0, %v1261_v17, 0.0  ;;  %v1585_v53 = vld [vmem:[%s1467_s24 + $0x60] sm:$0xff]   ;;  %v1596_v58 = vld [vmem:[%s1467_s24 + $0x38] sm:$0xff]  }
  0x15   : > { %v1240_v21 = vunpack.c.l.bf16 %v1508_v18  ;;  %v1241_v22 = vunpack.c.h.bf16 %v1508_v18  ;;  %v1264_v26 = vunpack.c.l.bf16 %v1519_v23  ;;  %v1265_v27 = vunpack.c.h.bf16 %v1519_v23  ;;  %v1607_v63 = vld [vmem:[%s1467_s24 + $0x68] sm:$0xff]  }
  0x16   : > { %v1244_v31 = vunpack.c.l.bf16 %v1530_v28  ;;  %v1245_v32 = vunpack.c.h.bf16 %v1530_v28  ;;  %v1268_v36 = vunpack.c.l.bf16 %v1541_v33  ;;  %v1269_v37 = vunpack.c.h.bf16 %v1541_v33 }
  0x17   : > { %v304_v24 = vsel %vm285_vm0, %v1240_v21, 0.0  ;;  %v307_v25 = vsel %vm285_vm0, %v1241_v22, 0.0  ;;  %v340_v29 = vsel %vm285_vm0, %v1264_v26, 0.0  ;;  %v343_v30 = vsel %vm285_vm0, %v1265_v27, 0.0 }
  0x18   : > { %290 = vadd.xlane.f32.xlu0 %v289_v9  ;;  %296 = vadd.xlane.f32.xlu1 %v295_v10  ;;  %v310_v34 = vsel %vm285_vm0, %v1244_v31, 0.0  ;;  %v313_v35 = vsel %vm285_vm0, %v1245_v32, 0.0  ;;  %v346_v39 = vsel %vm285_vm0, %v1268_v36, 0.0  ;;  %v349_v40 = vsel %vm285_vm0, %v1269_v37, 0.0 }
  0x19   : > { %v1248_v41 = vunpack.c.l.bf16 %v1552_v38  ;;  %v1249_v42 = vunpack.c.h.bf16 %v1552_v38  ;;  %v1272_v46 = vunpack.c.l.bf16 %v1563_v43  ;;  %v1273_v47 = vunpack.c.h.bf16 %v1563_v43 }
  0x1a   : > { %v1252_v51 = vunpack.c.l.bf16 %v1574_v48  ;;  %v1253_v52 = vunpack.c.h.bf16 %v1574_v48  ;;  %v1276_v56 = vunpack.c.l.bf16 %v1585_v53  ;;  %v1277_v57 = vunpack.c.h.bf16 %v1585_v53 }
  0x1b   : > { %v316_v44 = vsel %vm285_vm0, %v1248_v41, 0.0  ;;  %v319_v45 = vsel %vm285_vm0, %v1249_v42, 0.0  ;;  %v352_v49 = vsel %vm285_vm0, %v1272_v46, 0.0  ;;  %v355_v50 = vsel %vm285_vm0, %v1273_v47, 0.0 }
  0x1c   : > { %299 = vadd.xlane.f32.xlu0 %v298_v14  ;;  %302 = vadd.xlane.f32.xlu1 %v301_v15  ;;  %v322_v54 = vsel %vm285_vm0, %v1252_v51, 0.0  ;;  %v325_v55 = vsel %vm285_vm0, %v1253_v52, 0.0  ;;  %v358_v59 = vsel %vm285_vm0, %v1276_v56, 0.0  ;;  %v361_v60 = vsel %vm285_vm0, %v1277_v57, 0.0 }
  0x1d   : > { %v1256_v61 = vunpack.c.l.bf16 %v1596_v58  ;;  %v1257_v62 = vunpack.c.h.bf16 %v1596_v58  ;;  %v1280_v9 = vunpack.c.l.bf16 %v1607_v63  ;;  %v1281_v10 = vunpack.c.h.bf16 %v1607_v63 }
  0x1f   : > { %v328_v7 = vsel %vm285_vm0, %v1256_v61, 0.0  ;;  %v331_v8 = vsel %vm285_vm0, %v1257_v62, 0.0  ;;  %v364_v14 = vsel %vm285_vm0, %v1280_v9, 0.0  ;;  %v367_v15 = vsel %vm285_vm0, %v1281_v10, 0.0 }
  0x20   : > { %335 = vadd.xlane.f32.xlu0 %v334_v19  ;;  %338 = vadd.xlane.f32.xlu1 %v337_v20 }
  0x24   : > { %305 = vadd.xlane.f32.xlu0 %v304_v24  ;;  %308 = vadd.xlane.f32.xlu1 %v307_v25 }
  0x28   : > { %341 = vadd.xlane.f32.xlu0 %v340_v29  ;;  %344 = vadd.xlane.f32.xlu1 %v343_v30 }
  0x2c   : > { %311 = vadd.xlane.f32.xlu0 %v310_v34  ;;  %314 = vadd.xlane.f32.xlu1 %v313_v35 }
  0x30   : > { %347 = vadd.xlane.f32.xlu0 %v346_v39  ;;  %350 = vadd.xlane.f32.xlu1 %v349_v40 }
  0x34   : > { %317 = vadd.xlane.f32.xlu0 %v316_v44  ;;  %320 = vadd.xlane.f32.xlu1 %v319_v45 }
  0x38   : > { %353 = vadd.xlane.f32.xlu0 %v352_v49  ;;  %356 = vadd.xlane.f32.xlu1 %v355_v50 }
  0x3c   : > { %323 = vadd.xlane.f32.xlu0 %v322_v54  ;;  %326 = vadd.xlane.f32.xlu1 %v325_v55 }
  0x40   : > { %359 = vadd.xlane.f32.xlu0 %v358_v59  ;;  %362 = vadd.xlane.f32.xlu1 %v361_v60 }
  0x44   : > { %329 = vadd.xlane.f32.xlu0 %v328_v7  ;;  %332 = vadd.xlane.f32.xlu1 %v331_v8 }
  0x48   : > { %365 = vadd.xlane.f32.xlu0 %v364_v14  ;;  %368 = vadd.xlane.f32.xlu1 %v367_v15 }
  0xa1   : > { %v288_v19 = vpop.xlane.xlu0 %287  ;;  %v294_v20 = vpop.xlane.xlu1 %293 }
  0xa2   : > { %v371_v24 = vmul.f32 0.03125, %v288_v19  ;;  %v373_v25 = vmul.f32 0.03125, %v294_v20 }
  0xa4   : > { %v1625_v29 = vsub.f32 %v1228_v2, %v371_v24  ;;  %v1629_v30 = vsub.f32 %v1232_v3, %v373_v25 }
  0xa5   : > { %v291_v34 = vpop.xlane.xlu0 %290  ;;  %v297_v35 = vpop.xlane.xlu1 %296 }
  0xa6   : > { %v372_v39 = vmul.f32 0.03125, %v291_v34  ;;  %v374_v40 = vmul.f32 0.03125, %v297_v35  ;;  %v427_v44 = vmul.f32 %v1625_v29, %v1625_v29  ;;  %v429_v45 = vmul.f32 %v1629_v30, %v1629_v30 }
  0xa8   : > { %v1637_v49 = vsub.f32 %v1229_v4, %v372_v39  ;;  %v1641_v2 = vsub.f32 %v1233_v5, %v374_v40  ;;  %v455_v3 = vsel %vm285_vm0, %v427_v44, 0.0  ;;  %v461_v55 = vsel %vm285_vm0, %v429_v45, 0.0 }
  0xa9   : > { %456 = vadd.xlane.f32.xlu0 %v455_v3  ;;  %v300_v50 = vpop.xlane.xlu0 %299  ;;  %v303_v54 = vpop.xlane.xlu1 %302 }
  0xaa   : > { %v375_v59 = vmul.f32 0.03125, %v300_v50  ;;  %v376_v60 = vmul.f32 0.03125, %v303_v54  ;;  %v428_v7 = vmul.f32 %v1637_v49, %v1637_v49  ;;  %v430_v0 = vmul.f32 %v1641_v2, %v1641_v2 }
  0xac   : > { %v1651_v1 = vsub.f32 %v1236_v11, %v375_v59  ;;  %v1655_v4 = vsub.f32 %v1237_v12, %v376_v60  ;;  %v458_v5 = vsel %vm285_vm0, %v428_v7, 0.0  ;;  %v464_v15 = vsel %vm285_vm0, %v430_v0, 0.0 }
  0xad   : > { %462 = vadd.xlane.f32.xlu0 %v461_v55  ;;  %459 = vadd.xlane.f32.xlu1 %v458_v5  ;;  %v336_v8 = vpop.xlane.xlu0 %335  ;;  %v339_v14 = vpop.xlane.xlu1 %338 }
  0xae   : > { %v387_v19 = vmul.f32 0.03125, %v336_v8  ;;  %v388_v20 = vmul.f32 0.03125, %v339_v14  ;;  %v431_v24 = vmul.f32 %v1651_v1, %v1651_v1  ;;  %v432_v11 = vmul.f32 %v1655_v4, %v1655_v4 }
  0xb0   : > { %v1665_v6 = vsub.f32 %v1260_v16, %v387_v19  ;;  %v1669_v12 = vsub.f32 %v1261_v17, %v388_v20  ;;  %v467_v25 = vsel %vm285_vm0, %v431_v24, 0.0  ;;  %v470_v39 = vsel %vm285_vm0, %v432_v11, 0.0 }
  0xb1   : > { %465 = vadd.xlane.f32.xlu1 %v464_v15  ;;  %468 = vadd.xlane.f32.xlu0 %v467_v25  ;;  %v306_v34 = vpop.xlane.xlu0 %305  ;;  %v309_v35 = vpop.xlane.xlu1 %308 }
  0xb2   : > { %v377_v40 = vmul.f32 0.03125, %v306_v34  ;;  %v378_v44 = vmul.f32 0.03125, %v309_v35  ;;  %v443_v45 = vmul.f32 %v1665_v6, %v1665_v6  ;;  %v444_v16 = vmul.f32 %v1669_v12, %v1669_v12 }
  0xb4   : > { %v1679_v13 = vsub.f32 %v1240_v21, %v377_v40  ;;  %v1683_v17 = vsub.f32 %v1241_v22, %v378_v44  ;;  %v503_v3 = vsel %vm285_vm0, %v443_v45, 0.0  ;;  %v506_v55 = vsel %vm285_vm0, %v444_v16, 0.0 }
  0xb5   : > { %471 = vadd.xlane.f32.xlu1 %v470_v39  ;;  %504 = vadd.xlane.f32.xlu0 %v503_v3  ;;  %v342_v50 = vpop.xlane.xlu0 %341  ;;  %v345_v54 = vpop.xlane.xlu1 %344 }
  0xb6   : > { %v389_v59 = vmul.f32 0.03125, %v342_v50  ;;  %v390_v60 = vmul.f32 0.03125, %v345_v54  ;;  %v433_v7 = vmul.f32 %v1679_v13, %v1679_v13  ;;  %v434_v21 = vmul.f32 %v1683_v17, %v1683_v17 }
  0xb8   : > { %v1693_v18 = vsub.f32 %v1264_v26, %v389_v59  ;;  %v1697_v22 = vsub.f32 %v1265_v27, %v390_v60  ;;  %v473_v0 = vsel %vm285_vm0, %v433_v7, 0.0  ;;  %v476_v14 = vsel %vm285_vm0, %v434_v21, 0.0 }
  0xb9   : > { %507 = vadd.xlane.f32.xlu1 %v506_v55  ;;  %474 = vadd.xlane.f32.xlu0 %v473_v0  ;;  %v312_v5 = vpop.xlane.xlu0 %311  ;;  %v315_v8 = vpop.xlane.xlu1 %314 }
  0xba   : > { %v379_v15 = vmul.f32 0.03125, %v312_v5  ;;  %v380_v19 = vmul.f32 0.03125, %v315_v8  ;;  %v445_v20 = vmul.f32 %v1693_v18, %v1693_v18  ;;  %v446_v26 = vmul.f32 %v1697_v22, %v1697_v22 }
  0xbc   : > { %v1707_v23 = vsub.f32 %v1244_v31, %v379_v15  ;;  %v1711_v27 = vsub.f32 %v1245_v32, %v380_v19  ;;  %v509_v24 = vsel %vm285_vm0, %v445_v20, 0.0  ;;  %v512_v34 = vsel %vm285_vm0, %v446_v26, 0.0 }
  0xbd   : > { %477 = vadd.xlane.f32.xlu1 %v476_v14  ;;  %510 = vadd.xlane.f32.xlu0 %v509_v24  ;;  %v348_v11 = vpop.xlane.xlu0 %347  ;;  %v351_v25 = vpop.xlane.xlu1 %350 }
  0xbe   : > { %v391_v35 = vmul.f32 0.03125, %v348_v11  ;;  %v392_v39 = vmul.f32 0.03125, %v351_v25  ;;  %v435_v40 = vmul.f32 %v1707_v23, %v1707_v23  ;;  %v436_v31 = vmul.f32 %v1711_v27, %v1711_v27 }
  0xc0   : > { %v1721_v28 = vsub.f32 %v1268_v36, %v391_v35  ;;  %v1725_v32 = vsub.f32 %v1269_v37, %v392_v39  ;;  %v479_v44 = vsel %vm285_vm0, %v435_v40, 0.0  ;;  %v482_v3 = vsel %vm285_vm0, %v436_v31, 0.0  ;;  %v1355_v40 = vld [vmem:[%s2033_s1] sm:$0xff]  }
  0xc1   : > { %513 = vadd.xlane.f32.xlu1 %v512_v34  ;;  %480 = vadd.xlane.f32.xlu0 %v479_v44  ;;  %v318_v45 = vpop.xlane.xlu0 %317  ;;  %v321_v16 = vpop.xlane.xlu1 %320 }
  0xc2   : > { %v381_v50 = vmul.f32 0.03125, %v318_v45  ;;  %v382_v54 = vmul.f32 0.03125, %v321_v16  ;;  %v447_v55 = vmul.f32 %v1721_v28, %v1721_v28  ;;  %v448_v36 = vmul.f32 %v1725_v32, %v1725_v32  ;;  %1311 = vmatprep.subr.bf16.mxu0 %v1355_v40  ;;  %1343 = vmatprep.subr.bf16.mxu1 %v1355_v40 }
  0xc3   : > { %1312 = vmatpush3.bf16.msra.mxu0 %v1355_v40  ;;  %1345 = vmatpush3.bf16.msra.mxu1 %v1355_v40 }
  0xc4   : > { %v1735_v33 = vsub.f32 %v1248_v41, %v381_v50  ;;  %v1739_v37 = vsub.f32 %v1249_v42, %v382_v54  ;;  %v515_v59 = vsel %vm285_vm0, %v447_v55, 0.0  ;;  %v518_v21 = vsel %vm285_vm0, %v448_v36, 0.0  ;;  %v1356_v55 = vld [vmem:[%s2033_s1 + $0x8] sm:$0xff]  }
  0xc5   : > { %483 = vadd.xlane.f32.xlu1 %v482_v3  ;;  %516 = vadd.xlane.f32.xlu0 %v515_v59  ;;  %v354_v60 = vpop.xlane.xlu0 %353  ;;  %v357_v7 = vpop.xlane.xlu1 %356 }
  0xc6   : > { %v393_v0 = vmul.f32 0.03125, %v354_v60  ;;  %v394_v5 = vmul.f32 0.03125, %v357_v7  ;;  %v437_v8 = vmul.f32 %v1735_v33, %v1735_v33  ;;  %v438_v41 = vmul.f32 %v1739_v37, %v1739_v37  ;;  %1313 = vmatprep.subr.bf16.mxu0 %v1356_v55  ;;  %1344 = vmatprep.subr.bf16.mxu1 %v1356_v55 }
  0xc7   : > { %1314 = vmatpush3.bf16.msra.mxu0 %v1356_v55  ;;  %1346 = vmatpush3.bf16.msra.mxu1 %v1356_v55 }
  0xc8   : > { %v1749_v38 = vsub.f32 %v1272_v46, %v393_v0  ;;  %v1753_v42 = vsub.f32 %v1273_v47, %v394_v5  ;;  %v485_v14 = vsel %vm285_vm0, %v437_v8, 0.0  ;;  %v488_v20 = vsel %vm285_vm0, %v438_v41, 0.0 }
  0xc9   : > { %519 = vadd.xlane.f32.xlu1 %v518_v21  ;;  %486 = vadd.xlane.f32.xlu0 %v485_v14  ;;  %v324_v15 = vpop.xlane.xlu0 %323  ;;  %v327_v19 = vpop.xlane.xlu1 %326 }
  0xca   : > { %v383_v26 = vmul.f32 0.03125, %v324_v15  ;;  %v384_v24 = vmul.f32 0.03125, %v327_v19  ;;  %v449_v11 = vmul.f32 %v1749_v38, %v1749_v38  ;;  %v450_v46 = vmul.f32 %v1753_v42, %v1753_v42 }
  0xcc   : > { %v1763_v43 = vsub.f32 %v1252_v51, %v383_v26  ;;  %v1767_v47 = vsub.f32 %v1253_v52, %v384_v24  ;;  %v521_v25 = vsel %vm285_vm0, %v449_v11, 0.0  ;;  %v524_v39 = vsel %vm285_vm0, %v450_v46, 0.0 }
  0xcd   : > { %489 = vadd.xlane.f32.xlu1 %v488_v20  ;;  %522 = vadd.xlane.f32.xlu0 %v521_v25  ;;  %v360_v34 = vpop.xlane.xlu0 %359  ;;  %v363_v35 = vpop.xlane.xlu1 %362 }
  0xce   : > { %v395_v31 = vmul.f32 0.03125, %v360_v34  ;;  %v396_v44 = vmul.f32 0.03125, %v363_v35  ;;  %v439_v51 = vmul.f32 %v1763_v43, %v1763_v43  ;;  %v440_v48 = vmul.f32 %v1767_v47, %v1767_v47 }
  0xd0   : > { %v1780_v52 = vsub.f32 %v1276_v56, %v395_v31  ;;  %v1784_v45 = vsub.f32 %v1277_v57, %v396_v44  ;;  %v491_v16 = vsel %vm285_vm0, %v439_v51, 0.0  ;;  %v494_v54 = vsel %vm285_vm0, %v440_v48, 0.0 }
  0xd1   : > { %525 = vadd.xlane.f32.xlu1 %v524_v39  ;;  %492 = vadd.xlane.f32.xlu0 %v491_v16  ;;  %v330_v3 = vpop.xlane.xlu0 %329  ;;  %v333_v50 = vpop.xlane.xlu1 %332 }
  0xd2   : > { %v385_v56 = vmul.f32 0.03125, %v330_v3  ;;  %v386_v36 = vmul.f32 0.03125, %v333_v50  ;;  %v451_v53 = vmul.f32 %v1780_v52, %v1780_v52  ;;  %v452_v57 = vmul.f32 %v1784_v45, %v1784_v45 }
  0xd4   : > { %v1797_v59 = vsub.f32 %v1256_v61, %v385_v56  ;;  %v1801_v60 = vsub.f32 %v1257_v62, %v386_v36  ;;  %v527_v7 = vsel %vm285_vm0, %v451_v53, 0.0  ;;  %v530_v5 = vsel %vm285_vm0, %v452_v57, 0.0 }
  0xd5   : > { %495 = vadd.xlane.f32.xlu1 %v494_v54  ;;  %528 = vadd.xlane.f32.xlu0 %v527_v7  ;;  %v366_v21 = vpop.xlane.xlu0 %365  ;;  %v369_v0 = vpop.xlane.xlu1 %368 }
  0xd6   : > { %v397_v8 = vmul.f32 0.03125, %v366_v21  ;;  %v398_v41 = vmul.f32 0.03125, %v369_v0  ;;  %v441_v61 = vmul.f32 %v1797_v59, %v1797_v59  ;;  %v442_v58 = vmul.f32 %v1801_v60, %v1801_v60 }
  0xd8   : > { %v1811_v62 = vsub.f32 %v1280_v9, %v397_v8  ;;  %v1815_v14 = vsub.f32 %v1281_v10, %v398_v41  ;;  %v497_v15 = vsel %vm285_vm0, %v441_v61, 0.0  ;;  %v500_v19 = vsel %vm285_vm0, %v442_v58, 0.0  ;;  %v1829_v41 = vld [vmem:[%s2035_s3] ss:$0 sm:$0xff] }
  0xd9   : > { %531 = vadd.xlane.f32.xlu1 %v530_v5  ;;  %498 = vadd.xlane.f32.xlu0 %v497_v15 }
  0xda   : > { %v453_v20 = vmul.f32 %v1811_v62, %v1811_v62  ;;  %v454_v26 = vmul.f32 %v1815_v14, %v1815_v14 }
  0xdc   : > { %v533_v24 = vsel %vm285_vm0, %v453_v20, 0.0  ;;  %v536_v63 = vsel %vm285_vm0, %v454_v26, 0.0 }
  0xdd   : > { %501 = vadd.xlane.f32.xlu1 %v500_v19  ;;  %534 = vadd.xlane.f32.xlu0 %v533_v24 }
  0xe1   : > { %537 = vadd.xlane.f32.xlu1 %v536_v63 }
 0x136   : > { %v457_v9 = vpop.xlane.xlu0 %456 }
 0x137   : > { %v539_v10 = vmul.f32 0.03125, %v457_v9 }
 0x139   : > { %v567_v11 = vadd.f32 1e-05, %v539_v10 }
 0x13a   : > { %v460_v46 = vpop.xlane.xlu1 %459  ;;  %v463_v25 = vpop.xlane.xlu0 %462 }
 0x13b   : > { %1357 = vrsqrt.f32 %v567_v11  ;;  %v540_v34 = vmul.f32 0.03125, %v460_v46  ;;  %v541_v35 = vmul.f32 0.03125, %v463_v25  ;;  %v1837_v11 = vld [vmem:[%s2036_s4] ss:$0 sm:$0xff] }
 0x13d   : > { %v568_v39 = vadd.f32 1e-05, %v540_v34  ;;  %v569_v40 = vadd.f32 1e-05, %v541_v35 }
 0x13e   : > { %v466_v31 = vpop.xlane.xlu1 %465  ;;  %v469_v44 = vpop.xlane.xlu0 %468 }
 0x13f   : > { %1359 = vrsqrt.f32 %v568_v39  ;;  %v542_v51 = vmul.f32 0.03125, %v466_v31  ;;  %v543_v48 = vmul.f32 0.03125, %v469_v44 }
 0x140   : > { %1361 = vrsqrt.f32 %v569_v40 }
 0x141   : > { %v570_v16 = vadd.f32 1e-05, %v542_v51  ;;  %v571_v3 = vadd.f32 1e-05, %v543_v48 }
 0x142   : > { %v472_v50 = vpop.xlane.xlu1 %471  ;;  %v505_v54 = vpop.xlane.xlu0 %504 }
 0x143   : > { %1363 = vrsqrt.f32 %v570_v16  ;;  %v544_v55 = vmul.f32 0.03125, %v472_v50  ;;  %v555_v56 = vmul.f32 0.03125, %v505_v54 }
 0x144   : > { %1365 = vrsqrt.f32 %v571_v3 }
 0x145   : > { %v1358_v36 = vpop.eup %1357  ;;  %v572_v53 = vadd.f32 1e-05, %v544_v55  ;;  %v583_v57 = vadd.f32 1e-05, %v555_v56 }
 0x146   : > { %v508_v7 = vpop.xlane.xlu1 %507  ;;  %v475_v21 = vpop.xlane.xlu0 %474  ;;  %v623_v0 = vmul.f32 %v1358_v36, %v1625_v29 }
 0x147   : > { %1367 = vrsqrt.f32 %v572_v53  ;;  %v556_v5 = vmul.f32 0.03125, %v508_v7  ;;  %v545_v8 = vmul.f32 0.03125, %v475_v21 }
 0x148   : > { %1369 = vrsqrt.f32 %v583_v57  ;;  %v658_v63 = vmul.f32 %v1829_v41, %v623_v0 }
 0x149   : > { %v1360_v61 = vpop.eup %1359  ;;  %v584_v58 = vadd.f32 1e-05, %v556_v5  ;;  %v573_v15 = vadd.f32 1e-05, %v545_v8 }
 0x14a   : > { %v1362_v19 = vpop.eup %1361  ;;  %v478_v20 = vpop.xlane.xlu1 %477  ;;  %v624_v24 = vmul.f32 %v1360_v61, %v1637_v49 }
 0x14b   : > { %v511_v26 = vpop.xlane.xlu0 %510  ;;  %v625_v29 = vmul.f32 %v1362_v19, %v1629_v30  ;;  %1371 = vrsqrt.f32 %v584_v58  ;;  %v546_v9 = vmul.f32 0.03125, %v478_v20  ;;  %v693_v30 = vadd.f32 %v1837_v11, %v658_v63 }
 0x14c   : > { %v557_v10 = vmul.f32 0.03125, %v511_v26  ;;  %1373 = vrsqrt.f32 %v573_v15  ;;  %v659_v46 = vmul.f32 %v1829_v41, %v624_v24 }
 0x14d   : > { %v1364_v25 = vpop.eup %1363  ;;  %v574_v34 = vadd.f32 1e-05, %v546_v9  ;;  %v660_v51 = vmul.f32 %v1829_v41, %v625_v29 }
 0x14e   : > { %v585_v35 = vadd.f32 1e-05, %v557_v10  ;;  %v1366_v39 = vpop.eup %1365  ;;  %v626_v49 = vmul.f32 %v1364_v25, %v1641_v2  ;;  %v514_v40 = vpop.xlane.xlu1 %513  ;;  %v694_v44 = vadd.f32 %v1837_v11, %v659_v46 }
 0x14f   : > { %v481_v31 = vpop.xlane.xlu0 %480  ;;  %v627_v48 = vmul.f32 %v1366_v39, %v1651_v1  ;;  %1375 = vrsqrt.f32 %v574_v34  ;;  %v558_v16 = vmul.f32 0.03125, %v514_v40  ;;  %v695_v21 = vadd.f32 %v1837_v11, %v660_v51 }
 0x150   : > { %v547_v3 = vmul.f32 0.03125, %v481_v31  ;;  %1377 = vrsqrt.f32 %v585_v35  ;;  %v721_v50 = vpack.c.bf16 %v694_v44, %v693_v30  ;;  %v661_v54 = vmul.f32 %v1829_v41, %v626_v49 }
 0x151   : > { %v1368_v55 = vpop.eup %1367  ;;  %v586_v56 = vadd.f32 1e-05, %v558_v16  ;;  %v662_v0 = vmul.f32 %v1829_v41, %v627_v48 }
 0x152   : > { %v575_v2 = vadd.f32 1e-05, %v547_v3  ;;  %v1370_v36 = vpop.eup %1369  ;;  %v628_v53 = vmul.f32 %v1368_v55, %v1655_v4  ;;  %v484_v57 = vpop.xlane.xlu1 %483  ;;  %1315 = vmatprep.mubr.msk.bf16.mxu0 %vm285_vm0, %v721_v50  ;;  %v696_v1 = vadd.f32 %v1837_v11, %v661_v54 }
 0x153   : > { %v517_v7 = vpop.xlane.xlu0 %516  ;;  %1379 = vrsqrt.f32 %v586_v56  ;;  %v548_v5 = vmul.f32 0.03125, %v484_v57  ;;  %v639_v15 = vmul.f32 %v1370_v36, %v1665_v6  ;;  %v697_v29 = vadd.f32 %v1837_v11, %v662_v0 }
 0x154   : > { %v559_v8 = vmul.f32 0.03125, %v517_v7  ;;  %1381 = vrsqrt.f32 %v575_v2  ;;  %v722_v61 = vpack.c.bf16 %v696_v1, %v695_v21  ;;  %v663_v58 = vmul.f32 %v1829_v41, %v628_v53 }
 0x155   : > { %v1372_v4 = vpop.eup %1371  ;;  %v576_v19 = vadd.f32 1e-05, %v548_v5  ;;  %v674_v46 = vmul.f32 %v1829_v41, %v639_v15 }
 0x156   : > { %v587_v20 = vadd.f32 1e-05, %v559_v8  ;;  %v1374_v26 = vpop.eup %1373  ;;  %v520_v24 = vpop.xlane.xlu1 %519  ;;  %1316 = vmatmul.mubr.msk.bf16.vlgmr.msra.gmra.mrb[0].mxu0 %vm285_vm0, %v722_v61  ;;  %v698_v9 = vadd.f32 %v1837_v11, %v663_v58  ;;  %v640_v10 = vmul.f32 %v1372_v4, %v1669_v12 }
 0x157   : > { %v487_v63 = vpop.xlane.xlu0 %486  ;;  %v629_v25 = vmul.f32 %v1374_v26, %v1679_v13  ;;  %1383 = vrsqrt.f32 %v576_v19  ;;  %v560_v6 = vmul.f32 0.03125, %v520_v24  ;;  %v709_v48 = vadd.f32 %v1837_v11, %v674_v46 }
 0x158   : > { %v549_v34 = vmul.f32 0.03125, %v487_v63  ;;  %1385 = vrsqrt.f32 %v587_v20  ;;  %v723_v35 = vpack.c.bf16 %v698_v9, %v697_v29  ;;  %v675_v39 = vmul.f32 %v1829_v41, %v640_v10 }
 0x159   : > { %v1376_v49 = vpop.eup %1375  ;;  %v588_v40 = vadd.f32 1e-05, %v560_v6  ;;  %v664_v16 = vmul.f32 %v1829_v41, %v629_v25 }
 0x15a   : > { %v577_v31 = vadd.f32 1e-05, %v549_v34  ;;  %v1378_v30 = vpop.eup %1377  ;;  %v630_v44 = vmul.f32 %v1376_v49, %v1683_v17  ;;  %v490_v51 = vpop.xlane.xlu1 %489  ;;  %1319 = vmatprep.mubr.msk.bf16.mxu0 %vm285_vm0, %v723_v35  ;;  %v710_v13 = vadd.f32 %v1837_v11, %v675_v39 }
 0x15b   : > { %v523_v12 = vpop.xlane.xlu0 %522  ;;  %v641_v3 = vmul.f32 %v1378_v30, %v1693_v18  ;;  %1387 = vrsqrt.f32 %v588_v40  ;;  %v550_v50 = vmul.f32 0.03125, %v490_v51  ;;  %v699_v1 = vadd.f32 %v1837_v11, %v664_v16 }
 0x15c   : > { %v561_v54 = vmul.f32 0.03125, %v523_v12  ;;  %1389 = vrsqrt.f32 %v577_v31  ;;  %v729_v55 = vpack.c.bf16 %v710_v13, %v709_v48  ;;  %v665_v56 = vmul.f32 %v1829_v41, %v630_v44 }
 0x15d   : > { %v1380_v17 = vpop.eup %1379  ;;  %v578_v2 = vadd.f32 1e-05, %v550_v50  ;;  %v676_v0 = vmul.f32 %v1829_v41, %v641_v3 }
 0x15e   : > { %v589_v36 = vadd.f32 1e-05, %v561_v54  ;;  %v1382_v53 = vpop.eup %1381  ;;  %v642_v57 = vmul.f32 %v1380_v17, %v1697_v22  ;;  %v526_v7 = vpop.xlane.xlu1 %525  ;;  %1331 = vmatprep.mubr.msk.bf16.mxu1 %vm285_vm0, %v729_v55  ;;  %v700_v18 = vadd.f32 %v1837_v11, %v665_v56 }
 0x15f   : > { %v493_v21 = vpop.xlane.xlu0 %492  ;;  %v631_v5 = vmul.f32 %v1382_v53, %v1707_v23  ;;  %1391 = vrsqrt.f32 %v578_v2  ;;  %v562_v8 = vmul.f32 0.03125, %v526_v7  ;;  %v711_v29 = vadd.f32 %v1837_v11, %v676_v0 }
 0x160   : > { %v551_v61 = vmul.f32 0.03125, %v493_v21  ;;  %1393 = vrsqrt.f32 %v589_v36  ;;  %v724_v58 = vpack.c.bf16 %v700_v18, %v699_v1  ;;  %v677_v15 = vmul.f32 %v1829_v41, %v642_v57 }
 0x161   : > { %v1384_v22 = vpop.eup %1383  ;;  %v590_v4 = vadd.f32 1e-05, %v562_v8  ;;  %v666_v9 = vmul.f32 %v1829_v41, %v631_v5 }
 0x162   : > { %v579_v19 = vadd.f32 1e-05, %v551_v61  ;;  %v1386_v20 = vpop.eup %1385  ;;  %v632_v26 = vmul.f32 %v1384_v22, %v1711_v27  ;;  %v496_v24 = vpop.xlane.xlu1 %495  ;;  %1320 = vmatmul.mubr.msk.bf16.gmra.mrb[4].mxu0 %vm285_vm0, %v724_v58  ;;  %v712_v23 = vadd.f32 %v1837_v11, %v677_v15 }
 0x163   : > { %v529_v63 = vpop.xlane.xlu0 %528  ;;  %v643_v10 = vmul.f32 %v1386_v20, %v1721_v28  ;;  %1395 = vrsqrt.f32 %v590_v4  ;;  %v552_v46 = vmul.f32 0.03125, %v496_v24  ;;  %v701_v44 = vadd.f32 %v1837_v11, %v666_v9 }
 0x164   : > { %v563_v25 = vmul.f32 0.03125, %v529_v63  ;;  %1397 = vrsqrt.f32 %v579_v19  ;;  %v730_v6 = vpack.c.bf16 %v712_v23, %v711_v29  ;;  %v667_v34 = vmul.f32 %v1829_v41, %v632_v26 }
 0x165   : > { %v1388_v27 = vpop.eup %1387  ;;  %v580_v35 = vadd.f32 1e-05, %v552_v46  ;;  %v678_v51 = vmul.f32 %v1829_v41, %v643_v10 }
 0x166   : > { %v591_v39 = vadd.f32 1e-05, %v563_v25  ;;  %v1390_v49 = vpop.eup %1389  ;;  %v644_v40 = vmul.f32 %v1388_v27, %v1725_v32  ;;  %v532_v31 = vpop.xlane.xlu1 %531  ;;  %1332 = vmatmul.mubr.msk.bf16.vlgmr.msra.gmra.mrb[0].mxu1 %vm285_vm0, %v730_v6  ;;  %v702_v28 = vadd.f32 %v1837_v11, %v667_v34 }
 0x167   : > { %v499_v30 = vpop.xlane.xlu0 %498  ;;  %v633_v12 = vmul.f32 %v1390_v49, %v1735_v33  ;;  %1399 = vrsqrt.f32 %v580_v35  ;;  %v564_v48 = vmul.f32 0.03125, %v532_v31  ;;  %v713_v36 = vadd.f32 %v1837_v11, %v678_v51 }
 0x168   : > { %v553_v13 = vmul.f32 0.03125, %v499_v30  ;;  %1401 = vrsqrt.f32 %v591_v39  ;;  %v725_v16 = vpack.c.bf16 %v702_v28, %v701_v44  ;;  %v679_v3 = vmul.f32 %v1829_v41, %v644_v40 }
 0x169   : > { %v1392_v32 = vpop.eup %1391  ;;  %v592_v50 = vadd.f32 1e-05, %v564_v48  ;;  %v668_v53 = vmul.f32 %v1829_v41, %v633_v12 }
 0x16a   : > { %v581_v54 = vadd.f32 1e-05, %v553_v13  ;;  %v1394_v55 = vpop.eup %1393  ;;  %v634_v56 = vmul.f32 %v1392_v32, %v1739_v37  ;;  %v502_v17 = vpop.xlane.xlu1 %501  ;;  %1323 = vmatprep.mubr.msk.bf16.mxu0 %vm285_vm0, %v725_v16  ;;  %v714_v33 = vadd.f32 %v1837_v11, %v679_v3 }
 0x16b   : > { %v535_v2 = vpop.xlane.xlu0 %534  ;;  %v645_v57 = vmul.f32 %v1394_v55, %v1749_v38  ;;  %1403 = vrsqrt.f32 %v592_v50  ;;  %v554_v7 = vmul.f32 0.03125, %v502_v17  ;;  %v703_v15 = vadd.f32 %v1837_v11, %v668_v53 }
 0x16c   : > { %v565_v21 = vmul.f32 0.03125, %v535_v2  ;;  %1405 = vrsqrt.f32 %v581_v54  ;;  %v731_v1 = vpack.c.bf16 %v714_v33, %v713_v36  ;;  %v669_v18 = vmul.f32 %v1829_v41, %v634_v56 }
 0x16d   : > { %v1396_v37 = vpop.eup %1395  ;;  %v582_v0 = vadd.f32 1e-05, %v554_v7  ;;  %v680_v22 = vmul.f32 %v1829_v41, %v645_v57 }
 0x16e   : > { %v593_v5 = vadd.f32 1e-05, %v565_v21  ;;  %v1398_v8 = vpop.eup %1397  ;;  %v646_v61 = vmul.f32 %v1396_v37, %v1753_v42  ;;  %v538_v58 = vpop.xlane.xlu1 %537  ;;  %1335 = vmatprep.mubr.msk.bf16.mxu1 %vm285_vm0, %v731_v1  ;;  %v704_v38 = vadd.f32 %v1837_v11, %v669_v18 }
 0x16f   : > { %v635_v4 = vmul.f32 %v1398_v8, %v1763_v43  ;;  %1407 = vrsqrt.f32 %v582_v0  ;;  %v566_v19 = vmul.f32 0.03125, %v538_v58  ;;  %v715_v23 = vadd.f32 %v1837_v11, %v680_v22 }
 0x170   : > { %1409 = vrsqrt.f32 %v593_v5  ;;  %v726_v20 = vpack.c.bf16 %v704_v38, %v703_v15  ;;  %v681_v26 = vmul.f32 %v1829_v41, %v646_v61 }
 0x171   : > { %v1400_v24 = vpop.eup %1399  ;;  %v594_v63 = vadd.f32 1e-05, %v566_v19  ;;  %v670_v10 = vmul.f32 %v1829_v41, %v635_v4 }
 0x172   : > { %v1402_v42 = vpop.eup %1401  ;;  %v636_v29 = vmul.f32 %v1400_v24, %v1767_v47  ;;  %1324 = vmatmul.mubr.msk.bf16.gmra.mrb[8].mxu0 %vm285_vm0, %v726_v20  ;;  %v716_v9 = vadd.f32 %v1837_v11, %v681_v26 }
 0x173   : > { %v647_v43 = vmul.f32 %v1402_v42, %v1780_v52  ;;  %1411 = vrsqrt.f32 %v594_v63  ;;  %v705_v47 = vadd.f32 %v1837_v11, %v670_v10 }
 0x174   : > { %v732_v46 = vpack.c.bf16 %v716_v9, %v715_v23  ;;  %v671_v25 = vmul.f32 %v1829_v41, %v636_v29 }
 0x175   : > { %v1404_v6 = vpop.eup %1403  ;;  %v682_v39 = vmul.f32 %v1829_v41, %v647_v43 }
 0x176   : > { %v1406_v34 = vpop.eup %1405  ;;  %v648_v27 = vmul.f32 %v1404_v6, %v1784_v45  ;;  %1336 = vmatmul.mubr.msk.bf16.gmra.mrb[4].mxu1 %vm285_vm0, %v732_v46  ;;  %v706_v35 = vadd.f32 %v1837_v11, %v671_v25 }
 0x177   : > { %v637_v49 = vmul.f32 %v1406_v34, %v1797_v59  ;;  %v717_v45 = vadd.f32 %v1837_v11, %v682_v39 }
 0x178   : > { %v727_v40 = vpack.c.bf16 %v706_v35, %v705_v47  ;;  %v683_v52 = vmul.f32 %v1829_v41, %v648_v27 }
 0x179   : > { %v1408_v31 = vpop.eup %1407  ;;  %v672_v51 = vmul.f32 %v1829_v41, %v637_v49 }
 0x17a   : > { %v1410_v30 = vpop.eup %1409  ;;  %v638_v44 = vmul.f32 %v1408_v31, %v1801_v60  ;;  %1327 = vmatprep.mubr.msk.bf16.mxu0 %vm285_vm0, %v727_v40  ;;  %v718_v28 = vadd.f32 %v1837_v11, %v683_v52 }
 0x17b   : > { %v649_v12 = vmul.f32 %v1410_v30, %v1811_v62  ;;  %v707_v60 = vadd.f32 %v1837_v11, %v672_v51 }
 0x17c   : > { %v733_v48 = vpack.c.bf16 %v718_v28, %v717_v45  ;;  %v673_v59 = vmul.f32 %v1829_v41, %v638_v44 }
 0x17d   : > { %v1412_v13 = vpop.eup %1411  ;;  %v684_v32 = vmul.f32 %v1829_v41, %v649_v12 }
 0x17e   : > { %v650_v16 = vmul.f32 %v1412_v13, %v1815_v14  ;;  %1339 = vmatprep.mubr.msk.bf16.mxu1 %vm285_vm0, %v733_v48  ;;  %v708_v3 = vadd.f32 %v1837_v11, %v673_v59  ;;  %v1936_v14 = vld [vmem:[%s2034_s2] ss:$0 sm:$0xff] }
 0x17f   : > { %v719_v62 = vadd.f32 %v1837_v11, %v684_v32 }
 0x180   : > { %v728_v50 = vpack.c.bf16 %v708_v3, %v707_v60  ;;  %v685_v54 = vmul.f32 %v1829_v41, %v650_v16 }
 0x182   : > { %1328 = vmatmul.mubr.msk.bf16.gmra.mrb[12].mxu0 %vm285_vm0, %v728_v50  ;;  %v720_v55 = vadd.f32 %v1837_v11, %v685_v54 }
 0x184   : > { %v734_v56 = vpack.c.bf16 %v720_v55, %v719_v62 }
 0x186   : > { %1340 = vmatmul.mubr.msk.bf16.gmra.mrb[8].mxu1 %vm285_vm0, %v734_v56 }
 0x229   : > { %v1317_v17 = vpop.f32.mrb[0].mxu0 }
 0x22a   : > { %v843_v2 = vadd.f32 %v1317_v17, %v1936_v14  ;;  %v834_v36 = vpop.f32.mrb[1].mxu0 }
 0x22b   : > { %v835_v41 = vadd.f32 %v1936_v14, %v834_v36  ;;  %v1318_v11 = vpop.f32.mrb[2].mxu0 }
 0x22c   : > { %v1200_v33 = vpack.c.bf16 %v843_v2, %v843_v2  ;;  %v846_v53 = vadd.f32 %v1318_v11, %v1936_v14  ;;  %v837_v57 = vpop.f32.mrb[3].mxu0 }
 0x22d   : > { %v1198_v7 = vpack.c.bf16 %v835_v41, %v835_v41  ;;  %v838_v21 = vadd.f32 %v1936_v14, %v837_v57 }
 0x22e   : > { %1060 = vst.msk [vmem:[%s1944_s12 + $0x8] sm:$0xf] %vm1057_vm1, %v1200_v33  ;;  %v1201_v1 = vpack.c.bf16 %v846_v53, %v846_v53 }
 0x22f   : > { %1058 = vst.msk [vmem:[%s1944_s12] sm:$0xf] %vm1057_vm1, %v1198_v7  ;;  %v1199_v18 = vpack.c.bf16 %v838_v21, %v838_v21 }
 0x230   : > { %1061 = vst.msk [vmem:[%s1944_s12 + $0xc] sm:$0xf] %vm1057_vm1, %v1201_v1 }
 0x231   : > { %1059 = vst.msk [vmem:[%s1944_s12 + $0x4] sm:$0xf] %vm1057_vm1, %v1199_v18 }
 0x235   : > { %v1321_v37 = vpop.f32.mrb[4].mxu0 }
 0x236   : > { %v859_v0 = vadd.f32 %v1321_v37, %v1936_v14  ;;  %v850_v5 = vpop.f32.mrb[5].mxu0 }
 0x237   : > { %v851_v8 = vadd.f32 %v1936_v14, %v850_v5  ;;  %v1322_v61 = vpop.f32.mrb[6].mxu0 }
 0x238   : > { %v1204_v58 = vpack.c.bf16 %v859_v0, %v859_v0  ;;  %v862_v15 = vadd.f32 %v1322_v61, %v1936_v14  ;;  %v853_v38 = vpop.f32.mrb[7].mxu0 }
 0x239   : > { %v1202_v22 = vpack.c.bf16 %v851_v8, %v851_v8  ;;  %v854_v4 = vadd.f32 %v1936_v14, %v853_v38  ;;  %v1333_v19 = vpop.f32.mrb[0].mxu1 }
 0x23a   : > { %1064 = vst.msk [vmem:[%s1944_s12 + $0x18] sm:$0xf] %vm1057_vm1, %v1204_v58  ;;  %v1205_v20 = vpack.c.bf16 %v862_v15, %v862_v15  ;;  %v907_v26 = vadd.f32 %v1333_v19, %v1936_v14  ;;  %v898_v24 = vpop.f32.mrb[1].mxu1 }
 0x23b   : > { %1062 = vst.msk [vmem:[%s1944_s12 + $0x10] sm:$0xf] %vm1057_vm1, %v1202_v22  ;;  %v1203_v63 = vpack.c.bf16 %v854_v4, %v854_v4  ;;  %v899_v42 = vadd.f32 %v1936_v14, %v898_v24  ;;  %v1334_v29 = vpop.f32.mrb[2].mxu1 }
 0x23c   : > { %1065 = vst.msk [vmem:[%s1944_s12 + $0x1c] sm:$0xf] %vm1057_vm1, %v1205_v20  ;;  %v1216_v23 = vpack.c.bf16 %v907_v26, %v907_v26  ;;  %v910_v9 = vadd.f32 %v1334_v29, %v1936_v14  ;;  %v901_v10 = vpop.f32.mrb[3].mxu1 }
 0x23d   : > { %1063 = vst.msk [vmem:[%s1944_s12 + $0x14] sm:$0xf] %vm1057_vm1, %v1203_v63  ;;  %v1214_v43 = vpack.c.bf16 %v899_v42, %v899_v42  ;;  %v902_v46 = vadd.f32 %v1936_v14, %v901_v10 }
 0x23e   : > { %1076 = vst.msk [vmem:[%s1944_s12 + $0x48] sm:$0xf] %vm1057_vm1, %v1216_v23  ;;  %v1217_v25 = vpack.c.bf16 %v910_v9, %v910_v9 }
 0x23f   : > { %1074 = vst.msk [vmem:[%s1944_s12 + $0x40] sm:$0xf] %vm1057_vm1, %v1214_v43  ;;  %v1215_v6 = vpack.c.bf16 %v902_v46, %v902_v46 }
 0x240   : > { %1077 = vst.msk [vmem:[%s1944_s12 + $0x4c] sm:$0xf] %vm1057_vm1, %v1217_v25 }
 0x241   : > { %1075 = vst.msk [vmem:[%s1944_s12 + $0x44] sm:$0xf] %vm1057_vm1, %v1215_v6 }
 0x245   : > { %v1325_v34 = vpop.f32.mrb[8].mxu0 }
 0x246   : > { %v875_v27 = vadd.f32 %v1325_v34, %v1936_v14  ;;  %v866_v47 = vpop.f32.mrb[9].mxu0 }
 0x247   : > { %v867_v35 = vadd.f32 %v1936_v14, %v866_v47  ;;  %v1326_v39 = vpop.f32.mrb[10].mxu0 }
 0x248   : > { %v1208_v49 = vpack.c.bf16 %v875_v27, %v875_v27  ;;  %v878_v40 = vadd.f32 %v1326_v39, %v1936_v14  ;;  %v869_v52 = vpop.f32.mrb[11].mxu0 }
 0x249   : > { %v1206_v31 = vpack.c.bf16 %v867_v35, %v867_v35  ;;  %v870_v30 = vadd.f32 %v1936_v14, %v869_v52  ;;  %v1337_v44 = vpop.f32.mrb[4].mxu1 }
 0x24a   : > { %1068 = vst.msk [vmem:[%s1944_s12 + $0x28] sm:$0xf] %vm1057_vm1, %v1208_v49  ;;  %v1209_v45 = vpack.c.bf16 %v878_v40, %v878_v40  ;;  %v923_v28 = vadd.f32 %v1337_v44, %v1936_v14  ;;  %v914_v51 = vpop.f32.mrb[5].mxu1 }
 0x24b   : > { %1066 = vst.msk [vmem:[%s1944_s12 + $0x20] sm:$0xf] %vm1057_vm1, %v1206_v31  ;;  %v1207_v12 = vpack.c.bf16 %v870_v30, %v870_v30  ;;  %v915_v48 = vadd.f32 %v1936_v14, %v914_v51  ;;  %v1338_v59 = vpop.f32.mrb[6].mxu1 }
 0x24c   : > { %1069 = vst.msk [vmem:[%s1944_s12 + $0x2c] sm:$0xf] %vm1057_vm1, %v1209_v45  ;;  %v1220_v13 = vpack.c.bf16 %v923_v28, %v923_v28  ;;  %v926_v16 = vadd.f32 %v1338_v59, %v1936_v14  ;;  %v917_v60 = vpop.f32.mrb[7].mxu1 }
 0x24d   : > { %1067 = vst.msk [vmem:[%s1944_s12 + $0x24] sm:$0xf] %vm1057_vm1, %v1207_v12  ;;  %v1218_v3 = vpack.c.bf16 %v915_v48, %v915_v48  ;;  %v918_v32 = vadd.f32 %v1936_v14, %v917_v60 }
 0x24e   : > { %1080 = vst.msk [vmem:[%s1944_s12 + $0x58] sm:$0xf] %vm1057_vm1, %v1220_v13  ;;  %v1221_v50 = vpack.c.bf16 %v926_v16, %v926_v16 }
 0x24f   : > { %1078 = vst.msk [vmem:[%s1944_s12 + $0x50] sm:$0xf] %vm1057_vm1, %v1218_v3  ;;  %v1219_v54 = vpack.c.bf16 %v918_v32, %v918_v32 }
 0x250   : > { %1081 = vst.msk [vmem:[%s1944_s12 + $0x5c] sm:$0xf] %vm1057_vm1, %v1221_v50 }
 0x251   : > { %1079 = vst.msk [vmem:[%s1944_s12 + $0x54] sm:$0xf] %vm1057_vm1, %v1219_v54 }
 0x255   : > { %v1329_v62 = vpop.f32.mrb[12].mxu0 }
 0x256   : > { %v891_v55 = vadd.f32 %v1329_v62, %v1936_v14  ;;  %v882_v56 = vpop.f32.mrb[13].mxu0 }
 0x257   : > { %v883_v17 = vadd.f32 %v1936_v14, %v882_v56  ;;  %v1330_v2 = vpop.f32.mrb[14].mxu0 }
 0x258   : > { %v1212_v36 = vpack.c.bf16 %v891_v55, %v891_v55  ;;  %v894_v41 = vadd.f32 %v1330_v2, %v1936_v14  ;;  %v885_v11 = vpop.f32.mrb[15].mxu0 }
 0x259   : > { %v1210_v33 = vpack.c.bf16 %v883_v17, %v883_v17  ;;  %v886_v53 = vadd.f32 %v1936_v14, %v885_v11  ;;  %v1341_v57 = vpop.f32.mrb[8].mxu1 }
 0x25a   : > { %1072 = vst.msk [vmem:[%s1944_s12 + $0x38] sm:$0xf] %vm1057_vm1, %v1212_v36  ;;  %v1213_v7 = vpack.c.bf16 %v894_v41, %v894_v41  ;;  %v939_v21 = vadd.f32 %v1341_v57, %v1936_v14  ;;  %v930_v1 = vpop.f32.mrb[9].mxu1 }
 0x25b   : > { %1070 = vst.msk [vmem:[%s1944_s12 + $0x30] sm:$0xf] %vm1057_vm1, %v1210_v33  ;;  %v1211_v18 = vpack.c.bf16 %v886_v53, %v886_v53  ;;  %v931_v37 = vadd.f32 %v1936_v14, %v930_v1  ;;  %v1342_v0 = vpop.f32.mrb[10].mxu1 }
 0x25c   : > { %1073 = vst.msk [vmem:[%s1944_s12 + $0x3c] sm:$0xf] %vm1057_vm1, %v1213_v7  ;;  %v1224_v5 = vpack.c.bf16 %v939_v21, %v939_v21  ;;  %v942_v8 = vadd.f32 %v1342_v0, %v1936_v14  ;;  %v933_v61 = vpop.f32.mrb[11].mxu1 }
 0x25d   : > { %1071 = vst.msk [vmem:[%s1944_s12 + $0x34] sm:$0xf] %vm1057_vm1, %v1211_v18  ;;  %v1222_v58 = vpack.c.bf16 %v931_v37, %v931_v37  ;;  %v934_v15 = vadd.f32 %v1936_v14, %v933_v61 }
 0x25e   : > { %1084 = vst.msk [vmem:[%s1944_s12 + $0x68] sm:$0xf] %vm1057_vm1, %v1224_v5  ;;  %v1225_v38 = vpack.c.bf16 %v942_v8, %v942_v8 }
 0x25f   : > { %1082 = vst.msk [vmem:[%s1944_s12 + $0x60] sm:$0xf] %vm1057_vm1, %v1222_v58  ;;  %v1223_v22 = vpack.c.bf16 %v934_v15, %v934_v15 }
 0x260   : > { %1085 = vst.msk [vmem:[%s1944_s12 + $0x6c] sm:$0xf] %vm1057_vm1, %v1225_v38 }
 0x261   : > { %1083 = vst.msk [vmem:[%s1944_s12 + $0x64] sm:$0xf] %vm1057_vm1, %v1223_v22 }
 0x262 PF: > { %s15_s18 = sadd.s32 1, %s1419_s18  }
 0x263   : > { %p12_p4 = scmp.ge.s32.totalorder %s15_s18, 5  }
 0x265   :  { %14 = sbr.rel (!%p12_p4) target bundleno = 1 (0x1), region = 70 }

// kernel: s2_vision_tower_forward.9
= control target key start
LH: loop header
LB: loop body
LE: loop exit
PB: predicated region body
PF: predicated region fallthrough
CT: control target
= control target key end

     0   :  { %s1101_s15 = smov 0   ;;  %s1253_s0 = inlined_call_operand.vmem [shape: bf16[672,32], index: 0, kind: input, shape index: {}]   ;;  %s1254_s1 = inlined_call_operand.vmem [shape: bf16[32,32], index: 1, kind: input, shape index: {}]   ;;  %s1255_s2 = inlined_call_operand.vmem [shape: f32[1,32], index: 2, kind: input, shape index: {}]   ;;  %s1256_s3 = inlined_call_operand.vmem [shape: bf16[672,32], index: 3, kind: input, shape index: {}]   ;;  %s1257_s4 = inlined_call_operand.vmem [shape: bf16[672,32], index: 4, kind: output, shape index: {}]  }
   0x1 LB: > { %s826_s16 = sadd.s32 4294967295, %s1074_s15   ;;  %p830_p0 = scmp.ge.s32.totalorder %s1074_s15, 1  ;;  %s1074_s15 = sphi %s1101_s15, %s14_s15  }
   0x2   : > { %p174_p1 = scmp.lt.s32.totalorder %s1074_s15, 4 }
   0x4   : > { %p175_p2 = pnand %p830_p0, %p174_p1 }
   0x5   : > { %v1052_v0 = vld [vmem:[%s1254_s1] sm:$0xff] (!%p175_p2)   ;;  %s205_s19 = smul.u32 (!%p175_p2), 28, %s826_s16  ;;  %v1053_v1 = vld [vmem:[%s1254_s1 + $0x8] sm:$0xff] (!%p175_p2)   ;;  %vm345_vm0 = vcmask (!%p175_p2), 261120   ;;  %vm729_vm1 = vcmask (!%p175_p2), 257024  }
   0x6   : > { %178 = sbr.rel (%p175_p2) target bundleno = 264 (0x108), region = 36  ;;  %1008 = vmatprep.subr.bf16.mxu0 (!%p175_p2), %v1052_v0  ;;  %1040 = vmatprep.subr.bf16.mxu1 (!%p175_p2), %v1052_v0  ;;  %v1146_v18 = vld [vmem:[%s1255_s2] ss:$0 sm:$0xff] (!%p175_p2) }
   0x7   : > { %p206_p3 = scmp.lt.s32.totalorder (!%p175_p2), %s205_s19, 83  ;;  %1009 = vmatpush3.bf16.msra.mxu0 (!%p175_p2), %v1052_v0  ;;  %1042 = vmatpush3.bf16.msra.mxu1 (!%p175_p2), %v1052_v0 }
   0x8   : > { %1010 = vmatprep.subr.bf16.mxu0 (!%p175_p2), %v1053_v1  ;;  %1041 = vmatprep.subr.bf16.mxu1 (!%p175_p2), %v1053_v1 }
   0xb   : > { %1011 = vmatpush3.bf16.msra.mxu0 (!%p175_p2), %v1053_v1  ;;  %1043 = vmatpush3.bf16.msra.mxu1 (!%p175_p2), %v1053_v1 }
   0xd   : > { %s1259_s19 = smov (!%p206_p3, %s205_s19), 83 }
   0xe   : > { %s1115_s22 = sshll.u32 %s1259_s19, 2 }
   0xf   : > { %s209_s25 = scalar_lea.vmem %s1253_s0, %s1115_s22  ;;  %s1139_s28 = scalar_lea.vmem %s1256_s3, %s1115_s22 }
  0x10   : > { %v1054_v2 = vld [vmem:[%s209_s25] sm:$0xff]   ;;  %v1055_v3 = vld [vmem:[%s209_s25 + $0x8] sm:$0xff]   ;;  %v1058_v6 = vld [vmem:[%s209_s25 + $0x10] sm:$0xff]   ;;  %s1158_s7 = scalar_lea.vmem %s1257_s4, %s1115_s22 }
  0x11   : > { %1012 = vmatprep.mubr.msk.bf16.mxu0 %vm345_vm0, %v1054_v2  ;;  %v1056_v4 = vld [vmem:[%s209_s25 + $0x40] sm:$0xff]   ;;  %v1057_v5 = vld [vmem:[%s209_s25 + $0x48] sm:$0xff]   ;;  %v1060_v7 = vld [vmem:[%s209_s25 + $0x50] sm:$0xff]  }
  0x12   : > { %1013 = vmatmul.mubr.msk.bf16.vlgmr.msra.gmra.mrb[0].mxu0 %vm345_vm0, %v1055_v3  ;;  %1028 = vmatprep.mubr.msk.bf16.mxu1 %vm345_vm0, %v1056_v4  ;;  %v1059_v8 = vld [vmem:[%s209_s25 + $0x18] sm:$0xff]   ;;  %v1062_v9 = vld [vmem:[%s209_s25 + $0x20] sm:$0xff]   ;;  %v1063_v12 = vld [vmem:[%s209_s25 + $0x28] sm:$0xff]  }
  0x13   : > { %1029 = vmatmul.mubr.msk.bf16.vlgmr.msra.gmra.mrb[0].mxu1 %vm345_vm0, %v1057_v5  ;;  %1016 = vmatprep.mubr.msk.bf16.mxu0 %vm345_vm0, %v1058_v6  ;;  %v1061_v10 = vld [vmem:[%s209_s25 + $0x58] sm:$0xff]   ;;  %v1064_v11 = vld [vmem:[%s209_s25 + $0x60] sm:$0xff]   ;;  %v1066_v13 = vld [vmem:[%s209_s25 + $0x30] sm:$0xff]  }
  0x14   : > { %1032 = vmatprep.mubr.msk.bf16.mxu1 %vm345_vm0, %v1060_v7  ;;  %v1065_v14 = vld [vmem:[%s209_s25 + $0x68] sm:$0xff]   ;;  %v1067_v15 = vld [vmem:[%s209_s25 + $0x38] sm:$0xff]   ;;  %v924_v17 = vld [vmem:[%s1139_s28] sm:$0xff]  }
  0x15   : > { %v979_v16 = vld [vmem:[%s1139_s28 + $0x8] sm:$0xff]   ;;  %v986_v21 = vld [vmem:[%s1139_s28 + $0x40] sm:$0xff]   ;;  %v925_v23 = vunpack.c.l.bf16 %v924_v17  ;;  %v926_v30 = vunpack.c.h.bf16 %v924_v17  ;;  %v981_v43 = vld [vmem:[%s1139_s28 + $0x18] sm:$0xff]  }
  0x16   : > { %v987_v19 = vld [vmem:[%s1139_s28 + $0x48] sm:$0xff]   ;;  %v929_v20 = vunpack.c.l.bf16 %v979_v16  ;;  %v930_v26 = vunpack.c.h.bf16 %v979_v16  ;;  %v957_v32 = vunpack.c.l.bf16 %v986_v21  ;;  %v958_v44 = vunpack.c.h.bf16 %v986_v21  ;;  %v980_v50 = vld [vmem:[%s1139_s28 + $0x10] sm:$0xff]   ;;  %v989_v55 = vld [vmem:[%s1139_s28 + $0x58] sm:$0xff]  }
  0x17   : > { %v961_v27 = vunpack.c.l.bf16 %v987_v19  ;;  %v962_v38 = vunpack.c.h.bf16 %v987_v19  ;;  %v937_v59 = vunpack.c.l.bf16 %v981_v43  ;;  %v988_v60 = vld [vmem:[%s1139_s28 + $0x50] sm:$0xff]   ;;  %v933_v1 = vunpack.c.l.bf16 %v980_v50 }
  0x18   : > { %v938_v5 = vunpack.c.h.bf16 %v981_v43  ;;  %v969_v6 = vunpack.c.l.bf16 %v989_v55  ;;  %v970_v19 = vunpack.c.h.bf16 %v989_v55 }
  0x1a   : > { %1017 = vmatmul.mubr.msk.bf16.gmra.mrb[4].mxu0 %vm345_vm0, %v1059_v8 }
  0x1b   : > { %1020 = vmatprep.mubr.msk.bf16.mxu0 %vm345_vm0, %v1062_v9  ;;  %1033 = vmatmul.mubr.msk.bf16.gmra.mrb[4].mxu1 %vm345_vm0, %v1061_v10  ;;  %v934_v10 = vunpack.c.h.bf16 %v980_v50 }
  0x1c   : > { %1036 = vmatprep.mubr.msk.bf16.mxu1 %vm345_vm0, %v1064_v11 }
  0x22   : > { %1021 = vmatmul.mubr.msk.bf16.gmra.mrb[8].mxu0 %vm345_vm0, %v1063_v12  ;;  %v965_v12 = vunpack.c.l.bf16 %v988_v60 }
  0x23   : > { %1024 = vmatprep.mubr.msk.bf16.mxu0 %vm345_vm0, %v1066_v13  ;;  %1037 = vmatmul.mubr.msk.bf16.gmra.mrb[8].mxu1 %vm345_vm0, %v1065_v14 }
  0x2a   : > { %1025 = vmatmul.mubr.msk.bf16.gmra.mrb[12].mxu0 %vm345_vm0, %v1067_v15 }
  0xe5   : > { %v1014_v22 = vpop.f32.mrb[0].mxu0 }
  0xe6   : > { %v431_v24 = vadd.f32 %v1014_v22, %v1146_v18  ;;  %v422_v25 = vpop.f32.mrb[1].mxu0  ;;  %v1030_v31 = vpop.f32.mrb[0].mxu1 }
  0xe7   : > { %v423_v28 = vadd.f32 %v1146_v18, %v422_v25  ;;  %v1015_v29 = vpop.f32.mrb[2].mxu0  ;;  %v495_v36 = vadd.f32 %v1030_v31, %v1146_v18  ;;  %v486_v37 = vpop.f32.mrb[1].mxu1  ;;  %v966_v25 = vunpack.c.h.bf16 %v988_v60  ;;  %v982_v31 = vld [vmem:[%s1139_s28 + $0x20] sm:$0xff]  }
  0xe8   : > { %v591_v33 = vadd.f32 %v929_v20, %v431_v24  ;;  %v434_v34 = vadd.f32 %v1015_v29, %v1146_v18  ;;  %v425_v35 = vpop.f32.mrb[3].mxu0  ;;  %v487_v41 = vadd.f32 %v1146_v18, %v486_v37  ;;  %v1031_v42 = vpop.f32.mrb[2].mxu1  ;;  %v983_v24 = vld [vmem:[%s1139_s28 + $0x28] sm:$0xff]   ;;  %v942_v55 = vunpack.c.h.bf16 %v982_v31 }
  0xe9   : > { %v589_v39 = vadd.f32 %v925_v23, %v423_v28  ;;  %v426_v40 = vadd.f32 %v1146_v18, %v425_v35  ;;  %v607_v47 = vadd.f32 %v961_v27, %v495_v36  ;;  %v498_v48 = vadd.f32 %v1031_v42, %v1146_v18  ;;  %v489_v49 = vpop.f32.mrb[3].mxu1  ;;  %v991_v36 = vld [vmem:[%s1139_s28 + $0x68] sm:$0xff]  }
  0xea   : > { %v897_v45 = vpack.c.bf16 %v591_v33, %v591_v33  ;;  %v592_v46 = vadd.f32 %v930_v26, %v434_v34  ;;  %v605_v53 = vadd.f32 %v957_v32, %v487_v41  ;;  %v490_v54 = vadd.f32 %v1146_v18, %v489_v49  ;;  %v990_v41 = vld [vmem:[%s1139_s28 + $0x60] sm:$0xff]  }
  0xeb   : > { %v895_v51 = vpack.c.bf16 %v589_v39, %v589_v39  ;;  %v590_v52 = vadd.f32 %v926_v30, %v426_v40  ;;  %v913_v57 = vpack.c.bf16 %v607_v47, %v607_v47  ;;  %v608_v58 = vadd.f32 %v962_v38, %v498_v48 }
  0xec   : > { %732 = vst.msk [vmem:[%s1158_s7 + $0x8] sm:$0xf] %vm729_vm1, %v897_v45  ;;  %v898_v56 = vpack.c.bf16 %v592_v46, %v592_v46  ;;  %v911_v62 = vpack.c.bf16 %v605_v53, %v605_v53  ;;  %v606_v0 = vadd.f32 %v958_v44, %v490_v54  ;;  %v945_v40 = vunpack.c.l.bf16 %v983_v24 }
  0xed   : > { %730 = vst.msk [vmem:[%s1158_s7] sm:$0xf] %vm729_vm1, %v895_v51  ;;  %v896_v61 = vpack.c.bf16 %v590_v52, %v590_v52  ;;  %v1018_v63 = vpop.f32.mrb[4].mxu0  ;;  %748 = vst.msk [vmem:[%s1158_s7 + $0x48] sm:$0xf] %vm729_vm1, %v913_v57  ;;  %v914_v2 = vpack.c.bf16 %v608_v58, %v608_v58  ;;  %v941_v46 = vunpack.c.l.bf16 %v982_v31  ;;  %v946_v50 = vunpack.c.h.bf16 %v983_v24 }
  0xee   : > { %733 = vst.msk [vmem:[%s1158_s7 + $0xc] sm:$0xf] %vm729_vm1, %v898_v56  ;;  %v447_v3 = vadd.f32 %v1018_v63, %v1146_v18  ;;  %v438_v4 = vpop.f32.mrb[5].mxu0  ;;  %746 = vst.msk [vmem:[%s1158_s7 + $0x40] sm:$0xf] %vm729_vm1, %v911_v62  ;;  %v912_v7 = vpack.c.bf16 %v606_v0, %v606_v0  ;;  %v1034_v11 = vpop.f32.mrb[4].mxu1  ;;  %v977_v51 = vunpack.c.l.bf16 %v991_v36  ;;  %v973_v57 = vunpack.c.l.bf16 %v990_v41 }
  0xef   : > { %731 = vst.msk [vmem:[%s1158_s7 + $0x4] sm:$0xf] %vm729_vm1, %v896_v61  ;;  %v439_v8 = vadd.f32 %v1146_v18, %v438_v4  ;;  %v1019_v9 = vpop.f32.mrb[6].mxu0  ;;  %749 = vst.msk [vmem:[%s1158_s7 + $0x4c] sm:$0xf] %vm729_vm1, %v914_v2  ;;  %v511_v16 = vadd.f32 %v1034_v11, %v1146_v18  ;;  %v502_v17 = vpop.f32.mrb[5].mxu1  ;;  %v978_v63 = vunpack.c.h.bf16 %v991_v36 }
  0xf0   : > { %v595_v13 = vadd.f32 %v937_v59, %v447_v3  ;;  %v450_v14 = vadd.f32 %v1019_v9, %v1146_v18  ;;  %v441_v15 = vpop.f32.mrb[7].mxu0  ;;  %747 = vst.msk [vmem:[%s1158_s7 + $0x44] sm:$0xf] %vm729_vm1, %v912_v7  ;;  %v503_v22 = vadd.f32 %v1146_v18, %v502_v17  ;;  %v1035_v23 = vpop.f32.mrb[6].mxu1  ;;  %v985_v4 = vld [vmem:[%s1139_s28 + $0x38] sm:$0xff]   ;;  %v984_v11 = vld [vmem:[%s1139_s28 + $0x30] sm:$0xff]  }
  0xf1   : > { %v593_v20 = vadd.f32 %v933_v1, %v439_v8  ;;  %v442_v21 = vadd.f32 %v1146_v18, %v441_v15  ;;  %v611_v28 = vadd.f32 %v969_v6, %v511_v16  ;;  %v514_v29 = vadd.f32 %v1035_v23, %v1146_v18  ;;  %v505_v30 = vpop.f32.mrb[7].mxu1 }
  0xf2   : > { %v901_v26 = vpack.c.bf16 %v595_v13, %v595_v13  ;;  %v596_v27 = vadd.f32 %v938_v5, %v450_v14  ;;  %v609_v34 = vadd.f32 %v965_v12, %v503_v22  ;;  %v506_v35 = vadd.f32 %v1146_v18, %v505_v30 }
  0xf3   : > { %v899_v32 = vpack.c.bf16 %v593_v20, %v593_v20  ;;  %v594_v33 = vadd.f32 %v934_v10, %v442_v21  ;;  %v917_v38 = vpack.c.bf16 %v611_v28, %v611_v28  ;;  %v612_v39 = vadd.f32 %v970_v19, %v514_v29 }
  0xf4   : > { %736 = vst.msk [vmem:[%s1158_s7 + $0x18] sm:$0xf] %vm729_vm1, %v901_v26  ;;  %v902_v37 = vpack.c.bf16 %v596_v27, %v596_v27  ;;  %v915_v43 = vpack.c.bf16 %v609_v34, %v609_v34  ;;  %v610_v45 = vadd.f32 %v966_v25, %v506_v35  ;;  %v974_v5 = vunpack.c.h.bf16 %v990_v41 }
  0xf5   : > { %734 = vst.msk [vmem:[%s1158_s7 + $0x10] sm:$0xf] %vm729_vm1, %v899_v32  ;;  %v900_v42 = vpack.c.bf16 %v594_v33, %v594_v33  ;;  %v1022_v44 = vpop.f32.mrb[8].mxu0  ;;  %752 = vst.msk [vmem:[%s1158_s7 + $0x58] sm:$0xf] %vm729_vm1, %v917_v38  ;;  %v918_v47 = vpack.c.bf16 %v612_v39, %v612_v39  ;;  %v953_v20 = vunpack.c.l.bf16 %v985_v4  ;;  %v949_v25 = vunpack.c.l.bf16 %v984_v11 }
  0xf6   : > { %737 = vst.msk [vmem:[%s1158_s7 + $0x1c] sm:$0xf] %vm729_vm1, %v902_v37  ;;  %v463_v48 = vadd.f32 %v1022_v44, %v1146_v18  ;;  %v454_v49 = vpop.f32.mrb[9].mxu0  ;;  %750 = vst.msk [vmem:[%s1158_s7 + $0x50] sm:$0xf] %vm729_vm1, %v915_v43  ;;  %v916_v52 = vpack.c.bf16 %v610_v45, %v610_v45  ;;  %v1038_v56 = vpop.f32.mrb[8].mxu1  ;;  %v954_v29 = vunpack.c.h.bf16 %v985_v4  ;;  %v950_v33 = vunpack.c.h.bf16 %v984_v11 }
  0xf7   : > { %735 = vst.msk [vmem:[%s1158_s7 + $0x14] sm:$0xf] %vm729_vm1, %v900_v42  ;;  %v455_v53 = vadd.f32 %v1146_v18, %v454_v49  ;;  %v1023_v54 = vpop.f32.mrb[10].mxu0  ;;  %753 = vst.msk [vmem:[%s1158_s7 + $0x5c] sm:$0xf] %vm729_vm1, %v918_v47  ;;  %v527_v61 = vadd.f32 %v1038_v56, %v1146_v18  ;;  %v518_v62 = vpop.f32.mrb[9].mxu1 }
  0xf8   : > { %v599_v58 = vadd.f32 %v945_v40, %v463_v48  ;;  %v466_v59 = vadd.f32 %v1023_v54, %v1146_v18  ;;  %v457_v60 = vpop.f32.mrb[11].mxu0  ;;  %751 = vst.msk [vmem:[%s1158_s7 + $0x54] sm:$0xf] %vm729_vm1, %v916_v52  ;;  %v519_v2 = vadd.f32 %v1146_v18, %v518_v62  ;;  %v1039_v3 = vpop.f32.mrb[10].mxu1 }
  0xf9   : > { %v597_v0 = vadd.f32 %v941_v46, %v455_v53  ;;  %v458_v1 = vadd.f32 %v1146_v18, %v457_v60  ;;  %v615_v8 = vadd.f32 %v977_v51, %v527_v61  ;;  %v530_v9 = vadd.f32 %v1039_v3, %v1146_v18  ;;  %v521_v10 = vpop.f32.mrb[11].mxu1 }
  0xfa   : > { %v905_v6 = vpack.c.bf16 %v599_v58, %v599_v58  ;;  %v600_v7 = vadd.f32 %v946_v50, %v466_v59  ;;  %v613_v14 = vadd.f32 %v973_v57, %v519_v2  ;;  %v522_v15 = vadd.f32 %v1146_v18, %v521_v10 }
  0xfb   : > { %v903_v12 = vpack.c.bf16 %v597_v0, %v597_v0  ;;  %v598_v13 = vadd.f32 %v942_v55, %v458_v1  ;;  %v921_v17 = vpack.c.bf16 %v615_v8, %v615_v8  ;;  %v616_v19 = vadd.f32 %v978_v63, %v530_v9 }
  0xfc   : > { %740 = vst.msk [vmem:[%s1158_s7 + $0x28] sm:$0xf] %vm729_vm1, %v905_v6  ;;  %v906_v16 = vpack.c.bf16 %v600_v7, %v600_v7  ;;  %v919_v22 = vpack.c.bf16 %v613_v14, %v613_v14  ;;  %v614_v24 = vadd.f32 %v974_v5, %v522_v15 }
  0xfd   : > { %738 = vst.msk [vmem:[%s1158_s7 + $0x20] sm:$0xf] %vm729_vm1, %v903_v12  ;;  %v904_v21 = vpack.c.bf16 %v598_v13, %v598_v13  ;;  %v1026_v23 = vpop.f32.mrb[12].mxu0  ;;  %756 = vst.msk [vmem:[%s1158_s7 + $0x68] sm:$0xf] %vm729_vm1, %v921_v17  ;;  %v922_v26 = vpack.c.bf16 %v616_v19, %v616_v19 }
  0xfe   : > { %741 = vst.msk [vmem:[%s1158_s7 + $0x2c] sm:$0xf] %vm729_vm1, %v906_v16  ;;  %v479_v27 = vadd.f32 %v1026_v23, %v1146_v18  ;;  %v470_v28 = vpop.f32.mrb[13].mxu0  ;;  %754 = vst.msk [vmem:[%s1158_s7 + $0x60] sm:$0xf] %vm729_vm1, %v919_v22  ;;  %v920_v30 = vpack.c.bf16 %v614_v24, %v614_v24 }
  0xff   : > { %739 = vst.msk [vmem:[%s1158_s7 + $0x24] sm:$0xf] %vm729_vm1, %v904_v21  ;;  %v471_v31 = vadd.f32 %v1146_v18, %v470_v28  ;;  %v1027_v32 = vpop.f32.mrb[14].mxu0  ;;  %757 = vst.msk [vmem:[%s1158_s7 + $0x6c] sm:$0xf] %vm729_vm1, %v922_v26 }
 0x100   : > { %v603_v34 = vadd.f32 %v953_v20, %v479_v27  ;;  %v482_v35 = vadd.f32 %v1027_v32, %v1146_v18  ;;  %v473_v36 = vpop.f32.mrb[15].mxu0  ;;  %755 = vst.msk [vmem:[%s1158_s7 + $0x64] sm:$0xf] %vm729_vm1, %v920_v30 }
 0x101   : > { %v601_v37 = vadd.f32 %v949_v25, %v471_v31  ;;  %v474_v38 = vadd.f32 %v1146_v18, %v473_v36 }
 0x102   : > { %v909_v39 = vpack.c.bf16 %v603_v34, %v603_v34  ;;  %v604_v40 = vadd.f32 %v954_v29, %v482_v35 }
 0x103   : > { %v907_v41 = vpack.c.bf16 %v601_v37, %v601_v37  ;;  %v602_v42 = vadd.f32 %v950_v33, %v474_v38 }
 0x104   : > { %744 = vst.msk [vmem:[%s1158_s7 + $0x38] sm:$0xf] %vm729_vm1, %v909_v39  ;;  %v910_v43 = vpack.c.bf16 %v604_v40, %v604_v40 }
 0x105   : > { %742 = vst.msk [vmem:[%s1158_s7 + $0x30] sm:$0xf] %vm729_vm1, %v907_v41  ;;  %v908_v44 = vpack.c.bf16 %v602_v42, %v602_v42 }
 0x106   : > { %745 = vst.msk [vmem:[%s1158_s7 + $0x3c] sm:$0xf] %vm729_vm1, %v910_v43 }
 0x107   : > { %743 = vst.msk [vmem:[%s1158_s7 + $0x34] sm:$0xf] %vm729_vm1, %v908_v44 }
 0x108 PF: > { %s14_s15 = sadd.s32 1, %s1074_s15  }
 0x109   : > { %p11_p4 = scmp.ge.s32.totalorder %s14_s15, 5  }
 0x10b   :  { %13 = sbr.rel (!%p11_p4) target bundleno = 1 (0x1), region = 69 }

// kernel: s2_vision_tower_forward.10
= control target key start
LH: loop header
LB: loop body
LE: loop exit
PB: predicated region body
PF: predicated region fallthrough
CT: control target
= control target key end

     0   :  { %s1897_s18 = smov 0   ;;  %s2548_s0 = inlined_call_operand.vmem [shape: bf16[672,32], index: 0, kind: input, shape index: {}]   ;;  %s2549_s1 = inlined_call_operand.vmem [shape: bf16[32,128], index: 1, kind: input, shape index: {}]   ;;  %s2550_s2 = inlined_call_operand.vmem [shape: f32[1,128], index: 2, kind: input, shape index: {}]   ;;  %s2551_s3 = inlined_call_operand.vmem [shape: f32[1,32], index: 3, kind: input, shape index: {}]   ;;  %s2552_s4 = inlined_call_operand.vmem [shape: f32[1,32], index: 4, kind: input, shape index: {}]   ;;  %s2553_s5 = inlined_call_operand.vmem [shape: bf16[672,128], index: 5, kind: output, shape index: {}]  }
   0x1 LB: > { %s1365_s19 = sadd.s32 4294967295, %s1865_s18   ;;  %p1369_p0 = scmp.ge.s32.totalorder %s1865_s18, 1  ;;  %s1865_s18 = sphi %s1897_s18, %s15_s18  }
   0x2   : > { %p188_p1 = scmp.lt.s32.totalorder %s1865_s18, 4 }
   0x4   : > { %p189_p2 = pnand %p1369_p0, %p188_p1 }
   0x5   : > { %s216_s20 = smul.u32 (!%p189_p2), 28, %s1365_s19  ;;  %vm285_vm0 = vcmask (!%p189_p2), 261120  }
   0x6   : > { %192 = sbr.rel (%p189_p2) target bundleno = 652 (0x28c), region = 40 }
   0x7   : > { %p217_p3 = scmp.lt.s32.totalorder (!%p189_p2), %s216_s20, 83 }
   0xd   : > { %s2555_s20 = smov (!%p217_p3, %s216_s20), 83 }
   0xe   : > { %s1370_s21 = sshll.u32 %s2555_s20, 2 }
   0xf   : > { %s1913_s24 = scalar_lea.vmem %s2548_s0, %s1370_s21  ;;  %s2454_s12 = scalar_lea.vmem %s2553_s5, %s1370_s21 }
  0x10   : > { %v1916_v0 = vld [vmem:[%s1913_s24] sm:$0xff]   ;;  %v1919_v1 = vld [vmem:[%s1913_s24 + $0x8] sm:$0xff]   ;;  %v1926_v6 = vld [vmem:[%s1913_s24 + $0x10] sm:$0xff]  }
  0x11   : > { %v1479_v2 = vunpack.c.l.bf16 %v1916_v0  ;;  %v1483_v3 = vunpack.c.l.bf16 %v1919_v1  ;;  %v1480_v4 = vunpack.c.h.bf16 %v1916_v0  ;;  %v1484_v5 = vunpack.c.h.bf16 %v1919_v1  ;;  %v1943_v13 = vld [vmem:[%s1913_s24 + $0x40] sm:$0xff]   ;;  %v1954_v18 = vld [vmem:[%s1913_s24 + $0x18] sm:$0xff]   ;;  %v1965_v23 = vld [vmem:[%s1913_s24 + $0x48] sm:$0xff]  }
  0x12   : > { %v1487_v11 = vunpack.c.l.bf16 %v1926_v6  ;;  %v1488_v12 = vunpack.c.h.bf16 %v1926_v6  ;;  %v1511_v16 = vunpack.c.l.bf16 %v1943_v13  ;;  %v1512_v17 = vunpack.c.h.bf16 %v1943_v13  ;;  %v1976_v28 = vld [vmem:[%s1913_s24 + $0x20] sm:$0xff]   ;;  %v1987_v33 = vld [vmem:[%s1913_s24 + $0x50] sm:$0xff]   ;;  %v1998_v38 = vld [vmem:[%s1913_s24 + $0x28] sm:$0xff]  }
  0x13   : > { %v286_v7 = vsel %vm285_vm0, %v1479_v2, 0.0  ;;  %v292_v8 = vsel %vm285_vm0, %v1483_v3, 0.0  ;;  %v289_v9 = vsel %vm285_vm0, %v1480_v4, 0.0  ;;  %v295_v10 = vsel %vm285_vm0, %v1484_v5, 0.0  ;;  %v2009_v43 = vld [vmem:[%s1913_s24 + $0x58] sm:$0xff]   ;;  %v2020_v48 = vld [vmem:[%s1913_s24 + $0x30] sm:$0xff]  }
  0x14   : > { %287 = vadd.xlane.f32.xlu0 %v286_v7  ;;  %293 = vadd.xlane.f32.xlu1 %v292_v8  ;;  %v298_v14 = vsel %vm285_vm0, %v1487_v11, 0.0  ;;  %v301_v15 = vsel %vm285_vm0, %v1488_v12, 0.0  ;;  %v334_v19 = vsel %vm285_vm0, %v1511_v16, 0.0  ;;  %v337_v20 = vsel %vm285_vm0, %v1512_v17, 0.0  ;;  %v2031_v53 = vld [vmem:[%s1913_s24 + $0x60] sm:$0xff]   ;;  %v2042_v58 = vld [vmem:[%s1913_s24 + $0x38] sm:$0xff]  }
  0x15   : > { %v1491_v21 = vunpack.c.l.bf16 %v1954_v18  ;;  %v1492_v22 = vunpack.c.h.bf16 %v1954_v18  ;;  %v1515_v26 = vunpack.c.l.bf16 %v1965_v23  ;;  %v1516_v27 = vunpack.c.h.bf16 %v1965_v23  ;;  %v2053_v63 = vld [vmem:[%s1913_s24 + $0x68] sm:$0xff]  }
  0x16   : > { %v1495_v31 = vunpack.c.l.bf16 %v1976_v28  ;;  %v1496_v32 = vunpack.c.h.bf16 %v1976_v28  ;;  %v1519_v36 = vunpack.c.l.bf16 %v1987_v33  ;;  %v1520_v37 = vunpack.c.h.bf16 %v1987_v33 }
  0x17   : > { %v304_v24 = vsel %vm285_vm0, %v1491_v21, 0.0  ;;  %v307_v25 = vsel %vm285_vm0, %v1492_v22, 0.0  ;;  %v340_v29 = vsel %vm285_vm0, %v1515_v26, 0.0  ;;  %v343_v30 = vsel %vm285_vm0, %v1516_v27, 0.0 }
  0x18   : > { %290 = vadd.xlane.f32.xlu0 %v289_v9  ;;  %296 = vadd.xlane.f32.xlu1 %v295_v10  ;;  %v310_v34 = vsel %vm285_vm0, %v1495_v31, 0.0  ;;  %v313_v35 = vsel %vm285_vm0, %v1496_v32, 0.0  ;;  %v346_v39 = vsel %vm285_vm0, %v1519_v36, 0.0  ;;  %v349_v40 = vsel %vm285_vm0, %v1520_v37, 0.0 }
  0x19   : > { %v1499_v41 = vunpack.c.l.bf16 %v1998_v38  ;;  %v1500_v42 = vunpack.c.h.bf16 %v1998_v38  ;;  %v1523_v46 = vunpack.c.l.bf16 %v2009_v43  ;;  %v1524_v47 = vunpack.c.h.bf16 %v2009_v43 }
  0x1a   : > { %v1503_v51 = vunpack.c.l.bf16 %v2020_v48  ;;  %v1504_v52 = vunpack.c.h.bf16 %v2020_v48  ;;  %v1527_v56 = vunpack.c.l.bf16 %v2031_v53  ;;  %v1528_v57 = vunpack.c.h.bf16 %v2031_v53 }
  0x1b   : > { %v316_v44 = vsel %vm285_vm0, %v1499_v41, 0.0  ;;  %v319_v45 = vsel %vm285_vm0, %v1500_v42, 0.0  ;;  %v352_v49 = vsel %vm285_vm0, %v1523_v46, 0.0  ;;  %v355_v50 = vsel %vm285_vm0, %v1524_v47, 0.0 }
  0x1c   : > { %299 = vadd.xlane.f32.xlu0 %v298_v14  ;;  %302 = vadd.xlane.f32.xlu1 %v301_v15  ;;  %v322_v54 = vsel %vm285_vm0, %v1503_v51, 0.0  ;;  %v325_v55 = vsel %vm285_vm0, %v1504_v52, 0.0  ;;  %v358_v59 = vsel %vm285_vm0, %v1527_v56, 0.0  ;;  %v361_v60 = vsel %vm285_vm0, %v1528_v57, 0.0 }
  0x1d   : > { %v1507_v61 = vunpack.c.l.bf16 %v2042_v58  ;;  %v1508_v62 = vunpack.c.h.bf16 %v2042_v58  ;;  %v1531_v9 = vunpack.c.l.bf16 %v2053_v63  ;;  %v1532_v10 = vunpack.c.h.bf16 %v2053_v63 }
  0x1f   : > { %v328_v7 = vsel %vm285_vm0, %v1507_v61, 0.0  ;;  %v331_v8 = vsel %vm285_vm0, %v1508_v62, 0.0  ;;  %v364_v14 = vsel %vm285_vm0, %v1531_v9, 0.0  ;;  %v367_v15 = vsel %vm285_vm0, %v1532_v10, 0.0 }
  0x20   : > { %335 = vadd.xlane.f32.xlu0 %v334_v19  ;;  %338 = vadd.xlane.f32.xlu1 %v337_v20 }
  0x24   : > { %305 = vadd.xlane.f32.xlu0 %v304_v24  ;;  %308 = vadd.xlane.f32.xlu1 %v307_v25 }
  0x28   : > { %341 = vadd.xlane.f32.xlu0 %v340_v29  ;;  %344 = vadd.xlane.f32.xlu1 %v343_v30 }
  0x2c   : > { %311 = vadd.xlane.f32.xlu0 %v310_v34  ;;  %314 = vadd.xlane.f32.xlu1 %v313_v35 }
  0x30   : > { %347 = vadd.xlane.f32.xlu0 %v346_v39  ;;  %350 = vadd.xlane.f32.xlu1 %v349_v40 }
  0x34   : > { %317 = vadd.xlane.f32.xlu0 %v316_v44  ;;  %320 = vadd.xlane.f32.xlu1 %v319_v45 }
  0x38   : > { %353 = vadd.xlane.f32.xlu0 %v352_v49  ;;  %356 = vadd.xlane.f32.xlu1 %v355_v50 }
  0x3c   : > { %323 = vadd.xlane.f32.xlu0 %v322_v54  ;;  %326 = vadd.xlane.f32.xlu1 %v325_v55 }
  0x40   : > { %359 = vadd.xlane.f32.xlu0 %v358_v59  ;;  %362 = vadd.xlane.f32.xlu1 %v361_v60 }
  0x44   : > { %329 = vadd.xlane.f32.xlu0 %v328_v7  ;;  %332 = vadd.xlane.f32.xlu1 %v331_v8 }
  0x48   : > { %365 = vadd.xlane.f32.xlu0 %v364_v14  ;;  %368 = vadd.xlane.f32.xlu1 %v367_v15 }
  0xa1   : > { %v288_v19 = vpop.xlane.xlu0 %287  ;;  %v294_v20 = vpop.xlane.xlu1 %293 }
  0xa2   : > { %v371_v24 = vmul.f32 0.03125, %v288_v19  ;;  %v373_v25 = vmul.f32 0.03125, %v294_v20 }
  0xa4   : > { %v2071_v29 = vsub.f32 %v1479_v2, %v371_v24  ;;  %v2075_v30 = vsub.f32 %v1483_v3, %v373_v25 }
  0xa5   : > { %v291_v34 = vpop.xlane.xlu0 %290  ;;  %v297_v35 = vpop.xlane.xlu1 %296 }
  0xa6   : > { %v372_v39 = vmul.f32 0.03125, %v291_v34  ;;  %v374_v40 = vmul.f32 0.03125, %v297_v35  ;;  %v427_v44 = vmul.f32 %v2071_v29, %v2071_v29  ;;  %v429_v45 = vmul.f32 %v2075_v30, %v2075_v30 }
  0xa8   : > { %v2083_v49 = vsub.f32 %v1480_v4, %v372_v39  ;;  %v2087_v2 = vsub.f32 %v1484_v5, %v374_v40  ;;  %v455_v3 = vsel %vm285_vm0, %v427_v44, 0.0  ;;  %v461_v55 = vsel %vm285_vm0, %v429_v45, 0.0 }
  0xa9   : > { %456 = vadd.xlane.f32.xlu0 %v455_v3  ;;  %v300_v50 = vpop.xlane.xlu0 %299  ;;  %v303_v54 = vpop.xlane.xlu1 %302 }
  0xaa   : > { %v375_v59 = vmul.f32 0.03125, %v300_v50  ;;  %v376_v60 = vmul.f32 0.03125, %v303_v54  ;;  %v428_v7 = vmul.f32 %v2083_v49, %v2083_v49  ;;  %v430_v0 = vmul.f32 %v2087_v2, %v2087_v2 }
  0xac   : > { %v2097_v1 = vsub.f32 %v1487_v11, %v375_v59  ;;  %v2101_v4 = vsub.f32 %v1488_v12, %v376_v60  ;;  %v458_v5 = vsel %vm285_vm0, %v428_v7, 0.0  ;;  %v464_v15 = vsel %vm285_vm0, %v430_v0, 0.0 }
  0xad   : > { %462 = vadd.xlane.f32.xlu0 %v461_v55  ;;  %459 = vadd.xlane.f32.xlu1 %v458_v5  ;;  %v336_v8 = vpop.xlane.xlu0 %335  ;;  %v339_v14 = vpop.xlane.xlu1 %338 }
  0xae   : > { %v387_v19 = vmul.f32 0.03125, %v336_v8  ;;  %v388_v20 = vmul.f32 0.03125, %v339_v14  ;;  %v431_v24 = vmul.f32 %v2097_v1, %v2097_v1  ;;  %v432_v11 = vmul.f32 %v2101_v4, %v2101_v4 }
  0xb0   : > { %v2111_v6 = vsub.f32 %v1511_v16, %v387_v19  ;;  %v2115_v12 = vsub.f32 %v1512_v17, %v388_v20  ;;  %v467_v25 = vsel %vm285_vm0, %v431_v24, 0.0  ;;  %v470_v39 = vsel %vm285_vm0, %v432_v11, 0.0 }
  0xb1   : > { %465 = vadd.xlane.f32.xlu1 %v464_v15  ;;  %468 = vadd.xlane.f32.xlu0 %v467_v25  ;;  %v306_v34 = vpop.xlane.xlu0 %305  ;;  %v309_v35 = vpop.xlane.xlu1 %308 }
  0xb2   : > { %v377_v40 = vmul.f32 0.03125, %v306_v34  ;;  %v378_v44 = vmul.f32 0.03125, %v309_v35  ;;  %v443_v45 = vmul.f32 %v2111_v6, %v2111_v6  ;;  %v444_v16 = vmul.f32 %v2115_v12, %v2115_v12 }
  0xb4   : > { %v2125_v13 = vsub.f32 %v1491_v21, %v377_v40  ;;  %v2129_v17 = vsub.f32 %v1492_v22, %v378_v44  ;;  %v503_v3 = vsel %vm285_vm0, %v443_v45, 0.0  ;;  %v506_v55 = vsel %vm285_vm0, %v444_v16, 0.0 }
  0xb5   : > { %471 = vadd.xlane.f32.xlu1 %v470_v39  ;;  %504 = vadd.xlane.f32.xlu0 %v503_v3  ;;  %v342_v50 = vpop.xlane.xlu0 %341  ;;  %v345_v54 = vpop.xlane.xlu1 %344 }
  0xb6   : > { %v389_v59 = vmul.f32 0.03125, %v342_v50  ;;  %v390_v60 = vmul.f32 0.03125, %v345_v54  ;;  %v433_v7 = vmul.f32 %v2125_v13, %v2125_v13  ;;  %v434_v21 = vmul.f32 %v2129_v17, %v2129_v17 }
  0xb8   : > { %v2139_v18 = vsub.f32 %v1515_v26, %v389_v59  ;;  %v2143_v22 = vsub.f32 %v1516_v27, %v390_v60  ;;  %v473_v0 = vsel %vm285_vm0, %v433_v7, 0.0  ;;  %v476_v14 = vsel %vm285_vm0, %v434_v21, 0.0 }
  0xb9   : > { %507 = vadd.xlane.f32.xlu1 %v506_v55  ;;  %474 = vadd.xlane.f32.xlu0 %v473_v0  ;;  %v312_v5 = vpop.xlane.xlu0 %311  ;;  %v315_v8 = vpop.xlane.xlu1 %314 }
  0xba   : > { %v379_v15 = vmul.f32 0.03125, %v312_v5  ;;  %v380_v19 = vmul.f32 0.03125, %v315_v8  ;;  %v445_v20 = vmul.f32 %v2139_v18, %v2139_v18  ;;  %v446_v26 = vmul.f32 %v2143_v22, %v2143_v22 }
  0xbc   : > { %v2153_v23 = vsub.f32 %v1495_v31, %v379_v15  ;;  %v2157_v27 = vsub.f32 %v1496_v32, %v380_v19  ;;  %v509_v24 = vsel %vm285_vm0, %v445_v20, 0.0  ;;  %v512_v34 = vsel %vm285_vm0, %v446_v26, 0.0 }
  0xbd   : > { %477 = vadd.xlane.f32.xlu1 %v476_v14  ;;  %510 = vadd.xlane.f32.xlu0 %v509_v24  ;;  %v348_v11 = vpop.xlane.xlu0 %347  ;;  %v351_v25 = vpop.xlane.xlu1 %350 }
  0xbe   : > { %v391_v35 = vmul.f32 0.03125, %v348_v11  ;;  %v392_v39 = vmul.f32 0.03125, %v351_v25  ;;  %v435_v40 = vmul.f32 %v2153_v23, %v2153_v23  ;;  %v436_v31 = vmul.f32 %v2157_v27, %v2157_v27 }
  0xc0   : > { %v2167_v28 = vsub.f32 %v1519_v36, %v391_v35  ;;  %v2171_v32 = vsub.f32 %v1520_v37, %v392_v39  ;;  %v479_v44 = vsel %vm285_vm0, %v435_v40, 0.0  ;;  %v482_v3 = vsel %vm285_vm0, %v436_v31, 0.0  ;;  %v1689_v40 = vld [vmem:[%s2549_s1] sm:$0xff]  }
  0xc1   : > { %513 = vadd.xlane.f32.xlu1 %v512_v34  ;;  %480 = vadd.xlane.f32.xlu0 %v479_v44  ;;  %v318_v45 = vpop.xlane.xlu0 %317  ;;  %v321_v16 = vpop.xlane.xlu1 %320 }
  0xc2   : > { %v381_v50 = vmul.f32 0.03125, %v318_v45  ;;  %v382_v54 = vmul.f32 0.03125, %v321_v16  ;;  %v447_v55 = vmul.f32 %v2167_v28, %v2167_v28  ;;  %v448_v36 = vmul.f32 %v2171_v32, %v2171_v32  ;;  %1645 = vmatprep.subr.bf16.mxu0 %v1689_v40  ;;  %1677 = vmatprep.subr.bf16.mxu1 %v1689_v40 }
  0xc3   : > { %1646 = vmatpush3.bf16.msra.mxu0 %v1689_v40  ;;  %1679 = vmatpush3.bf16.msra.mxu1 %v1689_v40 }
  0xc4   : > { %v2181_v33 = vsub.f32 %v1499_v41, %v381_v50  ;;  %v2185_v37 = vsub.f32 %v1500_v42, %v382_v54  ;;  %v515_v59 = vsel %vm285_vm0, %v447_v55, 0.0  ;;  %v518_v21 = vsel %vm285_vm0, %v448_v36, 0.0  ;;  %v1690_v55 = vld [vmem:[%s2549_s1 + $0x8] sm:$0xff]  }
  0xc5   : > { %483 = vadd.xlane.f32.xlu1 %v482_v3  ;;  %516 = vadd.xlane.f32.xlu0 %v515_v59  ;;  %v354_v60 = vpop.xlane.xlu0 %353  ;;  %v357_v7 = vpop.xlane.xlu1 %356 }
  0xc6   : > { %v393_v0 = vmul.f32 0.03125, %v354_v60  ;;  %v394_v5 = vmul.f32 0.03125, %v357_v7  ;;  %v437_v8 = vmul.f32 %v2181_v33, %v2181_v33  ;;  %v438_v41 = vmul.f32 %v2185_v37, %v2185_v37  ;;  %1647 = vmatprep.subr.bf16.mxu0 %v1690_v55  ;;  %1678 = vmatprep.subr.bf16.mxu1 %v1690_v55 }
  0xc7   : > { %1648 = vmatpush3.bf16.msra.mxu0 %v1690_v55  ;;  %1680 = vmatpush3.bf16.msra.mxu1 %v1690_v55 }
  0xc8   : > { %v2195_v38 = vsub.f32 %v1523_v46, %v393_v0  ;;  %v2199_v42 = vsub.f32 %v1524_v47, %v394_v5  ;;  %v485_v14 = vsel %vm285_vm0, %v437_v8, 0.0  ;;  %v488_v20 = vsel %vm285_vm0, %v438_v41, 0.0 }
  0xc9   : > { %519 = vadd.xlane.f32.xlu1 %v518_v21  ;;  %486 = vadd.xlane.f32.xlu0 %v485_v14  ;;  %v324_v15 = vpop.xlane.xlu0 %323  ;;  %v327_v19 = vpop.xlane.xlu1 %326 }
  0xca   : > { %v383_v26 = vmul.f32 0.03125, %v324_v15  ;;  %v384_v24 = vmul.f32 0.03125, %v327_v19  ;;  %v449_v11 = vmul.f32 %v2195_v38, %v2195_v38  ;;  %v450_v46 = vmul.f32 %v2199_v42, %v2199_v42 }
  0xcc   : > { %v2209_v43 = vsub.f32 %v1503_v51, %v383_v26  ;;  %v2213_v47 = vsub.f32 %v1504_v52, %v384_v24  ;;  %v521_v25 = vsel %vm285_vm0, %v449_v11, 0.0  ;;  %v524_v39 = vsel %vm285_vm0, %v450_v46, 0.0 }
  0xcd   : > { %489 = vadd.xlane.f32.xlu1 %v488_v20  ;;  %522 = vadd.xlane.f32.xlu0 %v521_v25  ;;  %v360_v34 = vpop.xlane.xlu0 %359  ;;  %v363_v35 = vpop.xlane.xlu1 %362 }
  0xce   : > { %v395_v31 = vmul.f32 0.03125, %v360_v34  ;;  %v396_v44 = vmul.f32 0.03125, %v363_v35  ;;  %v439_v51 = vmul.f32 %v2209_v43, %v2209_v43  ;;  %v440_v48 = vmul.f32 %v2213_v47, %v2213_v47 }
  0xd0   : > { %v2226_v52 = vsub.f32 %v1527_v56, %v395_v31  ;;  %v2230_v45 = vsub.f32 %v1528_v57, %v396_v44  ;;  %v491_v16 = vsel %vm285_vm0, %v439_v51, 0.0  ;;  %v494_v54 = vsel %vm285_vm0, %v440_v48, 0.0 }
  0xd1   : > { %525 = vadd.xlane.f32.xlu1 %v524_v39  ;;  %492 = vadd.xlane.f32.xlu0 %v491_v16  ;;  %v330_v3 = vpop.xlane.xlu0 %329  ;;  %v333_v50 = vpop.xlane.xlu1 %332 }
  0xd2   : > { %v385_v56 = vmul.f32 0.03125, %v330_v3  ;;  %v386_v36 = vmul.f32 0.03125, %v333_v50  ;;  %v451_v53 = vmul.f32 %v2226_v52, %v2226_v52  ;;  %v452_v57 = vmul.f32 %v2230_v45, %v2230_v45 }
  0xd4   : > { %v2243_v59 = vsub.f32 %v1507_v61, %v385_v56  ;;  %v2247_v60 = vsub.f32 %v1508_v62, %v386_v36  ;;  %v527_v7 = vsel %vm285_vm0, %v451_v53, 0.0  ;;  %v530_v5 = vsel %vm285_vm0, %v452_v57, 0.0 }
  0xd5   : > { %495 = vadd.xlane.f32.xlu1 %v494_v54  ;;  %528 = vadd.xlane.f32.xlu0 %v527_v7  ;;  %v366_v21 = vpop.xlane.xlu0 %365  ;;  %v369_v0 = vpop.xlane.xlu1 %368 }
  0xd6   : > { %v397_v8 = vmul.f32 0.03125, %v366_v21  ;;  %v398_v41 = vmul.f32 0.03125, %v369_v0  ;;  %v441_v61 = vmul.f32 %v2243_v59, %v2243_v59  ;;  %v442_v58 = vmul.f32 %v2247_v60, %v2247_v60 }
  0xd8   : > { %v2257_v62 = vsub.f32 %v1531_v9, %v397_v8  ;;  %v2261_v14 = vsub.f32 %v1532_v10, %v398_v41  ;;  %v497_v15 = vsel %vm285_vm0, %v441_v61, 0.0  ;;  %v500_v19 = vsel %vm285_vm0, %v442_v58, 0.0  ;;  %v2275_v41 = vld [vmem:[%s2551_s3] ss:$0 sm:$0xff] }
  0xd9   : > { %531 = vadd.xlane.f32.xlu1 %v530_v5  ;;  %498 = vadd.xlane.f32.xlu0 %v497_v15 }
  0xda   : > { %v453_v20 = vmul.f32 %v2257_v62, %v2257_v62  ;;  %v454_v26 = vmul.f32 %v2261_v14, %v2261_v14 }
  0xdc   : > { %v533_v24 = vsel %vm285_vm0, %v453_v20, 0.0  ;;  %v536_v63 = vsel %vm285_vm0, %v454_v26, 0.0 }
  0xdd   : > { %501 = vadd.xlane.f32.xlu1 %v500_v19  ;;  %534 = vadd.xlane.f32.xlu0 %v533_v24 }
  0xe1   : > { %537 = vadd.xlane.f32.xlu1 %v536_v63 }
 0x136   : > { %v457_v9 = vpop.xlane.xlu0 %456 }
 0x137   : > { %v539_v10 = vmul.f32 0.03125, %v457_v9 }
 0x139   : > { %v567_v11 = vadd.f32 1e-05, %v539_v10 }
 0x13a   : > { %v460_v46 = vpop.xlane.xlu1 %459  ;;  %v463_v25 = vpop.xlane.xlu0 %462 }
 0x13b   : > { %1691 = vrsqrt.f32 %v567_v11  ;;  %v540_v34 = vmul.f32 0.03125, %v460_v46  ;;  %v541_v35 = vmul.f32 0.03125, %v463_v25  ;;  %v2283_v11 = vld [vmem:[%s2552_s4] ss:$0 sm:$0xff] }
 0x13d   : > { %v568_v39 = vadd.f32 1e-05, %v540_v34  ;;  %v569_v40 = vadd.f32 1e-05, %v541_v35 }
 0x13e   : > { %v466_v31 = vpop.xlane.xlu1 %465  ;;  %v469_v44 = vpop.xlane.xlu0 %468 }
 0x13f   : > { %1693 = vrsqrt.f32 %v568_v39  ;;  %v542_v51 = vmul.f32 0.03125, %v466_v31  ;;  %v543_v48 = vmul.f32 0.03125, %v469_v44 }
 0x140   : > { %1695 = vrsqrt.f32 %v569_v40 }
 0x141   : > { %v570_v16 = vadd.f32 1e-05, %v542_v51  ;;  %v571_v3 = vadd.f32 1e-05, %v543_v48 }
 0x142   : > { %v472_v50 = vpop.xlane.xlu1 %471  ;;  %v505_v54 = vpop.xlane.xlu0 %504 }
 0x143   : > { %1697 = vrsqrt.f32 %v570_v16  ;;  %v544_v55 = vmul.f32 0.03125, %v472_v50  ;;  %v555_v56 = vmul.f32 0.03125, %v505_v54 }
 0x144   : > { %1699 = vrsqrt.f32 %v571_v3 }
 0x145   : > { %v1692_v36 = vpop.eup %1691  ;;  %v572_v53 = vadd.f32 1e-05, %v544_v55  ;;  %v583_v57 = vadd.f32 1e-05, %v555_v56 }
 0x146   : > { %v508_v7 = vpop.xlane.xlu1 %507  ;;  %v475_v21 = vpop.xlane.xlu0 %474  ;;  %v623_v0 = vmul.f32 %v1692_v36, %v2071_v29 }
 0x147   : > { %1701 = vrsqrt.f32 %v572_v53  ;;  %v556_v5 = vmul.f32 0.03125, %v508_v7  ;;  %v545_v8 = vmul.f32 0.03125, %v475_v21 }
 0x148   : > { %1703 = vrsqrt.f32 %v583_v57  ;;  %v658_v63 = vmul.f32 %v2275_v41, %v623_v0 }
 0x149   : > { %v1694_v61 = vpop.eup %1693  ;;  %v584_v58 = vadd.f32 1e-05, %v556_v5  ;;  %v573_v15 = vadd.f32 1e-05, %v545_v8 }
 0x14a   : > { %v1696_v19 = vpop.eup %1695  ;;  %v478_v20 = vpop.xlane.xlu1 %477  ;;  %v624_v24 = vmul.f32 %v1694_v61, %v2083_v49 }
 0x14b   : > { %v511_v26 = vpop.xlane.xlu0 %510  ;;  %v625_v29 = vmul.f32 %v1696_v19, %v2075_v30  ;;  %1705 = vrsqrt.f32 %v584_v58  ;;  %v546_v9 = vmul.f32 0.03125, %v478_v20  ;;  %v693_v30 = vadd.f32 %v2283_v11, %v658_v63 }
 0x14c   : > { %v557_v10 = vmul.f32 0.03125, %v511_v26  ;;  %1707 = vrsqrt.f32 %v573_v15  ;;  %v659_v46 = vmul.f32 %v2275_v41, %v624_v24 }
 0x14d   : > { %v1698_v25 = vpop.eup %1697  ;;  %v574_v34 = vadd.f32 1e-05, %v546_v9  ;;  %v660_v51 = vmul.f32 %v2275_v41, %v625_v29 }
 0x14e   : > { %v585_v35 = vadd.f32 1e-05, %v557_v10  ;;  %v1700_v39 = vpop.eup %1699  ;;  %v626_v49 = vmul.f32 %v1698_v25, %v2087_v2  ;;  %v514_v40 = vpop.xlane.xlu1 %513  ;;  %v694_v44 = vadd.f32 %v2283_v11, %v659_v46 }
 0x14f   : > { %v481_v31 = vpop.xlane.xlu0 %480  ;;  %v627_v48 = vmul.f32 %v1700_v39, %v2097_v1  ;;  %1709 = vrsqrt.f32 %v574_v34  ;;  %v558_v16 = vmul.f32 0.03125, %v514_v40  ;;  %v695_v21 = vadd.f32 %v2283_v11, %v660_v51 }
 0x150   : > { %v547_v3 = vmul.f32 0.03125, %v481_v31  ;;  %1711 = vrsqrt.f32 %v585_v35  ;;  %v721_v50 = vpack.c.bf16 %v694_v44, %v693_v30  ;;  %v661_v54 = vmul.f32 %v2275_v41, %v626_v49 }
 0x151   : > { %v1702_v55 = vpop.eup %1701  ;;  %v586_v56 = vadd.f32 1e-05, %v558_v16  ;;  %v662_v0 = vmul.f32 %v2275_v41, %v627_v48 }
 0x152   : > { %v575_v2 = vadd.f32 1e-05, %v547_v3  ;;  %v1704_v36 = vpop.eup %1703  ;;  %v628_v53 = vmul.f32 %v1702_v55, %v2101_v4  ;;  %v484_v57 = vpop.xlane.xlu1 %483  ;;  %1649 = vmatprep.mubr.msk.bf16.mxu0 %vm285_vm0, %v721_v50  ;;  %v696_v1 = vadd.f32 %v2283_v11, %v661_v54 }
 0x153   : > { %v517_v7 = vpop.xlane.xlu0 %516  ;;  %1713 = vrsqrt.f32 %v586_v56  ;;  %v548_v5 = vmul.f32 0.03125, %v484_v57  ;;  %v639_v15 = vmul.f32 %v1704_v36, %v2111_v6  ;;  %v697_v29 = vadd.f32 %v2283_v11, %v662_v0 }
 0x154   : > { %v559_v8 = vmul.f32 0.03125, %v517_v7  ;;  %1715 = vrsqrt.f32 %v575_v2  ;;  %v722_v61 = vpack.c.bf16 %v696_v1, %v695_v21  ;;  %v663_v58 = vmul.f32 %v2275_v41, %v628_v53 }
 0x155   : > { %v1706_v4 = vpop.eup %1705  ;;  %v576_v19 = vadd.f32 1e-05, %v548_v5  ;;  %v674_v46 = vmul.f32 %v2275_v41, %v639_v15 }
 0x156   : > { %v587_v20 = vadd.f32 1e-05, %v559_v8  ;;  %v1708_v26 = vpop.eup %1707  ;;  %v520_v24 = vpop.xlane.xlu1 %519  ;;  %1650 = vmatmul.mubr.msk.bf16.vlgmr.msra.gmra.mrb[0].mxu0 %vm285_vm0, %v722_v61  ;;  %v698_v9 = vadd.f32 %v2283_v11, %v663_v58  ;;  %v640_v10 = vmul.f32 %v1706_v4, %v2115_v12 }
 0x157   : > { %v487_v63 = vpop.xlane.xlu0 %486  ;;  %v629_v25 = vmul.f32 %v1708_v26, %v2125_v13  ;;  %1717 = vrsqrt.f32 %v576_v19  ;;  %v560_v6 = vmul.f32 0.03125, %v520_v24  ;;  %v709_v48 = vadd.f32 %v2283_v11, %v674_v46 }
 0x158   : > { %v549_v34 = vmul.f32 0.03125, %v487_v63  ;;  %1719 = vrsqrt.f32 %v587_v20  ;;  %v723_v35 = vpack.c.bf16 %v698_v9, %v697_v29  ;;  %v675_v39 = vmul.f32 %v2275_v41, %v640_v10 }
 0x159   : > { %v1710_v49 = vpop.eup %1709  ;;  %v588_v40 = vadd.f32 1e-05, %v560_v6  ;;  %v664_v16 = vmul.f32 %v2275_v41, %v629_v25 }
 0x15a   : > { %v577_v31 = vadd.f32 1e-05, %v549_v34  ;;  %v1712_v30 = vpop.eup %1711  ;;  %v630_v44 = vmul.f32 %v1710_v49, %v2129_v17  ;;  %v490_v51 = vpop.xlane.xlu1 %489  ;;  %1653 = vmatprep.mubr.msk.bf16.mxu0 %vm285_vm0, %v723_v35  ;;  %v710_v13 = vadd.f32 %v2283_v11, %v675_v39 }
 0x15b   : > { %v523_v12 = vpop.xlane.xlu0 %522  ;;  %v641_v3 = vmul.f32 %v1712_v30, %v2139_v18  ;;  %1721 = vrsqrt.f32 %v588_v40  ;;  %v550_v50 = vmul.f32 0.03125, %v490_v51  ;;  %v699_v1 = vadd.f32 %v2283_v11, %v664_v16 }
 0x15c   : > { %v561_v54 = vmul.f32 0.03125, %v523_v12  ;;  %1723 = vrsqrt.f32 %v577_v31  ;;  %v729_v55 = vpack.c.bf16 %v710_v13, %v709_v48  ;;  %v665_v56 = vmul.f32 %v2275_v41, %v630_v44 }
 0x15d   : > { %v1714_v17 = vpop.eup %1713  ;;  %v578_v2 = vadd.f32 1e-05, %v550_v50  ;;  %v676_v0 = vmul.f32 %v2275_v41, %v641_v3 }
 0x15e   : > { %v589_v36 = vadd.f32 1e-05, %v561_v54  ;;  %v1716_v53 = vpop.eup %1715  ;;  %v642_v57 = vmul.f32 %v1714_v17, %v2143_v22  ;;  %v526_v7 = vpop.xlane.xlu1 %525  ;;  %1665 = vmatprep.mubr.msk.bf16.mxu1 %vm285_vm0, %v729_v55  ;;  %v700_v18 = vadd.f32 %v2283_v11, %v665_v56 }
 0x15f   : > { %v493_v21 = vpop.xlane.xlu0 %492  ;;  %v631_v5 = vmul.f32 %v1716_v53, %v2153_v23  ;;  %1725 = vrsqrt.f32 %v578_v2  ;;  %v562_v8 = vmul.f32 0.03125, %v526_v7  ;;  %v711_v29 = vadd.f32 %v2283_v11, %v676_v0 }
 0x160   : > { %v551_v61 = vmul.f32 0.03125, %v493_v21  ;;  %1727 = vrsqrt.f32 %v589_v36  ;;  %v724_v58 = vpack.c.bf16 %v700_v18, %v699_v1  ;;  %v677_v15 = vmul.f32 %v2275_v41, %v642_v57 }
 0x161   : > { %v1718_v22 = vpop.eup %1717  ;;  %v590_v4 = vadd.f32 1e-05, %v562_v8  ;;  %v666_v9 = vmul.f32 %v2275_v41, %v631_v5 }
 0x162   : > { %v579_v19 = vadd.f32 1e-05, %v551_v61  ;;  %v1720_v20 = vpop.eup %1719  ;;  %v632_v26 = vmul.f32 %v1718_v22, %v2157_v27  ;;  %v496_v24 = vpop.xlane.xlu1 %495  ;;  %1654 = vmatmul.mubr.msk.bf16.gmra.mrb[4].mxu0 %vm285_vm0, %v724_v58  ;;  %v712_v23 = vadd.f32 %v2283_v11, %v677_v15 }
 0x163   : > { %v529_v63 = vpop.xlane.xlu0 %528  ;;  %v643_v10 = vmul.f32 %v1720_v20, %v2167_v28  ;;  %1729 = vrsqrt.f32 %v590_v4  ;;  %v552_v46 = vmul.f32 0.03125, %v496_v24  ;;  %v701_v44 = vadd.f32 %v2283_v11, %v666_v9 }
 0x164   : > { %v563_v25 = vmul.f32 0.03125, %v529_v63  ;;  %1731 = vrsqrt.f32 %v579_v19  ;;  %v730_v6 = vpack.c.bf16 %v712_v23, %v711_v29  ;;  %v667_v34 = vmul.f32 %v2275_v41, %v632_v26 }
 0x165   : > { %v1722_v27 = vpop.eup %1721  ;;  %v580_v35 = vadd.f32 1e-05, %v552_v46  ;;  %v678_v51 = vmul.f32 %v2275_v41, %v643_v10 }
 0x166   : > { %v591_v39 = vadd.f32 1e-05, %v563_v25  ;;  %v1724_v49 = vpop.eup %1723  ;;  %v644_v40 = vmul.f32 %v1722_v27, %v2171_v32  ;;  %v532_v31 = vpop.xlane.xlu1 %531  ;;  %1666 = vmatmul.mubr.msk.bf16.vlgmr.msra.gmra.mrb[0].mxu1 %vm285_vm0, %v730_v6  ;;  %v702_v28 = vadd.f32 %v2283_v11, %v667_v34 }
 0x167   : > { %v499_v30 = vpop.xlane.xlu0 %498  ;;  %v633_v12 = vmul.f32 %v1724_v49, %v2181_v33  ;;  %1733 = vrsqrt.f32 %v580_v35  ;;  %v564_v48 = vmul.f32 0.03125, %v532_v31  ;;  %v713_v36 = vadd.f32 %v2283_v11, %v678_v51 }
 0x168   : > { %v553_v13 = vmul.f32 0.03125, %v499_v30  ;;  %1735 = vrsqrt.f32 %v591_v39  ;;  %v725_v16 = vpack.c.bf16 %v702_v28, %v701_v44  ;;  %v679_v3 = vmul.f32 %v2275_v41, %v644_v40 }
 0x169   : > { %v1726_v32 = vpop.eup %1725  ;;  %v592_v50 = vadd.f32 1e-05, %v564_v48  ;;  %v668_v53 = vmul.f32 %v2275_v41, %v633_v12 }
 0x16a   : > { %v581_v54 = vadd.f32 1e-05, %v553_v13  ;;  %v1728_v55 = vpop.eup %1727  ;;  %v634_v56 = vmul.f32 %v1726_v32, %v2185_v37  ;;  %v502_v17 = vpop.xlane.xlu1 %501  ;;  %1657 = vmatprep.mubr.msk.bf16.mxu0 %vm285_vm0, %v725_v16  ;;  %v714_v33 = vadd.f32 %v2283_v11, %v679_v3 }
 0x16b   : > { %v535_v2 = vpop.xlane.xlu0 %534  ;;  %v645_v57 = vmul.f32 %v1728_v55, %v2195_v38  ;;  %1737 = vrsqrt.f32 %v592_v50  ;;  %v554_v7 = vmul.f32 0.03125, %v502_v17  ;;  %v703_v15 = vadd.f32 %v2283_v11, %v668_v53 }
 0x16c   : > { %v565_v21 = vmul.f32 0.03125, %v535_v2  ;;  %1739 = vrsqrt.f32 %v581_v54  ;;  %v731_v1 = vpack.c.bf16 %v714_v33, %v713_v36  ;;  %v669_v18 = vmul.f32 %v2275_v41, %v634_v56 }
 0x16d   : > { %v1730_v37 = vpop.eup %1729  ;;  %v582_v0 = vadd.f32 1e-05, %v554_v7  ;;  %v680_v22 = vmul.f32 %v2275_v41, %v645_v57 }
 0x16e   : > { %v593_v5 = vadd.f32 1e-05, %v565_v21  ;;  %v1732_v8 = vpop.eup %1731  ;;  %v646_v61 = vmul.f32 %v1730_v37, %v2199_v42  ;;  %v538_v58 = vpop.xlane.xlu1 %537  ;;  %1669 = vmatprep.mubr.msk.bf16.mxu1 %vm285_vm0, %v731_v1  ;;  %v704_v38 = vadd.f32 %v2283_v11, %v669_v18 }
 0x16f   : > { %v635_v4 = vmul.f32 %v1732_v8, %v2209_v43  ;;  %1741 = vrsqrt.f32 %v582_v0  ;;  %v566_v19 = vmul.f32 0.03125, %v538_v58  ;;  %v715_v23 = vadd.f32 %v2283_v11, %v680_v22 }
 0x170   : > { %1743 = vrsqrt.f32 %v593_v5  ;;  %v726_v20 = vpack.c.bf16 %v704_v38, %v703_v15  ;;  %v681_v26 = vmul.f32 %v2275_v41, %v646_v61 }
 0x171   : > { %v1734_v24 = vpop.eup %1733  ;;  %v594_v63 = vadd.f32 1e-05, %v566_v19  ;;  %v670_v10 = vmul.f32 %v2275_v41, %v635_v4 }
 0x172   : > { %v1736_v42 = vpop.eup %1735  ;;  %v636_v29 = vmul.f32 %v1734_v24, %v2213_v47  ;;  %1658 = vmatmul.mubr.msk.bf16.gmra.mrb[8].mxu0 %vm285_vm0, %v726_v20  ;;  %v716_v9 = vadd.f32 %v2283_v11, %v681_v26 }
 0x173   : > { %v647_v43 = vmul.f32 %v1736_v42, %v2226_v52  ;;  %1745 = vrsqrt.f32 %v594_v63  ;;  %v705_v47 = vadd.f32 %v2283_v11, %v670_v10 }
 0x174   : > { %v732_v46 = vpack.c.bf16 %v716_v9, %v715_v23  ;;  %v671_v25 = vmul.f32 %v2275_v41, %v636_v29 }
 0x175   : > { %v1738_v6 = vpop.eup %1737  ;;  %v682_v39 = vmul.f32 %v2275_v41, %v647_v43 }
 0x176   : > { %v1740_v34 = vpop.eup %1739  ;;  %v648_v27 = vmul.f32 %v1738_v6, %v2230_v45  ;;  %1670 = vmatmul.mubr.msk.bf16.gmra.mrb[4].mxu1 %vm285_vm0, %v732_v46  ;;  %v706_v35 = vadd.f32 %v2283_v11, %v671_v25 }
 0x177   : > { %v637_v49 = vmul.f32 %v1740_v34, %v2243_v59  ;;  %v717_v45 = vadd.f32 %v2283_v11, %v682_v39 }
 0x178   : > { %v727_v40 = vpack.c.bf16 %v706_v35, %v705_v47  ;;  %v683_v52 = vmul.f32 %v2275_v41, %v648_v27 }
 0x179   : > { %v1742_v31 = vpop.eup %1741  ;;  %v672_v51 = vmul.f32 %v2275_v41, %v637_v49 }
 0x17a   : > { %v1744_v30 = vpop.eup %1743  ;;  %v638_v44 = vmul.f32 %v1742_v31, %v2247_v60  ;;  %1661 = vmatprep.mubr.msk.bf16.mxu0 %vm285_vm0, %v727_v40  ;;  %v718_v28 = vadd.f32 %v2283_v11, %v683_v52 }
 0x17b   : > { %v649_v12 = vmul.f32 %v1744_v30, %v2257_v62  ;;  %v707_v60 = vadd.f32 %v2283_v11, %v672_v51 }
 0x17c   : > { %v733_v48 = vpack.c.bf16 %v718_v28, %v717_v45  ;;  %v673_v59 = vmul.f32 %v2275_v41, %v638_v44 }
 0x17d   : > { %v1746_v13 = vpop.eup %1745  ;;  %v684_v32 = vmul.f32 %v2275_v41, %v649_v12 }
 0x17e   : > { %v650_v16 = vmul.f32 %v1746_v13, %v2261_v14  ;;  %1673 = vmatprep.mubr.msk.bf16.mxu1 %vm285_vm0, %v733_v48  ;;  %v708_v3 = vadd.f32 %v2283_v11, %v673_v59  ;;  %v2382_v14 = vld [vmem:[%s2550_s2] ss:$0 sm:$0xff] }
 0x17f   : > { %v719_v62 = vadd.f32 %v2283_v11, %v684_v32 }
 0x180   : > { %v728_v50 = vpack.c.bf16 %v708_v3, %v707_v60  ;;  %v685_v54 = vmul.f32 %v2275_v41, %v650_v16 }
 0x182   : > { %1662 = vmatmul.mubr.msk.bf16.gmra.mrb[12].mxu0 %vm285_vm0, %v728_v50  ;;  %v720_v55 = vadd.f32 %v2283_v11, %v685_v54 }
 0x184   : > { %v734_v56 = vpack.c.bf16 %v720_v55, %v719_v62 }
 0x186   : > { %1674 = vmatmul.mubr.msk.bf16.gmra.mrb[8].mxu1 %vm285_vm0, %v734_v56 }
 0x229   : > { %v1651_v17 = vpop.f32.mrb[0].mxu0 }
 0x22a   : > { %v2385_v2 = vadd.f32 %v1651_v17, %v2382_v14  ;;  %v834_v36 = vpop.f32.mrb[1].mxu0 }
 0x22b   : > { %v2388_v41 = vadd.f32 %v2382_v14, %v834_v36  ;;  %v1652_v33 = vpop.f32.mrb[2].mxu0 }
 0x22c   : > { %v1393_v53 = vmul.f32 -1.702, %v2385_v2  ;;  %v2392_v11 = vadd.f32 %v1652_v33, %v2382_v14  ;;  %v837_v57 = vpop.f32.mrb[3].mxu0 }
 0x22d   : > { %v1391_v7 = vmul.f32 -1.702, %v2388_v41  ;;  %v2396_v21 = vadd.f32 %v2382_v14, %v837_v57 }
 0x22e   : > { %v1005_v1 = vmul.f32 1.442695, %v1393_v53  ;;  %v1394_v18 = vmul.f32 -1.702, %v2392_v11 }
 0x22f   : > { %v1001_v37 = vmul.f32 1.442695, %v1391_v7  ;;  %v1392_v0 = vmul.f32 -1.702, %v2396_v21 }
 0x230   : > { %1747 = vpow2.f32 %v1005_v1  ;;  %v1007_v5 = vmul.f32 1.442695, %v1394_v18 }
 0x231   : > { %1749 = vpow2.f32 %v1001_v37  ;;  %v1003_v8 = vmul.f32 1.442695, %v1392_v0 }
 0x232   : > { %1751 = vpow2.f32 %v1007_v5 }
 0x233   : > { %1753 = vpow2.f32 %v1003_v8 }
 0x235   : > { %v1655_v61 = vpop.f32.mrb[4].mxu0 }
 0x236   : > { %v2401_v58 = vadd.f32 %v1655_v61, %v2382_v14  ;;  %v850_v15 = vpop.f32.mrb[5].mxu0 }
 0x237   : > { %v2404_v38 = vadd.f32 %v2382_v14, %v850_v15  ;;  %v1656_v22 = vpop.f32.mrb[6].mxu0 }
 0x238   : > { %v1397_v4 = vmul.f32 -1.702, %v2401_v58  ;;  %v2408_v19 = vadd.f32 %v1656_v22, %v2382_v14  ;;  %v853_v20 = vpop.f32.mrb[7].mxu0 }
 0x239   : > { %v1395_v26 = vmul.f32 -1.702, %v2404_v38  ;;  %v2412_v24 = vadd.f32 %v2382_v14, %v853_v20  ;;  %v1667_v63 = vpop.f32.mrb[0].mxu1 }
 0x23a   : > { %v1748_v42 = vpop.eup %1747  ;;  %v1013_v29 = vmul.f32 1.442695, %v1397_v4  ;;  %v1398_v23 = vmul.f32 -1.702, %v2408_v19  ;;  %v2416_v9 = vadd.f32 %v1667_v63, %v2382_v14  ;;  %v898_v10 = vpop.f32.mrb[1].mxu1 }
 0x23b   : > { %v1750_v43 = vpop.eup %1749  ;;  %v1059_v46 = vadd.f32 1.0, %v1748_v42  ;;  %v1396_v25 = vmul.f32 -1.702, %v2412_v24  ;;  %v2420_v6 = vadd.f32 %v2382_v14, %v898_v10  ;;  %v1668_v34 = vpop.f32.mrb[2].mxu1  ;;  %v1009_v52 = vmul.f32 1.442695, %v1395_v26 }
 0x23c   : > { %v1752_v27 = vpop.eup %1751  ;;  %v1057_v47 = vadd.f32 1.0, %v1750_v43  ;;  %1755 = vpow2.f32 %v1013_v29  ;;  %v1409_v35 = vmul.f32 -1.702, %v2416_v9  ;;  %v901_v39 = vpop.f32.mrb[3].mxu1  ;;  %v1015_v44 = vmul.f32 1.442695, %v1398_v23 }
 0x23d   : > { %v1754_v49 = vpop.eup %1753  ;;  %1757 = vrcp.f32 %v1059_v46  ;;  %v1060_v40 = vadd.f32 1.0, %v1752_v27  ;;  %v1407_v31 = vmul.f32 -1.702, %v2420_v6  ;;  %v2425_v45 = vadd.f32 %v1668_v34, %v2382_v14 }
 0x23e   : > { %1759 = vrcp.f32 %v1057_v47  ;;  %v1058_v30 = vadd.f32 1.0, %v1754_v49  ;;  %v1011_v28 = vmul.f32 1.442695, %v1396_v25  ;;  %v2428_v51 = vadd.f32 %v2382_v14, %v901_v39 }
 0x23f   : > { %1761 = vrcp.f32 %v1060_v40  ;;  %v1037_v12 = vmul.f32 1.442695, %v1409_v35  ;;  %v1410_v48 = vmul.f32 -1.702, %v2425_v45  ;;  %v1033_v59 = vmul.f32 1.442695, %v1407_v31 }
 0x240   : > { %1763 = vrcp.f32 %v1058_v30  ;;  %v1408_v13 = vmul.f32 -1.702, %v2428_v51 }
 0x241   : > { %1765 = vpow2.f32 %v1009_v52  ;;  %v1039_v16 = vmul.f32 1.442695, %v1410_v48 }
 0x242   : > { %1767 = vpow2.f32 %v1015_v44  ;;  %v1035_v60 = vmul.f32 1.442695, %v1408_v13 }
 0x243   : > { %1769 = vpow2.f32 %v1011_v28 }
 0x244   : > { %1771 = vpow2.f32 %v1037_v12 }
 0x245   : > { %1773 = vpow2.f32 %v1033_v59  ;;  %v1659_v3 = vpop.f32.mrb[8].mxu0 }
 0x246   : > { %v1756_v32 = vpop.eup %1755  ;;  %1775 = vpow2.f32 %v1039_v16  ;;  %v2433_v50 = vadd.f32 %v1659_v3, %v2382_v14  ;;  %v866_v54 = vpop.f32.mrb[9].mxu0 }
 0x247   : > { %v1758_v62 = vpop.eup %1757  ;;  %v1063_v55 = vadd.f32 1.0, %v1756_v32  ;;  %1777 = vpow2.f32 %v1035_v60  ;;  %v2436_v56 = vadd.f32 %v2382_v14, %v866_v54  ;;  %v1660_v17 = vpop.f32.mrb[10].mxu0 }
 0x248   : > { %v1760_v36 = vpop.eup %1759  ;;  %v1401_v33 = vmul.f32 -1.702, %v2433_v50  ;;  %v869_v53 = vpop.f32.mrb[11].mxu0  ;;  %v1143_v7 = vmul.f32 %v1758_v62, %v2385_v2  ;;  %v2442_v18 = vadd.f32 %v1660_v17, %v2382_v14 }
 0x249   : > { %v1762_v57 = vpop.eup %1761  ;;  %v1399_v1 = vmul.f32 -1.702, %v2436_v56  ;;  %v1671_v37 = vpop.f32.mrb[4].mxu1  ;;  %v1141_v5 = vmul.f32 %v1760_v36, %v2388_v41  ;;  %v2447_v15 = vadd.f32 %v2382_v14, %v869_v53  ;;  %1779 = vrcp.f32 %v1063_v55 }
 0x24a   : > { %v1764_v0 = vpop.eup %1763  ;;  %v1144_v8 = vmul.f32 %v1762_v57, %v2392_v11  ;;  %v1021_v61 = vmul.f32 1.442695, %v1401_v33  ;;  %v914_v22 = vpop.f32.mrb[5].mxu1  ;;  %v2458_v41 = vadd.f32 %v1671_v37, %v2382_v14 }
 0x24b   : > { %v1766_v4 = vpop.eup %1765  ;;  %v1142_v2 = vmul.f32 %v1764_v0, %v2396_v21  ;;  %v1017_v20 = vmul.f32 1.442695, %v1399_v1  ;;  %v1672_v11 = vpop.f32.mrb[6].mxu1  ;;  %v2461_v29 = vadd.f32 %v2382_v14, %v914_v22  ;;  %v1402_v21 = vmul.f32 -1.702, %v2442_v18 }
 0x24c   : > { %v1768_v26 = vpop.eup %1767  ;;  %v1541_v63 = vpack.c.bf16 %v1144_v8, %v1143_v7  ;;  %v1061_v42 = vadd.f32 1.0, %v1766_v4  ;;  %1781 = vpow2.f32 %v1021_v61  ;;  %v917_v23 = vpop.f32.mrb[7].mxu1  ;;  %v1400_v27 = vmul.f32 -1.702, %v2447_v15 }
 0x24d   : > { %v1770_v10 = vpop.eup %1769  ;;  %v1536_v43 = vpack.c.bf16 %v1142_v2, %v1141_v5  ;;  %v1064_v46 = vadd.f32 1.0, %v1768_v26  ;;  %1783 = vpow2.f32 %v1017_v20  ;;  %v1413_v39 = vmul.f32 -1.702, %v2458_v41 }
 0x24e   : > { %v1772_v25 = vpop.eup %1771  ;;  %1616 = vst [vmem:[%s2454_s12 + $0x8] sm:$0xff] %v1541_v63   ;;  %1785 = vrcp.f32 %v1061_v42  ;;  %v1062_v34 = vadd.f32 1.0, %v1770_v10  ;;  %v2469_v49 = vadd.f32 %v1672_v11, %v2382_v14  ;;  %v1411_v31 = vmul.f32 -1.702, %v2461_v29 }
 0x24f   : > { %v1774_v47 = vpop.eup %1773  ;;  %1537 = vst [vmem:[%s2454_s12] sm:$0xff] %v1536_v43   ;;  %1787 = vrcp.f32 %v1064_v46  ;;  %v1075_v35 = vadd.f32 1.0, %v1772_v25  ;;  %v2473_v30 = vadd.f32 %v2382_v14, %v917_v23  ;;  %v1023_v12 = vmul.f32 1.442695, %v1402_v21 }
 0x250   : > { %v1776_v40 = vpop.eup %1775  ;;  %1789 = vrcp.f32 %v1062_v34  ;;  %v1073_v52 = vadd.f32 1.0, %v1774_v47  ;;  %v1019_v59 = vmul.f32 1.442695, %v1400_v27  ;;  %v1045_v13 = vmul.f32 1.442695, %v1413_v39 }
 0x251   : > { %v1778_v44 = vpop.eup %1777  ;;  %1791 = vrcp.f32 %v1075_v35  ;;  %v1076_v28 = vadd.f32 1.0, %v1776_v40  ;;  %v1414_v16 = vmul.f32 -1.702, %v2469_v49  ;;  %v1041_v60 = vmul.f32 1.442695, %v1411_v31 }
 0x252   : > { %1793 = vrcp.f32 %v1073_v52  ;;  %v1074_v48 = vadd.f32 1.0, %v1778_v44  ;;  %v1412_v3 = vmul.f32 -1.702, %v2473_v30 }
 0x253   : > { %1795 = vrcp.f32 %v1076_v28  ;;  %v1780_v32 = vpop.eup %1779  ;;  %v1047_v53 = vmul.f32 1.442695, %v1414_v16 }
 0x254   : > { %1797 = vrcp.f32 %v1074_v48  ;;  %v1043_v37 = vmul.f32 1.442695, %v1412_v3  ;;  %v1147_v22 = vmul.f32 %v1780_v32, %v2401_v58 }
 0x255   : > { %1799 = vpow2.f32 %v1023_v12  ;;  %v1663_v54 = vpop.f32.mrb[12].mxu0 }
 0x256   : > { %v1782_v62 = vpop.eup %1781  ;;  %1801 = vpow2.f32 %v1019_v59  ;;  %v2478_v55 = vadd.f32 %v1663_v54, %v2382_v14  ;;  %v882_v17 = vpop.f32.mrb[13].mxu0 }
 0x257   : > { %v1784_v36 = vpop.eup %1783  ;;  %v1067_v33 = vadd.f32 1.0, %v1782_v62  ;;  %1803 = vpow2.f32 %v1045_v13  ;;  %v2481_v57 = vadd.f32 %v2382_v14, %v882_v17  ;;  %v1664_v7 = vpop.f32.mrb[14].mxu0 }
 0x258   : > { %v1786_v1 = vpop.eup %1785  ;;  %1805 = vpow2.f32 %v1041_v60  ;;  %v1405_v0 = vmul.f32 -1.702, %v2478_v55  ;;  %v2485_v5 = vadd.f32 %v1664_v7, %v2382_v14  ;;  %v885_v8 = vpop.f32.mrb[15].mxu0  ;;  %v1065_v27 = vadd.f32 1.0, %v1784_v36 }
 0x259   : > { %v1788_v61 = vpop.eup %1787  ;;  %v1145_v4 = vmul.f32 %v1786_v1, %v2404_v38  ;;  %v1403_v2 = vmul.f32 -1.702, %v2481_v57  ;;  %v2491_v20 = vadd.f32 %v2382_v14, %v885_v8  ;;  %v1675_v11 = vpop.f32.mrb[8].mxu1  ;;  %1807 = vrcp.f32 %v1067_v33 }
 0x25a   : > { %v1790_v26 = vpop.eup %1789  ;;  %v1148_v63 = vmul.f32 %v1788_v61, %v2408_v19  ;;  %v1029_v42 = vmul.f32 1.442695, %v1405_v0  ;;  %v1406_v23 = vmul.f32 -1.702, %v2485_v5  ;;  %v930_v10 = vpop.f32.mrb[9].mxu1  ;;  %1809 = vpow2.f32 %v1047_v53 }
 0x25b   : > { %v1792_v43 = vpop.eup %1791  ;;  %v1146_v46 = vmul.f32 %v1790_v26, %v2412_v24  ;;  %v1025_v58 = vmul.f32 1.442695, %v1403_v2  ;;  %v1404_v38 = vmul.f32 -1.702, %v2491_v20  ;;  %v1676_v21 = vpop.f32.mrb[10].mxu1  ;;  %1811 = vpow2.f32 %v1043_v37 }
 0x25c   : > { %v1794_v25 = vpop.eup %1793  ;;  %v1551_v34 = vpack.c.bf16 %v1148_v63, %v1147_v22  ;;  %v1031_v19 = vmul.f32 1.442695, %v1406_v23  ;;  %v933_v47 = vpop.f32.mrb[11].mxu1  ;;  %v1159_v40 = vmul.f32 %v1792_v43, %v2416_v9  ;;  %1813 = vpow2.f32 %v1029_v42 }
 0x25d   : > { %v1796_v35 = vpop.eup %1795  ;;  %v1546_v39 = vpack.c.bf16 %v1146_v46, %v1145_v4  ;;  %v1027_v52 = vmul.f32 1.442695, %v1404_v38  ;;  %1815 = vpow2.f32 %v1025_v58  ;;  %v2501_v44 = vadd.f32 %v1675_v11, %v2382_v14 }
 0x25e   : > { %v1798_v24 = vpop.eup %1797  ;;  %1618 = vst [vmem:[%s2454_s12 + $0x18] sm:$0xff] %v1551_v34   ;;  %v1160_v31 = vmul.f32 %v1796_v35, %v2425_v45  ;;  %v2504_v28 = vadd.f32 %v2382_v14, %v930_v10  ;;  %v1157_v48 = vmul.f32 %v1794_v25, %v2420_v6  ;;  %1817 = vpow2.f32 %v1031_v19 }
 0x25f   : > { %v1800_v12 = vpop.eup %1799  ;;  %1617 = vst [vmem:[%s2454_s12 + $0x10] sm:$0xff] %v1546_v39   ;;  %v1158_v9 = vmul.f32 %v1798_v24, %v2428_v51  ;;  %1819 = vpow2.f32 %v1027_v52  ;;  %v1417_v45 = vmul.f32 -1.702, %v2501_v44  ;;  %v2513_v51 = vadd.f32 %v1676_v21, %v2382_v14 }
 0x260   : > { %v1802_v59 = vpop.eup %1801  ;;  %v1581_v13 = vpack.c.bf16 %v1160_v31, %v1159_v40  ;;  %v1068_v16 = vadd.f32 1.0, %v1800_v12  ;;  %1821 = vrcp.f32 %v1065_v27  ;;  %v1415_v54 = vmul.f32 -1.702, %v2504_v28 }
 0x261   : > { %v1804_v60 = vpop.eup %1803  ;;  %v1576_v3 = vpack.c.bf16 %v1158_v9, %v1157_v48  ;;  %v1066_v32 = vadd.f32 1.0, %v1802_v59  ;;  %v1053_v17 = vmul.f32 1.442695, %v1417_v45  ;;  %v2517_v53 = vadd.f32 %v2382_v14, %v933_v47 }
 0x262   : > { %v1806_v62 = vpop.eup %1805  ;;  %1624 = vst [vmem:[%s2454_s12 + $0x48] sm:$0xff] %v1581_v13   ;;  %1823 = vrcp.f32 %v1068_v16  ;;  %v1079_v6 = vadd.f32 1.0, %v1804_v60  ;;  %v1049_v33 = vmul.f32 1.442695, %v1415_v54  ;;  %v1418_v8 = vmul.f32 -1.702, %v2513_v51 }
 0x263   : > { %1623 = vst [vmem:[%s2454_s12 + $0x40] sm:$0xff] %v1576_v3   ;;  %1825 = vrcp.f32 %v1066_v32  ;;  %v1077_v36 = vadd.f32 1.0, %v1806_v62  ;;  %v1808_v7 = vpop.eup %1807  ;;  %v1416_v4 = vmul.f32 -1.702, %v2517_v53 }
 0x264   : > { %1827 = vrcp.f32 %v1079_v6  ;;  %v1810_v1 = vpop.eup %1809  ;;  %v1055_v23 = vmul.f32 1.442695, %v1418_v8  ;;  %v1151_v21 = vmul.f32 %v1808_v7, %v2433_v50 }
 0x265   : > { %1829 = vrcp.f32 %v1077_v36  ;;  %v1812_v37 = vpop.eup %1811  ;;  %v1080_v0 = vadd.f32 1.0, %v1810_v1  ;;  %v1051_v46 = vmul.f32 1.442695, %v1416_v4 }
 0x266   : > { %1831 = vpow2.f32 %v1053_v17  ;;  %v1814_v61 = vpop.eup %1813  ;;  %v1078_v22 = vadd.f32 1.0, %v1812_v37 }
 0x267   : > { %1833 = vpow2.f32 %v1049_v33  ;;  %v1816_v2 = vpop.eup %1815  ;;  %v1071_v11 = vadd.f32 1.0, %v1814_v61 }
 0x268   : > { %1835 = vrcp.f32 %v1080_v0  ;;  %v1818_v26 = vpop.eup %1817  ;;  %v1069_v14 = vadd.f32 1.0, %v1816_v2 }
 0x269   : > { %1837 = vrcp.f32 %v1078_v22  ;;  %v1820_v63 = vpop.eup %1819  ;;  %v1072_v42 = vadd.f32 1.0, %v1818_v26 }
 0x26a   : > { %1839 = vrcp.f32 %v1071_v11  ;;  %v1822_v10 = vpop.eup %1821  ;;  %v1070_v43 = vadd.f32 1.0, %v1820_v63 }
 0x26b   : > { %1841 = vrcp.f32 %v1069_v14  ;;  %v1149_v27 = vmul.f32 %v1822_v10, %v2436_v56 }
 0x26c   : > { %v1824_v58 = vpop.eup %1823  ;;  %1843 = vrcp.f32 %v1072_v42 }
 0x26d   : > { %v1826_v38 = vpop.eup %1825  ;;  %v1152_v25 = vmul.f32 %v1824_v58, %v2442_v18  ;;  %1845 = vrcp.f32 %v1070_v43 }
 0x26e   : > { %v1828_v34 = vpop.eup %1827  ;;  %v1150_v19 = vmul.f32 %v1826_v38, %v2447_v15  ;;  %1847 = vpow2.f32 %v1055_v23 }
 0x26f   : > { %v1830_v47 = vpop.eup %1829  ;;  %v1561_v35 = vpack.c.bf16 %v1152_v25, %v1151_v21  ;;  %1849 = vpow2.f32 %v1051_v46  ;;  %v1163_v18 = vmul.f32 %v1828_v34, %v2458_v41 }
 0x270   : > { %v1832_v39 = vpop.eup %1831  ;;  %v1556_v40 = vpack.c.bf16 %v1150_v19, %v1149_v27  ;;  %v1161_v15 = vmul.f32 %v1830_v47, %v2461_v29 }
 0x271   : > { %v1834_v52 = vpop.eup %1833  ;;  %1620 = vst [vmem:[%s2454_s12 + $0x28] sm:$0xff] %v1561_v35   ;;  %v1083_v59 = vadd.f32 1.0, %v1832_v39 }
 0x272   : > { %v1836_v24 = vpop.eup %1835  ;;  %1619 = vst [vmem:[%s2454_s12 + $0x20] sm:$0xff] %v1556_v40   ;;  %v1081_v45 = vadd.f32 1.0, %v1834_v52 }
 0x273   : > { %v1838_v50 = vpop.eup %1837  ;;  %v1164_v31 = vmul.f32 %v1836_v24, %v2469_v49  ;;  %1851 = vrcp.f32 %v1083_v59 }
 0x274   : > { %v1840_v56 = vpop.eup %1839  ;;  %v1162_v12 = vmul.f32 %v1838_v50, %v2473_v30  ;;  %1853 = vrcp.f32 %v1081_v45 }
 0x275   : > { %v1842_v48 = vpop.eup %1841  ;;  %v1591_v9 = vpack.c.bf16 %v1164_v31, %v1163_v18  ;;  %v1155_v41 = vmul.f32 %v1840_v56, %v2478_v55 }
 0x276   : > { %v1844_v13 = vpop.eup %1843  ;;  %v1586_v16 = vpack.c.bf16 %v1162_v12, %v1161_v15  ;;  %v1153_v29 = vmul.f32 %v1842_v48, %v2481_v57 }
 0x277   : > { %v1846_v60 = vpop.eup %1845  ;;  %1626 = vst [vmem:[%s2454_s12 + $0x58] sm:$0xff] %v1591_v9   ;;  %v1156_v3 = vmul.f32 %v1844_v13, %v2485_v5 }
 0x278   : > { %v1848_v49 = vpop.eup %1847  ;;  %1625 = vst [vmem:[%s2454_s12 + $0x50] sm:$0xff] %v1586_v16   ;;  %v1154_v30 = vmul.f32 %v1846_v60, %v2491_v20 }
 0x279   : > { %v1850_v32 = vpop.eup %1849  ;;  %v1571_v54 = vpack.c.bf16 %v1156_v3, %v1155_v41  ;;  %v1084_v62 = vadd.f32 1.0, %v1848_v49 }
 0x27a   : > { %v1566_v6 = vpack.c.bf16 %v1154_v30, %v1153_v29  ;;  %v1082_v17 = vadd.f32 1.0, %v1850_v32 }
 0x27b   : > { %1622 = vst [vmem:[%s2454_s12 + $0x38] sm:$0xff] %v1571_v54   ;;  %1855 = vrcp.f32 %v1084_v62 }
 0x27c   : > { %1621 = vst [vmem:[%s2454_s12 + $0x30] sm:$0xff] %v1566_v6   ;;  %1857 = vrcp.f32 %v1082_v17 }
 0x27d   : > { %v1852_v55 = vpop.eup %1851 }
 0x27e   : > { %v1854_v5 = vpop.eup %1853  ;;  %v1167_v57 = vmul.f32 %v1852_v55, %v2501_v44 }
 0x27f   : > { %v1165_v7 = vmul.f32 %v1854_v5, %v2504_v28 }
 0x285   : > { %v1856_v36 = vpop.eup %1855 }
 0x286   : > { %v1858_v33 = vpop.eup %1857  ;;  %v1168_v20 = vmul.f32 %v1856_v36, %v2513_v51 }
 0x287   : > { %v1166_v1 = vmul.f32 %v1858_v33, %v2517_v53 }
 0x288   : > { %v1601_v37 = vpack.c.bf16 %v1168_v20, %v1167_v57 }
 0x289   : > { %v1596_v0 = vpack.c.bf16 %v1166_v1, %v1165_v7 }
 0x28a   : > { %1628 = vst [vmem:[%s2454_s12 + $0x68] sm:$0xff] %v1601_v37  }
 0x28b   : > { %1627 = vst [vmem:[%s2454_s12 + $0x60] sm:$0xff] %v1596_v0  }
 0x28c PF: > { %s15_s18 = sadd.s32 1, %s1865_s18  }
 0x28d   : > { %p12_p4 = scmp.ge.s32.totalorder %s15_s18, 5  }
 0x28f   :  { %14 = sbr.rel (!%p12_p4) target bundleno = 1 (0x1), region = 70 }

// kernel: s2_vision_tower_forward.11
= control target key start
LH: loop header
LB: loop body
LE: loop exit
PB: predicated region body
PF: predicated region fallthrough
CT: control target
= control target key end

     0   :  { %s1148_s15 = smov 0   ;;  %s1320_s0 = inlined_call_operand.vmem [shape: bf16[672,128], index: 0, kind: input, shape index: {}]   ;;  %s1321_s1 = inlined_call_operand.vmem [shape: bf16[128,32], index: 1, kind: input, shape index: {}]   ;;  %s1322_s2 = inlined_call_operand.vmem [shape: f32[1,32], index: 2, kind: input, shape index: {}]   ;;  %s1323_s3 = inlined_call_operand.vmem [shape: bf16[672,32], index: 3, kind: input, shape index: {}]   ;;  %s1324_s4 = inlined_call_operand.vmem [shape: bf16[672,32], index: 4, kind: output, shape index: {}]  }
   0x1 LB: > { %s845_s16 = sadd.s32 4294967295, %s1121_s15   ;;  %p849_p0 = scmp.ge.s32.totalorder %s1121_s15, 1  ;;  %s1121_s15 = sphi %s1148_s15, %s14_s15  }
   0x2   : > { %p174_p1 = scmp.lt.s32.totalorder %s1121_s15, 4 }
   0x4   : > { %p175_p2 = pnand %p849_p0, %p174_p1 }
   0x5   : > { %v1093_v0 = vld [vmem:[%s1321_s1] sm:$0xff] (!%p175_p2)   ;;  %s205_s19 = smul.u32 (!%p175_p2), 28, %s845_s16  ;;  %v1094_v1 = vld [vmem:[%s1321_s1 + $0x8] sm:$0xff] (!%p175_p2)   ;;  %v1095_v2 = vld [vmem:[%s1321_s1 + $0x10] sm:$0xff] (!%p175_p2)   ;;  %vm748_vm0 = vcmask (!%p175_p2), 257024  }
   0x6   : > { %178 = sbr.rel (%p175_p2) target bundleno = 284 (0x11c), region = 36  ;;  %1025 = vmatprep.subr.bf16.mxu0 (!%p175_p2), %v1093_v0  ;;  %1069 = vmatprep.subr.bf16.mxu1 (!%p175_p2), %v1093_v0  ;;  %v1096_v3 = vld [vmem:[%s1321_s1 + $0x18] sm:$0xff] (!%p175_p2)   ;;  %v1097_v6 = vld [vmem:[%s1321_s1 + $0x20] sm:$0xff] (!%p175_p2)   ;;  %v1098_v7 = vld [vmem:[%s1321_s1 + $0x28] sm:$0xff] (!%p175_p2)  }
   0x7   : > { %p206_p3 = scmp.lt.s32.totalorder (!%p175_p2), %s205_s19, 83  ;;  %1026 = vmatpush3.bf16.msra.mxu0 (!%p175_p2), %v1093_v0  ;;  %1077 = vmatpush3.bf16.msra.mxu1 (!%p175_p2), %v1093_v0  ;;  %v1099_v8 = vld [vmem:[%s1321_s1 + $0x30] sm:$0xff] (!%p175_p2)   ;;  %v1100_v9 = vld [vmem:[%s1321_s1 + $0x38] sm:$0xff] (!%p175_p2)   ;;  %v1215_v26 = vld [vmem:[%s1322_s2] ss:$0 sm:$0xff] (!%p175_p2) }
   0x8   : > { %1027 = vmatprep.subr.bf16.mxu0 (!%p175_p2), %v1094_v1  ;;  %1070 = vmatprep.subr.bf16.mxu1 (!%p175_p2), %v1094_v1 }
   0xb   : > { %1028 = vmatpush3.bf16.msra.mxu0 (!%p175_p2), %v1094_v1  ;;  %1078 = vmatpush3.bf16.msra.mxu1 (!%p175_p2), %v1094_v1 }
   0xc   : > { %1029 = vmatprep.subr.bf16.mxu0 (!%p175_p2), %v1095_v2  ;;  %1071 = vmatprep.subr.bf16.mxu1 (!%p175_p2), %v1095_v2 }
   0xd   : > { %s1326_s19 = smov (!%p206_p3, %s205_s19), 83 }
   0xe   : > { %s1165_s24 = sshll.u32 %s1326_s19, 2 }
   0xf   : > { %s1174_s29 = scalar_lea.vmem %s1320_s0, %s1165_s24  ;;  %1030 = vmatpush3.bf16.msra.mxu0 %v1095_v2  ;;  %1079 = vmatpush3.bf16.msra.mxu1 %v1095_v2  ;;  %s1206_s14 = scalar_lea.vmem %s1323_s3, %s1165_s24 }
  0x10   : > { %v1101_v4 = vld [vmem:[%s1174_s29] sm:$0xff]   ;;  %1031 = vmatprep.subr.bf16.mxu0 %v1096_v3  ;;  %1072 = vmatprep.subr.bf16.mxu1 %v1096_v3  ;;  %v1102_v10 = vld [vmem:[%s1174_s29 + $0x8] sm:$0xff]   ;;  %v1105_v12 = vld [vmem:[%s1174_s29 + $0x10] sm:$0xff]   ;;  %s1227_s20 = scalar_lea.vmem %s1324_s4, %s1165_s24 }
  0x11   : > { %1041 = vmatprep.mubr.bf16.mxu0 %v1101_v4  ;;  %v1103_v5 = vld [vmem:[%s1174_s29 + $0x40] sm:$0xff]   ;;  %v1104_v11 = vld [vmem:[%s1174_s29 + $0x48] sm:$0xff]   ;;  %v1107_v13 = vld [vmem:[%s1174_s29 + $0x50] sm:$0xff]  }
  0x12   : > { %1057 = vmatprep.mubr.bf16.mxu1 %v1103_v5  ;;  %v1106_v14 = vld [vmem:[%s1174_s29 + $0x18] sm:$0xff]   ;;  %v1109_v16 = vld [vmem:[%s1174_s29 + $0x20] sm:$0xff]   ;;  %v1110_v18 = vld [vmem:[%s1174_s29 + $0x28] sm:$0xff]  }
  0x13   : > { %1032 = vmatpush3.bf16.msra.mxu0 %v1096_v3  ;;  %1080 = vmatpush3.bf16.msra.mxu1 %v1096_v3  ;;  %v1108_v15 = vld [vmem:[%s1174_s29 + $0x58] sm:$0xff]   ;;  %v1111_v17 = vld [vmem:[%s1174_s29 + $0x60] sm:$0xff]   ;;  %v1112_v19 = vld [vmem:[%s1174_s29 + $0x68] sm:$0xff]  }
  0x14   : > { %1033 = vmatprep.subr.bf16.mxu0 %v1097_v6  ;;  %1073 = vmatprep.subr.bf16.mxu1 %v1097_v6  ;;  %v1113_v20 = vld [vmem:[%s1174_s29 + $0x30] sm:$0xff]   ;;  %v1114_v21 = vld [vmem:[%s1174_s29 + $0x38] sm:$0xff]   ;;  %v990_v22 = vld [vmem:[%s1206_s14 + $0x8] sm:$0xff]  }
  0x15   : > { %v998_v23 = vld [vmem:[%s1206_s14 + $0x48] sm:$0xff]   ;;  %v935_v24 = vld [vmem:[%s1206_s14] sm:$0xff]   ;;  %v940_v27 = vunpack.c.l.bf16 %v990_v22  ;;  %v941_v31 = vunpack.c.h.bf16 %v990_v22  ;;  %v992_v54 = vld [vmem:[%s1206_s14 + $0x18] sm:$0xff]  }
  0x16   : > { %v997_v25 = vld [vmem:[%s1206_s14 + $0x40] sm:$0xff]   ;;  %v972_v28 = vunpack.c.l.bf16 %v998_v23  ;;  %v936_v30 = vunpack.c.l.bf16 %v935_v24  ;;  %v937_v36 = vunpack.c.h.bf16 %v935_v24  ;;  %v973_v39 = vunpack.c.h.bf16 %v998_v23  ;;  %v1000_v56 = vld [vmem:[%s1206_s14 + $0x58] sm:$0xff]   ;;  %v991_v61 = vld [vmem:[%s1206_s14 + $0x10] sm:$0xff]  }
  0x17   : > { %1034 = vmatpush3.bf16.msra.mxu0 %v1097_v6  ;;  %1081 = vmatpush3.bf16.msra.mxu1 %v1097_v6  ;;  %v968_v33 = vunpack.c.l.bf16 %v997_v25  ;;  %v969_v44 = vunpack.c.h.bf16 %v997_v25  ;;  %v999_v62 = vld [vmem:[%s1206_s14 + $0x50] sm:$0xff]   ;;  %v948_v5 = vunpack.c.l.bf16 %v992_v54  ;;  %v980_v6 = vunpack.c.l.bf16 %v1000_v56 }
  0x18   : > { %1035 = vmatprep.subr.bf16.mxu0 %v1098_v7  ;;  %1074 = vmatprep.subr.bf16.mxu1 %v1098_v7  ;;  %v977_v24 = vunpack.c.h.bf16 %v999_v62 }
  0x1b   : > { %1036 = vmatpush3.bf16.msra.mxu0 %v1098_v7  ;;  %1082 = vmatpush3.bf16.msra.mxu1 %v1098_v7 }
  0x1c   : > { %1037 = vmatprep.subr.bf16.mxu0 %v1099_v8  ;;  %1075 = vmatprep.subr.bf16.mxu1 %v1099_v8 }
  0x1f   : > { %1038 = vmatpush3.bf16.msra.mxu0 %v1099_v8  ;;  %1083 = vmatpush3.bf16.msra.mxu1 %v1099_v8 }
  0x20   : > { %1039 = vmatprep.subr.bf16.mxu0 %v1100_v9  ;;  %1076 = vmatprep.subr.bf16.mxu1 %v1100_v9 }
  0x23   : > { %1040 = vmatpush3.bf16.msra.mxu0 %v1100_v9  ;;  %1084 = vmatpush3.bf16.msra.mxu1 %v1100_v9 }
  0x26   : > { %1042 = vmatmul.mubr.bf16.vlgmr.msra.gmra.mrb[0].mxu0 %v1102_v10  ;;  %1058 = vmatmul.mubr.bf16.vlgmr.msra.gmra.mrb[0].mxu1 %v1104_v11  ;;  %v944_v10 = vunpack.c.l.bf16 %v991_v61 }
  0x27   : > { %1045 = vmatprep.mubr.bf16.mxu0 %v1105_v12  ;;  %1061 = vmatprep.mubr.bf16.mxu1 %v1107_v13  ;;  %v976_v12 = vunpack.c.l.bf16 %v999_v62 }
  0x2e   : > { %1046 = vmatmul.mubr.bf16.gmra.mrb[4].mxu0 %v1106_v14  ;;  %1062 = vmatmul.mubr.bf16.gmra.mrb[4].mxu1 %v1108_v15  ;;  %v949_v15 = vunpack.c.h.bf16 %v992_v54 }
  0x2f   : > { %1049 = vmatprep.mubr.bf16.mxu0 %v1109_v16  ;;  %1065 = vmatprep.mubr.bf16.mxu1 %v1111_v17 }
  0x36   : > { %1050 = vmatmul.mubr.bf16.gmra.mrb[8].mxu0 %v1110_v18  ;;  %1066 = vmatmul.mubr.bf16.gmra.mrb[8].mxu1 %v1112_v19  ;;  %v981_v18 = vunpack.c.h.bf16 %v1000_v56 }
  0x37   : > { %1053 = vmatprep.mubr.bf16.mxu0 %v1113_v20 }
  0x3e   : > { %1054 = vmatmul.mubr.bf16.gmra.mrb[12].mxu0 %v1114_v21  ;;  %v945_v21 = vunpack.c.h.bf16 %v991_v61 }
  0xf9   : > { %v1043_v29 = vpop.f32.mrb[0].mxu0  ;;  %v1059_v32 = vpop.f32.mrb[0].mxu1 }
  0xfa   : > { %v450_v34 = vadd.f32 %v1043_v29, %v1215_v26  ;;  %v441_v35 = vpop.f32.mrb[1].mxu0  ;;  %v514_v37 = vadd.f32 %v1059_v32, %v1215_v26  ;;  %v505_v38 = vpop.f32.mrb[1].mxu1 }
  0xfb   : > { %v442_v40 = vadd.f32 %v1215_v26, %v441_v35  ;;  %v1044_v41 = vpop.f32.mrb[2].mxu0  ;;  %v506_v42 = vadd.f32 %v1215_v26, %v505_v38  ;;  %v1060_v43 = vpop.f32.mrb[2].mxu1  ;;  %v994_v35 = vld [vmem:[%s1206_s14 + $0x28] sm:$0xff]  }
  0xfc   : > { %v610_v45 = vadd.f32 %v940_v27, %v450_v34  ;;  %v453_v46 = vadd.f32 %v1044_v41, %v1215_v26  ;;  %v444_v47 = vpop.f32.mrb[3].mxu0  ;;  %v626_v48 = vadd.f32 %v972_v28, %v514_v37  ;;  %v517_v49 = vadd.f32 %v1060_v43, %v1215_v26  ;;  %v508_v50 = vpop.f32.mrb[3].mxu1  ;;  %v1002_v37 = vld [vmem:[%s1206_s14 + $0x68] sm:$0xff]   ;;  %v1001_v43 = vld [vmem:[%s1206_s14 + $0x60] sm:$0xff]  }
  0xfd   : > { %v608_v51 = vadd.f32 %v936_v30, %v442_v40  ;;  %v445_v52 = vadd.f32 %v1215_v26, %v444_v47  ;;  %v624_v53 = vadd.f32 %v968_v33, %v506_v42  ;;  %v509_v55 = vadd.f32 %v1215_v26, %v508_v50  ;;  %v993_v42 = vld [vmem:[%s1206_s14 + $0x20] sm:$0xff]  }
  0xfe   : > { %v908_v57 = vpack.c.bf16 %v610_v45, %v610_v45  ;;  %v611_v58 = vadd.f32 %v941_v31, %v453_v46  ;;  %v924_v59 = vpack.c.bf16 %v626_v48, %v626_v48  ;;  %v627_v60 = vadd.f32 %v973_v39, %v517_v49 }
  0xff   : > { %v906_v63 = vpack.c.bf16 %v608_v51, %v608_v51  ;;  %v609_v0 = vadd.f32 %v937_v36, %v445_v52  ;;  %v922_v1 = vpack.c.bf16 %v624_v53, %v624_v53  ;;  %v625_v2 = vadd.f32 %v969_v44, %v509_v55 }
 0x100   : > { %751 = vst.msk [vmem:[%s1227_s20 + $0x8] sm:$0xf] %vm748_vm0, %v908_v57  ;;  %v909_v3 = vpack.c.bf16 %v611_v58, %v611_v58  ;;  %767 = vst.msk [vmem:[%s1227_s20 + $0x48] sm:$0xf] %vm748_vm0, %v924_v59  ;;  %v925_v4 = vpack.c.bf16 %v627_v60, %v627_v60  ;;  %v956_v50 = vunpack.c.l.bf16 %v994_v35  ;;  %v988_v51 = vunpack.c.l.bf16 %v1002_v37 }
 0x101   : > { %749 = vst.msk [vmem:[%s1227_s20] sm:$0xf] %vm748_vm0, %v906_v63  ;;  %v907_v7 = vpack.c.bf16 %v609_v0, %v609_v0  ;;  %765 = vst.msk [vmem:[%s1227_s20 + $0x40] sm:$0xf] %vm748_vm0, %v922_v1  ;;  %v1047_v8 = vpop.f32.mrb[4].mxu0  ;;  %v923_v9 = vpack.c.bf16 %v625_v2, %v625_v2  ;;  %v1063_v11 = vpop.f32.mrb[4].mxu1  ;;  %v952_v55 = vunpack.c.l.bf16 %v993_v42  ;;  %v984_v57 = vunpack.c.l.bf16 %v1001_v43 }
 0x102   : > { %752 = vst.msk [vmem:[%s1227_s20 + $0xc] sm:$0xf] %vm748_vm0, %v909_v3  ;;  %768 = vst.msk [vmem:[%s1227_s20 + $0x4c] sm:$0xf] %vm748_vm0, %v925_v4  ;;  %v466_v13 = vadd.f32 %v1047_v8, %v1215_v26  ;;  %v457_v14 = vpop.f32.mrb[5].mxu0  ;;  %v530_v16 = vadd.f32 %v1063_v11, %v1215_v26  ;;  %v521_v17 = vpop.f32.mrb[5].mxu1  ;;  %v957_v60 = vunpack.c.h.bf16 %v994_v35  ;;  %v989_v63 = vunpack.c.h.bf16 %v1002_v37 }
 0x103   : > { %750 = vst.msk [vmem:[%s1227_s20 + $0x4] sm:$0xf] %vm748_vm0, %v907_v7  ;;  %766 = vst.msk [vmem:[%s1227_s20 + $0x44] sm:$0xf] %vm748_vm0, %v923_v9  ;;  %v458_v19 = vadd.f32 %v1215_v26, %v457_v14  ;;  %v1048_v20 = vpop.f32.mrb[6].mxu0  ;;  %v522_v22 = vadd.f32 %v1215_v26, %v521_v17  ;;  %v1064_v23 = vpop.f32.mrb[6].mxu1  ;;  %v953_v2 = vunpack.c.h.bf16 %v993_v42 }
 0x104   : > { %v614_v25 = vadd.f32 %v948_v5, %v466_v13  ;;  %v469_v27 = vadd.f32 %v1048_v20, %v1215_v26  ;;  %v460_v28 = vpop.f32.mrb[7].mxu0  ;;  %v630_v29 = vadd.f32 %v980_v6, %v530_v16  ;;  %v533_v30 = vadd.f32 %v1064_v23, %v1215_v26  ;;  %v524_v31 = vpop.f32.mrb[7].mxu1 }
 0x105   : > { %v612_v32 = vadd.f32 %v944_v10, %v458_v19  ;;  %v461_v33 = vadd.f32 %v1215_v26, %v460_v28  ;;  %v628_v34 = vadd.f32 %v976_v12, %v522_v22  ;;  %v525_v36 = vadd.f32 %v1215_v26, %v524_v31 }
 0x106   : > { %v912_v38 = vpack.c.bf16 %v614_v25, %v614_v25  ;;  %v615_v39 = vadd.f32 %v949_v15, %v469_v27  ;;  %v928_v40 = vpack.c.bf16 %v630_v29, %v630_v29  ;;  %v631_v41 = vadd.f32 %v981_v18, %v533_v30  ;;  %v996_v15 = vld [vmem:[%s1206_s14 + $0x38] sm:$0xff]  }
 0x107   : > { %v910_v44 = vpack.c.bf16 %v612_v32, %v612_v32  ;;  %v613_v45 = vadd.f32 %v945_v21, %v461_v33  ;;  %v926_v46 = vpack.c.bf16 %v628_v34, %v628_v34  ;;  %v629_v47 = vadd.f32 %v977_v24, %v525_v36  ;;  %v995_v21 = vld [vmem:[%s1206_s14 + $0x30] sm:$0xff]  }
 0x108   : > { %755 = vst.msk [vmem:[%s1227_s20 + $0x18] sm:$0xf] %vm748_vm0, %v912_v38  ;;  %v913_v48 = vpack.c.bf16 %v615_v39, %v615_v39  ;;  %771 = vst.msk [vmem:[%s1227_s20 + $0x58] sm:$0xf] %vm748_vm0, %v928_v40  ;;  %v929_v49 = vpack.c.bf16 %v631_v41, %v631_v41  ;;  %v985_v5 = vunpack.c.h.bf16 %v1001_v43  ;;  %v964_v29 = vunpack.c.l.bf16 %v996_v15 }
 0x109   : > { %753 = vst.msk [vmem:[%s1227_s20 + $0x10] sm:$0xf] %vm748_vm0, %v910_v44  ;;  %v911_v52 = vpack.c.bf16 %v613_v45, %v613_v45  ;;  %769 = vst.msk [vmem:[%s1227_s20 + $0x50] sm:$0xf] %vm748_vm0, %v926_v46  ;;  %v1051_v53 = vpop.f32.mrb[8].mxu0  ;;  %v927_v54 = vpack.c.bf16 %v629_v47, %v629_v47  ;;  %v1067_v56 = vpop.f32.mrb[8].mxu1  ;;  %v960_v33 = vunpack.c.l.bf16 %v995_v21  ;;  %v965_v36 = vunpack.c.h.bf16 %v996_v15 }
 0x10a   : > { %756 = vst.msk [vmem:[%s1227_s20 + $0x1c] sm:$0xf] %vm748_vm0, %v913_v48  ;;  %772 = vst.msk [vmem:[%s1227_s20 + $0x5c] sm:$0xf] %vm748_vm0, %v929_v49  ;;  %v482_v58 = vadd.f32 %v1051_v53, %v1215_v26  ;;  %v473_v59 = vpop.f32.mrb[9].mxu0  ;;  %v546_v61 = vadd.f32 %v1067_v56, %v1215_v26  ;;  %v537_v62 = vpop.f32.mrb[9].mxu1  ;;  %v961_v39 = vunpack.c.h.bf16 %v995_v21 }
 0x10b   : > { %754 = vst.msk [vmem:[%s1227_s20 + $0x14] sm:$0xf] %vm748_vm0, %v911_v52  ;;  %770 = vst.msk [vmem:[%s1227_s20 + $0x54] sm:$0xf] %vm748_vm0, %v927_v54  ;;  %v474_v0 = vadd.f32 %v1215_v26, %v473_v59  ;;  %v1052_v1 = vpop.f32.mrb[10].mxu0  ;;  %v538_v3 = vadd.f32 %v1215_v26, %v537_v62  ;;  %v1068_v4 = vpop.f32.mrb[10].mxu1 }
 0x10c   : > { %v618_v6 = vadd.f32 %v956_v50, %v482_v58  ;;  %v485_v7 = vadd.f32 %v1052_v1, %v1215_v26  ;;  %v476_v8 = vpop.f32.mrb[11].mxu0  ;;  %v634_v9 = vadd.f32 %v988_v51, %v546_v61  ;;  %v549_v10 = vadd.f32 %v1068_v4, %v1215_v26  ;;  %v540_v11 = vpop.f32.mrb[11].mxu1 }
 0x10d   : > { %v616_v12 = vadd.f32 %v952_v55, %v474_v0  ;;  %v477_v13 = vadd.f32 %v1215_v26, %v476_v8  ;;  %v632_v14 = vadd.f32 %v984_v57, %v538_v3  ;;  %v541_v16 = vadd.f32 %v1215_v26, %v540_v11 }
 0x10e   : > { %v916_v17 = vpack.c.bf16 %v618_v6, %v618_v6  ;;  %v619_v18 = vadd.f32 %v957_v60, %v485_v7  ;;  %v932_v19 = vpack.c.bf16 %v634_v9, %v634_v9  ;;  %v635_v20 = vadd.f32 %v989_v63, %v549_v10 }
 0x10f   : > { %v914_v22 = vpack.c.bf16 %v616_v12, %v616_v12  ;;  %v617_v23 = vadd.f32 %v953_v2, %v477_v13  ;;  %v930_v24 = vpack.c.bf16 %v632_v14, %v632_v14  ;;  %v633_v25 = vadd.f32 %v985_v5, %v541_v16 }
 0x110   : > { %759 = vst.msk [vmem:[%s1227_s20 + $0x28] sm:$0xf] %vm748_vm0, %v916_v17  ;;  %v917_v27 = vpack.c.bf16 %v619_v18, %v619_v18  ;;  %775 = vst.msk [vmem:[%s1227_s20 + $0x68] sm:$0xf] %vm748_vm0, %v932_v19  ;;  %v933_v28 = vpack.c.bf16 %v635_v20, %v635_v20 }
 0x111   : > { %757 = vst.msk [vmem:[%s1227_s20 + $0x20] sm:$0xf] %vm748_vm0, %v914_v22  ;;  %v915_v30 = vpack.c.bf16 %v617_v23, %v617_v23  ;;  %773 = vst.msk [vmem:[%s1227_s20 + $0x60] sm:$0xf] %vm748_vm0, %v930_v24  ;;  %v1055_v31 = vpop.f32.mrb[12].mxu0  ;;  %v931_v32 = vpack.c.bf16 %v633_v25, %v633_v25 }
 0x112   : > { %760 = vst.msk [vmem:[%s1227_s20 + $0x2c] sm:$0xf] %vm748_vm0, %v917_v27  ;;  %776 = vst.msk [vmem:[%s1227_s20 + $0x6c] sm:$0xf] %vm748_vm0, %v933_v28  ;;  %v498_v34 = vadd.f32 %v1055_v31, %v1215_v26  ;;  %v489_v35 = vpop.f32.mrb[13].mxu0 }
 0x113   : > { %758 = vst.msk [vmem:[%s1227_s20 + $0x24] sm:$0xf] %vm748_vm0, %v915_v30  ;;  %774 = vst.msk [vmem:[%s1227_s20 + $0x64] sm:$0xf] %vm748_vm0, %v931_v32  ;;  %v490_v37 = vadd.f32 %v1215_v26, %v489_v35  ;;  %v1056_v38 = vpop.f32.mrb[14].mxu0 }
 0x114   : > { %v622_v40 = vadd.f32 %v964_v29, %v498_v34  ;;  %v501_v41 = vadd.f32 %v1056_v38, %v1215_v26  ;;  %v492_v42 = vpop.f32.mrb[15].mxu0 }
 0x115   : > { %v620_v43 = vadd.f32 %v960_v33, %v490_v37  ;;  %v493_v44 = vadd.f32 %v1215_v26, %v492_v42 }
 0x116   : > { %v920_v45 = vpack.c.bf16 %v622_v40, %v622_v40  ;;  %v623_v46 = vadd.f32 %v965_v36, %v501_v41 }
 0x117   : > { %v918_v47 = vpack.c.bf16 %v620_v43, %v620_v43  ;;  %v621_v48 = vadd.f32 %v961_v39, %v493_v44 }
 0x118   : > { %763 = vst.msk [vmem:[%s1227_s20 + $0x38] sm:$0xf] %vm748_vm0, %v920_v45  ;;  %v921_v49 = vpack.c.bf16 %v623_v46, %v623_v46 }
 0x119   : > { %761 = vst.msk [vmem:[%s1227_s20 + $0x30] sm:$0xf] %vm748_vm0, %v918_v47  ;;  %v919_v50 = vpack.c.bf16 %v621_v48, %v621_v48 }
 0x11a   : > { %764 = vst.msk [vmem:[%s1227_s20 + $0x3c] sm:$0xf] %vm748_vm0, %v921_v49 }
 0x11b   : > { %762 = vst.msk [vmem:[%s1227_s20 + $0x34] sm:$0xf] %vm748_vm0, %v919_v50 }
 0x11c PF: > { %s14_s15 = sadd.s32 1, %s1121_s15  }
 0x11d   : > { %p11_p4 = scmp.ge.s32.totalorder %s14_s15, 5  }
 0x11f   :  { %13 = sbr.rel (!%p11_p4) target bundleno = 1 (0x1), region = 69 }

</bundles_post_ra>
